<compile_context>
chip_gen: v5e
topology: v5e:2x2
jax: 0.10.0
libtpu: 0.0.40
codegen_flags: <defaults>
</compile_context>

<pallas_src>
import functools

import jax
import jax.numpy as jnp
from jax.experimental import pallas as pl
from jax.experimental.pallas import tpu as pltpu


_VMEM_LIMIT = 32 * 1024 * 1024      # explicit scoped-VMEM budget (all gens, <= v7x limit)
_BLOCK_BUDGET = 18 * 1024 * 1024    # target bytes for streamed blocks (incl. 2x buffering)


def _round_up(x, m):
    return (x + m - 1) // m * m


def _pick_rows(M, per_row_bytes, fixed_bytes):
    """Row-tile size: fit the lane-padded, double-buffered footprint in budget,
    keep >= ~8 grid steps when M is large (v7x 2-TC sharding / pipelining)."""
    avail = max(_BLOCK_BUDGET - fixed_bytes, 1 << 20)
    t = max(16, min(avail // max(per_row_bytes, 1), 4096))
    t = min(t, max(256, 16 * pl.cdiv(pl.cdiv(M, 8), 16)))
    t = int(max(16, t - (t % 16)))
    return M if M <= t else t


# ----------------------------- Pallas kernels ------------------------------

def _conv_mm_kernel(ncand, a_ref, w_ref, b_ref, o_ref):
    # Fused: MXU matmul (f32 acc) + bias + ReLU, then (optionally) a 2x2
    # max-pool realized as a max over `ncand` lane groups of the output.
    acc = jnp.dot(a_ref[...], w_ref[...], preferred_element_type=jnp.float32)
    acc = jnp.maximum(acc + b_ref[...], 0.0)
    width = o_ref.shape[-1]
    y = acc[:, :width]
    for q in range(1, ncand):
        y = jnp.maximum(y, acc[:, q * width:(q + 1) * width])
    o_ref[...] = y.astype(o_ref.dtype)


def _conv_matmul(a, w, b, ncand, out_width, out_dtype=jnp.bfloat16):
    """relu(a @ w + b), then max over `ncand` output-column groups.
    a: (M, K) bf16, w: (K, ncand*out_width) bf16, b: (ncand*out_width,) f32."""
    M, K = a.shape
    Nw = w.shape[1]
    assert Nw == ncand * out_width
    per_row = (_round_up(K, 128) * 2 * 2            # A block, bf16, 2 buffers
               + _round_up(out_width, 128) * 2 * 2  # out block, bf16, 2 buffers
               + _round_up(Nw, 128) * 4)            # f32 accumulator value
    fixed = _round_up(Nw, 128) * _round_up(K, 16) * 2 * 2   # resident weights
    tm = _pick_rows(M, per_row, fixed)
    kernel = functools.partial(_conv_mm_kernel, ncand)
    return pl.pallas_call(
        kernel,
        out_shape=jax.ShapeDtypeStruct((M, out_width), out_dtype),
        grid_spec=pltpu.PrefetchScalarGridSpec(
            num_scalar_prefetch=0,
            grid=(pl.cdiv(M, tm),),
            in_specs=[
                pl.BlockSpec((tm, K), lambda i: (i, 0)),
                pl.BlockSpec((K, Nw), lambda i: (0, 0)),
                pl.BlockSpec((1, Nw), lambda i: (0, 0)),
            ],
            out_specs=pl.BlockSpec((tm, out_width), lambda i: (i, 0)),
        ),
        compiler_params=pltpu.CompilerParams(
            dimension_semantics=("parallel",),
            vmem_limit_bytes=_VMEM_LIMIT),
    )(a, w, b.reshape(1, Nw))


def _gap_fc_relu_kernel(f_ref, w_ref, b_ref, o_ref):
    # Global-average-pool in f32, bf16 MXU matmul, f32 bias + ReLU.
    f = jnp.mean(f_ref[...].astype(jnp.float32), axis=1)          # (tn, C)
    o = jnp.dot(f.astype(jnp.bfloat16), w_ref[...],
                preferred_element_type=jnp.float32) + b_ref[...]
    o_ref[...] = jnp.maximum(o, 0.0)


def gap_fc_relu(feats, w, b):
    """AdaptiveAvgPool2d((1,1)) + Linear + ReLU; feats: (N, S, C) bf16."""
    N, S, C = feats.shape
    Cout = w.shape[1]
    tn = min(N, 64)
    return pl.pallas_call(
        _gap_fc_relu_kernel,
        out_shape=jax.ShapeDtypeStruct((N, Cout), jnp.float32),
        grid_spec=pltpu.PrefetchScalarGridSpec(
            num_scalar_prefetch=0,
            grid=(pl.cdiv(N, tn),),
            in_specs=[
                pl.BlockSpec((tn, S, C), lambda i: (i, 0, 0)),
                pl.BlockSpec((C, Cout), lambda i: (0, 0)),
                pl.BlockSpec((1, Cout), lambda i: (0, 0)),
            ],
            out_specs=pl.BlockSpec((tn, Cout), lambda i: (i, 0)),
        ),
        compiler_params=pltpu.CompilerParams(
            dimension_semantics=("parallel",),
            vmem_limit_bytes=_VMEM_LIMIT),
    )(feats, w.astype(jnp.bfloat16), b.astype(jnp.float32).reshape(1, Cout))


# ------------------------------ JAX glue ------------------------------------
# TODO(synk): patch extraction (strided slices + concat) stays in XLA; a fully
# in-kernel im2col for Cin=3 needs ~5+ lane-gather/concat ops per output row,
# which costs more than the (already shrunk) HBM patch matrix it would remove.

def conv_relu_pool(x, wgt, b, *, k, pad, colpack=1):
    """Conv2d(k, stride=2, padding=pad) + ReLU + MaxPool2d(2), fused.

    The 2x2 pooling window and `colpack` adjacent pooled columns are packed into
    the matmul's N dimension with a zero-padded weight matrix, so the HBM patch
    matrix is built at pooled resolution and the full-res conv output never
    touches HBM.  x: (N, H, W, Cin) bf16 NHWC; wgt: (k, k, Cin, Cout) HWIO."""
    N, H, W, Cin = x.shape
    Cout = wgt.shape[-1]
    Ho = (H + 2 * pad - k) // 2 + 1
    Wo = (W + 2 * pad - k) // 2 + 1
    Hp2, Wp2 = Ho // 2, Wo // 2                 # floor-mode MaxPool2d(2)
    p = max(1, colpack)
    while Wp2 % p:
        p //= 2
    Wg = Wp2 // p
    Dr, Dc = k + 2, 4 * p + k - 2               # patch extent per packed A row

    # Patch (im2col-at-pooled-granularity) matrix: one row per (n, h2, col grp).
    xp = jnp.pad(x, ((0, 0), (pad, pad), (pad, pad), (0, 0)))
    taps = []
    for di in range(Dr):
        for dj in range(Dc):
            taps.append(xp[:, di:di + 4 * Hp2:4, dj:dj + 4 * p * Wg:4 * p, :])
    a = jnp.concatenate(taps, axis=-1)
    a = a.reshape(N * Hp2 * Wg, Dr * Dc * Cin).astype(jnp.bfloat16)

    # Packed weights: output columns ordered (hp, wp, t, cout); entries outside
    # the k x k support of each (hp, wp, t) pool candidate are zero.
    pieces = []
    for hp in (0, 1):
        for wp in (0, 1):
            for t in range(p):
                ro, cs = 2 * hp, 4 * t + 2 * wp
                pieces.append(jnp.pad(
                    wgt, ((ro, Dr - k - ro), (cs, Dc - k - cs), (0, 0), (0, 0))))
    w_packed = jnp.stack(pieces, axis=3).reshape(Dr * Dc * Cin, 4 * p * Cout)
    b_packed = jnp.tile(b.astype(jnp.float32), 4 * p)

    out = _conv_matmul(a, w_packed.astype(jnp.bfloat16), b_packed,
                       ncand=4, out_width=p * Cout)
    return out.reshape(N, Hp2, Wp2, Cout)


def conv_relu(x, wgt, b, *, k, pad):
    """Conv2d(k, stride=2, padding=pad) + ReLU via patch matmul (no pooling)."""
    N, H, W, Cin = x.shape
    Cout = wgt.shape[-1]
    Ho = (H + 2 * pad - k) // 2 + 1
    Wo = (W + 2 * pad - k) // 2 + 1
    xp = jnp.pad(x, ((0, 0), (pad, pad), (pad, pad), (0, 0)))
    taps = []
    for di in range(k):
        for dj in range(k):
            taps.append(xp[:, di:di + 2 * Ho:2, dj:dj + 2 * Wo:2, :])
    a = jnp.concatenate(taps, axis=-1)
    a = a.reshape(N * Ho * Wo, k * k * Cin).astype(jnp.bfloat16)
    wm = wgt.reshape(k * k * Cin, Cout).astype(jnp.bfloat16)
    out = _conv_matmul(a, wm, b.astype(jnp.float32), ncand=1, out_width=Cout)
    return out.reshape(N, Ho, Wo, Cout)


def init_params(key, out_dim=128):
    ks = jax.random.split(key, 8)

    def conv_w(kk, ksz, cin, cout):
        fan_in = ksz * ksz * cin
        return jax.random.normal(kk, (ksz, ksz, cin, cout), jnp.float32) * \
            (2.0 / fan_in) ** 0.5

    return {
        "w1": conv_w(ks[0], 5, 3, 32),
        "b1": jax.random.normal(ks[1], (32,), jnp.float32) * 0.01,
        "w2": conv_w(ks[2], 3, 32, 64),
        "b2": jax.random.normal(ks[3], (64,), jnp.float32) * 0.01,
        "w3": conv_w(ks[4], 3, 64, 128),
        "b3": jax.random.normal(ks[5], (128,), jnp.float32) * 0.01,
        "wfc": jax.random.normal(ks[6], (128, out_dim), jnp.float32) *
               (1.0 / 128.0) ** 0.5,
        "bfc": jax.random.normal(ks[7], (out_dim,), jnp.float32) * 0.01,
    }


def image_feature_extractor_simple(params, x_nchw):
    """x_nchw: (N, 3, H, W) -> (N, out_dim) float32.
    Note: bf16 activations/weights (f32 accumulation) — expect ~1e-2 relative
    divergence vs. a float32 PyTorch reference."""
    x = jnp.transpose(x_nchw, (0, 2, 3, 1)).astype(jnp.bfloat16)   # NCHW->NHWC
    x = conv_relu_pool(x, params["w1"], params["b1"], k=5, pad=2, colpack=4)
    x = conv_relu_pool(x, params["w2"], params["b2"], k=3, pad=1, colpack=1)
    x = conv_relu(x, params["w3"], params["b3"], k=3, pad=1)
    N, Hf, Wf, C = x.shape
    feats = x.reshape(N, Hf * Wf, C)
    return gap_fc_relu(feats, params["wfc"], params["bfc"])


if __name__ == "__main__":
    key = jax.random.PRNGKey(0)
    pkey, xkey = jax.random.split(key)
    params = init_params(pkey, out_dim=128)
    # Small shape consistent with the module: NCHW, 3 channels, spatial 64
    # (total downsample factor 32; the module's nominal input is (N,3,360,640)).
    x = jax.random.normal(xkey, (2, 3, 64, 64), jnp.float32)
    fwd = jax.jit(functools.partial(image_feature_extractor_simple, params))
    out = jax.block_until_ready(fwd(x))
    assert out.shape == (2, 128), out.shape
    assert bool(jnp.all(jnp.isfinite(out)))
    assert bool(jnp.all(out >= 0.0))  # final ReLU
    print("KERNEL_OK")
</pallas_src>

<mosaic_0001>
module attributes {stable_mosaic.version = 11 : i64} {
  func.func @_conv_mm_kernel(%arg0: i32, %arg1: memref<128x399xbf16, #tpu.memory_space<vmem>>, %arg2: memref<399x512xbf16, #tpu.memory_space<vmem>>, %arg3: memref<1x512xf32, #tpu.memory_space<vmem>>, %arg4: memref<128x128xbf16, #tpu.memory_space<vmem>>) attributes {dimension_semantics = [#tpu.dimension_semantics<parallel>], iteration_bounds = array<i64: 1>, scalar_prefetch = 0 : i64, scratch_operands = 0 : i64, tpu.core_type = #tpu.core_type<tc>, window_params = [{transform_indices = @transform_0, window_bounds = array<i64: 128, 399>}, {pipeline_mode = #tpu.pipeline_mode<synchronous>, transform_indices = @transform_1, window_bounds = array<i64: 399, 512>}, {pipeline_mode = #tpu.pipeline_mode<synchronous>, transform_indices = @transform_2, window_bounds = array<i64: 1, 512>}, {transform_indices = @transform_3, window_bounds = array<i64: 128, 128>}]} {
    %c0 = arith.constant 0 : index
    %c0_0 = arith.constant 0 : index
    %0 = vector.load %arg1[%c0, %c0_0] : memref<128x399xbf16, #tpu.memory_space<vmem>>, vector<128x399xbf16>
    %c0_1 = arith.constant 0 : index
    %c0_2 = arith.constant 0 : index
    %1 = vector.load %arg2[%c0_1, %c0_2] : memref<399x512xbf16, #tpu.memory_space<vmem>>, vector<399x512xbf16>
    %cst = arith.constant dense<0.000000e+00> : vector<128x512xf32>
    %2 = tpu.matmul %0, %1, %cst {dimension_numbers = #tpu.dot_dimension_numbers<[1], [0], [0], [1], [0, 0, 1, 1], [], []>} : vector<128x399xbf16>, vector<399x512xbf16>, vector<128x512xf32> -> vector<128x512xf32>
    %c0_3 = arith.constant 0 : index
    %c0_4 = arith.constant 0 : index
    %3 = vector.load %arg3[%c0_3, %c0_4] : memref<1x512xf32, #tpu.memory_space<vmem>>, vector<1x512xf32>
    %4 = vector.broadcast %3 : vector<1x512xf32> to vector<128x512xf32>
    %5 = arith.addf %2, %4 : vector<128x512xf32>
    %cst_5 = arith.constant 0.000000e+00 : f32
    %6 = vector.broadcast %cst_5 : f32 to vector<128x512xf32>
    %7 = arith.maximumf %5, %6 : vector<128x512xf32>
    %8 = vector.extract_strided_slice %7 {offsets = [0, 0], sizes = [128, 128], strides = [1, 1]} : vector<128x512xf32> to vector<128x128xf32>
    %9 = vector.extract_strided_slice %7 {offsets = [0, 128], sizes = [128, 128], strides = [1, 1]} : vector<128x512xf32> to vector<128x128xf32>
    %10 = arith.maximumf %8, %9 : vector<128x128xf32>
    %11 = vector.extract_strided_slice %7 {offsets = [0, 256], sizes = [128, 128], strides = [1, 1]} : vector<128x512xf32> to vector<128x128xf32>
    %12 = arith.maximumf %10, %11 : vector<128x128xf32>
    %13 = vector.extract_strided_slice %7 {offsets = [0, 384], sizes = [128, 128], strides = [1, 1]} : vector<128x512xf32> to vector<128x128xf32>
    %14 = arith.maximumf %12, %13 : vector<128x128xf32>
    %15 = arith.truncf %14 : vector<128x128xf32> to vector<128x128xbf16>
    %c0_6 = arith.constant 0 : index
    %c0_7 = arith.constant 0 : index
    %16 = vector.load %arg4[%c0_6, %c0_7] : memref<128x128xbf16, #tpu.memory_space<vmem>>, vector<128x128xbf16>
    tpu.vector_store %arg4[%c0_6, %c0_7], %15 {strides = array<i32>} : memref<128x128xbf16, #tpu.memory_space<vmem>>, vector<128x128xbf16>,
    return
  }
  func.func @transform_0(%arg0: i32) -> (i32, i32) {
    %c0_i32 = arith.constant 0 : i32
    %c0_i32_0 = arith.constant 0 : i32
    return %arg0, %c0_i32 : i32, i32
  }
  func.func @transform_1(%arg0: i32) -> (i32, i32) {
    %c0_i32 = arith.constant 0 : i32
    %c0_i32_0 = arith.constant 0 : i32
    %c0_i32_1 = arith.constant 0 : i32
    return %c0_i32, %c0_i32_0 : i32, i32
  }
  func.func @transform_2(%arg0: i32) -> (i32, i32) {
    %c0_i32 = arith.constant 0 : i32
    %c0_i32_0 = arith.constant 0 : i32
    %c0_i32_1 = arith.constant 0 : i32
    return %c0_i32, %c0_i32_0 : i32, i32
  }
  func.func @transform_3(%arg0: i32) -> (i32, i32) {
    %c0_i32 = arith.constant 0 : i32
    %c0_i32_0 = arith.constant 0 : i32
    return %arg0, %c0_i32 : i32, i32
  }
}

module attributes {stable_mosaic.version = 11 : i64} {
  func.func @_conv_mm_kernel(%arg0: i32, %arg1: memref<32x800xbf16, #tpu.memory_space<vmem>>, %arg2: memref<800x256xbf16, #tpu.memory_space<vmem>>, %arg3: memref<1x256xf32, #tpu.memory_space<vmem>>, %arg4: memref<32x64xbf16, #tpu.memory_space<vmem>>) attributes {dimension_semantics = [#tpu.dimension_semantics<parallel>], iteration_bounds = array<i64: 1>, scalar_prefetch = 0 : i64, scratch_operands = 0 : i64, tpu.core_type = #tpu.core_type<tc>, window_params = [{transform_indices = @transform_0, window_bounds = array<i64: 32, 800>}, {pipeline_mode = #tpu.pipeline_mode<synchronous>, transform_indices = @transform_1, window_bounds = array<i64: 800, 256>}, {pipeline_mode = #tpu.pipeline_mode<synchronous>, transform_indices = @transform_2, window_bounds = array<i64: 1, 256>}, {transform_indices = @transform_3, window_bounds = array<i64: 32, 64>}]} {
    %c0 = arith.constant 0 : index
    %c0_0 = arith.constant 0 : index
    %0 = vector.load %arg1[%c0, %c0_0] : memref<32x800xbf16, #tpu.memory_space<vmem>>, vector<32x800xbf16>
    %c0_1 = arith.constant 0 : index
    %c0_2 = arith.constant 0 : index
    %1 = vector.load %arg2[%c0_1, %c0_2] : memref<800x256xbf16, #tpu.memory_space<vmem>>, vector<800x256xbf16>
    %cst = arith.constant dense<0.000000e+00> : vector<32x256xf32>
    %2 = tpu.matmul %0, %1, %cst {dimension_numbers = #tpu.dot_dimension_numbers<[1], [0], [0], [1], [0, 0, 1, 1], [], []>} : vector<32x800xbf16>, vector<800x256xbf16>, vector<32x256xf32> -> vector<32x256xf32>
    %c0_3 = arith.constant 0 : index
    %c0_4 = arith.constant 0 : index
    %3 = vector.load %arg3[%c0_3, %c0_4] : memref<1x256xf32, #tpu.memory_space<vmem>>, vector<1x256xf32>
    %4 = vector.broadcast %3 : vector<1x256xf32> to vector<32x256xf32>
    %5 = arith.addf %2, %4 : vector<32x256xf32>
    %cst_5 = arith.constant 0.000000e+00 : f32
    %6 = vector.broadcast %cst_5 : f32 to vector<32x256xf32>
    %7 = arith.maximumf %5, %6 : vector<32x256xf32>
    %8 = vector.extract_strided_slice %7 {offsets = [0, 0], sizes = [32, 64], strides = [1, 1]} : vector<32x256xf32> to vector<32x64xf32>
    %9 = vector.extract_strided_slice %7 {offsets = [0, 64], sizes = [32, 64], strides = [1, 1]} : vector<32x256xf32> to vector<32x64xf32>
    %10 = arith.maximumf %8, %9 : vector<32x64xf32>
    %11 = vector.extract_strided_slice %7 {offsets = [0, 128], sizes = [32, 64], strides = [1, 1]} : vector<32x256xf32> to vector<32x64xf32>
    %12 = arith.maximumf %10, %11 : vector<32x64xf32>
    %13 = vector.extract_strided_slice %7 {offsets = [0, 192], sizes = [32, 64], strides = [1, 1]} : vector<32x256xf32> to vector<32x64xf32>
    %14 = arith.maximumf %12, %13 : vector<32x64xf32>
    %15 = arith.truncf %14 : vector<32x64xf32> to vector<32x64xbf16>
    %c0_6 = arith.constant 0 : index
    %c0_7 = arith.constant 0 : index
    %16 = vector.load %arg4[%c0_6, %c0_7] : memref<32x64xbf16, #tpu.memory_space<vmem>>, vector<32x64xbf16>
    tpu.vector_store %arg4[%c0_6, %c0_7], %15 {strides = array<i32>} : memref<32x64xbf16, #tpu.memory_space<vmem>>, vector<32x64xbf16>,
    return
  }
  func.func @transform_0(%arg0: i32) -> (i32, i32) {
    %c0_i32 = arith.constant 0 : i32
    %c0_i32_0 = arith.constant 0 : i32
    return %arg0, %c0_i32 : i32, i32
  }
  func.func @transform_1(%arg0: i32) -> (i32, i32) {
    %c0_i32 = arith.constant 0 : i32
    %c0_i32_0 = arith.constant 0 : i32
    %c0_i32_1 = arith.constant 0 : i32
    return %c0_i32, %c0_i32_0 : i32, i32
  }
  func.func @transform_2(%arg0: i32) -> (i32, i32) {
    %c0_i32 = arith.constant 0 : i32
    %c0_i32_0 = arith.constant 0 : i32
    %c0_i32_1 = arith.constant 0 : i32
    return %c0_i32, %c0_i32_0 : i32, i32
  }
  func.func @transform_3(%arg0: i32) -> (i32, i32) {
    %c0_i32 = arith.constant 0 : i32
    %c0_i32_0 = arith.constant 0 : i32
    return %arg0, %c0_i32 : i32, i32
  }
}

module attributes {stable_mosaic.version = 11 : i64} {
  func.func @_conv_mm_kernel(%arg0: i32, %arg1: memref<8x576xbf16, #tpu.memory_space<vmem>>, %arg2: memref<576x128xbf16, #tpu.memory_space<vmem>>, %arg3: memref<1x128xf32, #tpu.memory_space<vmem>>, %arg4: memref<8x128xbf16, #tpu.memory_space<vmem>>) attributes {dimension_semantics = [#tpu.dimension_semantics<parallel>], iteration_bounds = array<i64: 1>, scalar_prefetch = 0 : i64, scratch_operands = 0 : i64, tpu.core_type = #tpu.core_type<tc>, window_params = [{transform_indices = @transform_0, window_bounds = array<i64: 8, 576>}, {pipeline_mode = #tpu.pipeline_mode<synchronous>, transform_indices = @transform_1, window_bounds = array<i64: 576, 128>}, {pipeline_mode = #tpu.pipeline_mode<synchronous>, transform_indices = @transform_2, window_bounds = array<i64: 1, 128>}, {transform_indices = @transform_3, window_bounds = array<i64: 8, 128>}]} {
    %c0 = arith.constant 0 : index
    %c0_0 = arith.constant 0 : index
    %0 = vector.load %arg1[%c0, %c0_0] : memref<8x576xbf16, #tpu.memory_space<vmem>>, vector<8x576xbf16>
    %c0_1 = arith.constant 0 : index
    %c0_2 = arith.constant 0 : index
    %1 = vector.load %arg2[%c0_1, %c0_2] : memref<576x128xbf16, #tpu.memory_space<vmem>>, vector<576x128xbf16>
    %cst = arith.constant dense<0.000000e+00> : vector<8x128xf32>
    %2 = tpu.matmul %0, %1, %cst {dimension_numbers = #tpu.dot_dimension_numbers<[1], [0], [0], [1], [0, 0, 1, 1], [], []>} : vector<8x576xbf16>, vector<576x128xbf16>, vector<8x128xf32> -> vector<8x128xf32>
    %c0_3 = arith.constant 0 : index
    %c0_4 = arith.constant 0 : index
    %3 = vector.load %arg3[%c0_3, %c0_4] : memref<1x128xf32, #tpu.memory_space<vmem>>, vector<1x128xf32>
    %4 = vector.broadcast %3 : vector<1x128xf32> to vector<8x128xf32>
    %5 = arith.addf %2, %4 : vector<8x128xf32>
    %cst_5 = arith.constant 0.000000e+00 : f32
    %6 = vector.broadcast %cst_5 : f32 to vector<8x128xf32>
    %7 = arith.maximumf %5, %6 : vector<8x128xf32>
    %8 = arith.truncf %7 : vector<8x128xf32> to vector<8x128xbf16>
    %c0_6 = arith.constant 0 : index
    %c0_7 = arith.constant 0 : index
    %9 = vector.load %arg4[%c0_6, %c0_7] : memref<8x128xbf16, #tpu.memory_space<vmem>>, vector<8x128xbf16>
    tpu.vector_store %arg4[%c0_6, %c0_7], %8 {strides = array<i32>} : memref<8x128xbf16, #tpu.memory_space<vmem>>, vector<8x128xbf16>,
    return
  }
  func.func @transform_0(%arg0: i32) -> (i32, i32) {
    %c0_i32 = arith.constant 0 : i32
    %c0_i32_0 = arith.constant 0 : i32
    return %arg0, %c0_i32 : i32, i32
  }
  func.func @transform_1(%arg0: i32) -> (i32, i32) {
    %c0_i32 = arith.constant 0 : i32
    %c0_i32_0 = arith.constant 0 : i32
    %c0_i32_1 = arith.constant 0 : i32
    return %c0_i32, %c0_i32_0 : i32, i32
  }
  func.func @transform_2(%arg0: i32) -> (i32, i32) {
    %c0_i32 = arith.constant 0 : i32
    %c0_i32_0 = arith.constant 0 : i32
    %c0_i32_1 = arith.constant 0 : i32
    return %c0_i32, %c0_i32_0 : i32, i32
  }
  func.func @transform_3(%arg0: i32) -> (i32, i32) {
    %c0_i32 = arith.constant 0 : i32
    %c0_i32_0 = arith.constant 0 : i32
    return %arg0, %c0_i32 : i32, i32
  }
}

module attributes {stable_mosaic.version = 11 : i64} {
  func.func @_gap_fc_relu_kernel(%arg0: i32, %arg1: memref<2x4x128xbf16, #tpu.memory_space<vmem>>, %arg2: memref<128x128xbf16, #tpu.memory_space<vmem>>, %arg3: memref<1x128xf32, #tpu.memory_space<vmem>>, %arg4: memref<2x128xf32, #tpu.memory_space<vmem>>) attributes {dimension_semantics = [#tpu.dimension_semantics<parallel>], iteration_bounds = array<i64: 1>, scalar_prefetch = 0 : i64, scratch_operands = 0 : i64, tpu.core_type = #tpu.core_type<tc>, window_params = [{transform_indices = @transform_0, window_bounds = array<i64: 2, 4, 128>}, {pipeline_mode = #tpu.pipeline_mode<synchronous>, transform_indices = @transform_1, window_bounds = array<i64: 128, 128>}, {pipeline_mode = #tpu.pipeline_mode<synchronous>, transform_indices = @transform_2, window_bounds = array<i64: 1, 128>}, {transform_indices = @transform_3, window_bounds = array<i64: 2, 128>}]} {
    %c0 = arith.constant 0 : index
    %c0_0 = arith.constant 0 : index
    %c0_1 = arith.constant 0 : index
    %0 = vector.load %arg1[%c0, %c0_0, %c0_1] : memref<2x4x128xbf16, #tpu.memory_space<vmem>>, vector<2x4x128xbf16>
    %1 = arith.extf %0 : vector<2x4x128xbf16> to vector<2x4x128xf32>
    %cst = arith.constant dense<0.000000e+00> : vector<2x128xf32>
    %2 = vector.multi_reduction <add>, %1, %cst [1] : vector<2x4x128xf32> to vector<2x128xf32>
    %cst_2 = arith.constant 4.000000e+00 : f32
    %3 = vector.broadcast %cst_2 : f32 to vector<2x128xf32>
    %4 = arith.divf %2, %3 : vector<2x128xf32>
    %5 = arith.truncf %4 : vector<2x128xf32> to vector<2x128xbf16>
    %c0_3 = arith.constant 0 : index
    %c0_4 = arith.constant 0 : index
    %6 = vector.load %arg2[%c0_3, %c0_4] : memref<128x128xbf16, #tpu.memory_space<vmem>>, vector<128x128xbf16>
    %cst_5 = arith.constant dense<0.000000e+00> : vector<2x128xf32>
    %7 = tpu.matmul %5, %6, %cst_5 {dimension_numbers = #tpu.dot_dimension_numbers<[1], [0], [0], [1], [0, 0, 1, 1], [], []>} : vector<2x128xbf16>, vector<128x128xbf16>, vector<2x128xf32> -> vector<2x128xf32>
    %c0_6 = arith.constant 0 : index
    %c0_7 = arith.constant 0 : index
    %8 = vector.load %arg3[%c0_6, %c0_7] : memref<1x128xf32, #tpu.memory_space<vmem>>, vector<1x128xf32>
    %9 = vector.broadcast %8 : vector<1x128xf32> to vector<2x128xf32>
    %10 = arith.addf %7, %9 : vector<2x128xf32>
    %cst_8 = arith.constant 0.000000e+00 : f32
    %11 = vector.broadcast %cst_8 : f32 to vector<2x128xf32>
    %12 = arith.maximumf %10, %11 : vector<2x128xf32>
    %c0_9 = arith.constant 0 : index
    %c0_10 = arith.constant 0 : index
    %13 = vector.load %arg4[%c0_9, %c0_10] : memref<2x128xf32, #tpu.memory_space<vmem>>, vector<2x128xf32>
    tpu.vector_store %arg4[%c0_9, %c0_10], %12 {strides = array<i32>} : memref<2x128xf32, #tpu.memory_space<vmem>>, vector<2x128xf32>,
    return
  }
  func.func @transform_0(%arg0: i32) -> (i32, i32, i32) {
    %c0_i32 = arith.constant 0 : i32
    %c0_i32_0 = arith.constant 0 : i32
    %c0_i32_1 = arith.constant 0 : i32
    return %arg0, %c0_i32, %c0_i32_0 : i32, i32, i32
  }
  func.func @transform_1(%arg0: i32) -> (i32, i32) {
    %c0_i32 = arith.constant 0 : i32
    %c0_i32_0 = arith.constant 0 : i32
    %c0_i32_1 = arith.constant 0 : i32
    return %c0_i32, %c0_i32_0 : i32, i32
  }
  func.func @transform_2(%arg0: i32) -> (i32, i32) {
    %c0_i32 = arith.constant 0 : i32
    %c0_i32_0 = arith.constant 0 : i32
    %c0_i32_1 = arith.constant 0 : i32
    return %c0_i32, %c0_i32_0 : i32, i32
  }
  func.func @transform_3(%arg0: i32) -> (i32, i32) {
    %c0_i32 = arith.constant 0 : i32
    %c0_i32_0 = arith.constant 0 : i32
    return %arg0, %c0_i32 : i32, i32
  }
}

</mosaic_0001>

<bundles_post_ra>
// kernel: tile.11
= control target key start
LH: loop header
LB: loop body
LE: loop exit
PB: predicated region body
PF: predicated region fallthrough
CT: control target
= control target key end

     0   :  { %s56_s8 = smov 96   ;;  %s57_s11 = smov 32   ;;  %vm3_vm0 = vcmask 261120   ;;  %vm9_vm1 = vcmask 1048320   ;;  %vm15_vm2 = vcmask 785920   ;;  %vm21_vm3 = vcmask 523520   ;;  %s93_s0 = inlined_call_operand.vmem [shape: f32[16,32], index: 0, kind: input, shape index: {}]   ;;  %s94_s1 = inlined_call_operand.vmem [shape: f32[1,512], index: 1, kind: output, shape index: {}]  }
   0x1   :  { %v47_v0 = vld [vmem:[%s93_s0 + $0x3] ss:$4 sm:$0xf]   ;;  %v49_v1 = vld [vmem:[%s93_s0 + $0x1] ss:$4 sm:$0xf]  }
   0x2   :  { %7 = vrot.lane.b32.xlu0 %v47_v0, %s56_s8  ;;  %19 = vrot.lane.b32.xlu1 %v49_v1, %s57_s11  ;;  %v48_v2 = vld [vmem:[%s93_s0 + $0x2] ss:$4 sm:$0xf]   ;;  %s58_s14 = smov 64  }
   0x3   :  { %v2_v3 = vld [vmem:[%s93_s0] ss:$4 sm:$0xf]  }
   0x4   :  { %4 = vst.msk [vmem:[#allocation0] ss:$8 sm:$0xf] %vm3_vm0, %v2_v3  }
   0xa   :  { %13 = vrot.lane.b32.xlu0 %v48_v2, %s58_s14 }
  0x74   :  { %v8_v4 = vpop.permute.xlu0 %7   ;;  %v20_v5 = vpop.permute.xlu1 %19  }
  0x75   :  { %10 = vst.msk [vmem:[#allocation0] ss:$8 sm:$0xf] %vm9_vm1, %v8_v4  }
  0x7c   :  { %v14_v6 = vpop.permute.xlu0 %13  }
  0x7d   :  { %16 = vst.msk [vmem:[#allocation0] ss:$8 sm:$0xf] %vm15_vm2, %v14_v6  }
  0x7e   :  { %22 = vst.msk [vmem:[#allocation0] ss:$8 sm:$0xf] %vm21_vm3, %v20_v5  }
  0x85   :  { %v25_v7 = vld [vmem:[#allocation0] sm:$0x1]  ;;  %v30_v8 = vld [vmem:[#allocation0 + $0x8] sm:$0x1]  ;;  %v36_v9 = vld [vmem:[#allocation0 + $0x10] sm:$0x1] }
  0x86   :  { %28 = vst [vmem:[%s94_s1] sm:$0x1] %v25_v7  ;;  %v42_v10 = vld [vmem:[#allocation0 + $0x18] sm:$0x1] }
  0x87   :  { %50 = vst [vmem:[%s94_s1 + $0x1] sm:$0x1] %v30_v8 }
  0x88   :  { %51 = vst [vmem:[%s94_s1 + $0x2] sm:$0x1] %v36_v9 }
  0x89   :  { %52 = vst [vmem:[%s94_s1 + $0x3] sm:$0x1] %v42_v10 }

// kernel: tile.10
= control target key start
LH: loop header
LB: loop body
LE: loop exit
PB: predicated region body
PF: predicated region fallthrough
CT: control target
= control target key end

     0   :  { %s28_s0 = inlined_call_operand.vmem [shape: f32[32], index: 0, kind: input, shape index: {}]   ;;  %s29_s1 = inlined_call_operand.vmem [shape: f32[16,32], index: 1, kind: output, shape index: {}]  }
   0x1   :  { %v4_v0 = vld [vmem:[%s28_s0] ss:$0 sm:$0xff] }
   0x2   :  { %5 = vst [vmem:[%s29_s1] sm:$0xff] %v4_v0 }
   0x3   :  { %8 = vst [vmem:[%s29_s1 + $0x8] sm:$0xff] %v4_v0 }

// kernel: tile.14
= control target key start
LH: loop header
LB: loop body
LE: loop exit
PB: predicated region body
PF: predicated region fallthrough
CT: control target
= control target key end

     0   :  { %s22_s0 = inlined_call_operand.vmem [shape: f32[64], index: 0, kind: input, shape index: {}]   ;;  %s23_s1 = inlined_call_operand.vmem [shape: f32[4,64], index: 1, kind: output, shape index: {}]  }
   0x1   :  { %v4_v0 = vld [vmem:[%s22_s0] ss:$0 sm:$0xff] }
   0x2   :  { %5 = vst [vmem:[%s23_s1] sm:$0xf] %v4_v0 }

// kernel: tile.15
= control target key start
LH: loop header
LB: loop body
LE: loop exit
PB: predicated region body
PF: predicated region fallthrough
CT: control target
= control target key end

     0   :  { %s6_s8 = smov 3  ;;  %vm8_vm0 = vcmask 523264   ;;  %s31_s9 = smov 64   ;;  %vm15_vm1 = vcmask 1048064   ;;  %s51_s0 = inlined_call_operand.vmem [shape: f32[4,64], index: 0, kind: input, shape index: {}]   ;;  %s52_s1 = inlined_call_operand.vmem [shape: f32[1,256], index: 1, kind: output, shape index: {}]  }
   0x1   :  { %v4_v0 = vld [vmem:[%s51_s0] sm:$0xf]  ;;  %s11_s0 = smov 3 }
   0x2   :  { %5 = vst [vmem:[#allocation1] sm:$0xf] %v4_v0 }
   0x9   :  { %v12_v1 = vld [vmem:[#allocation1 + $0x1] ss:$2 sm:%s11_s0]   ;;  %v7_v2 = vld [vmem:[#allocation1] ss:$2 sm:%s6_s8]  }
   0xa   :  { %13 = vrot.lane.b32.xlu0 %v12_v1, %s31_s9  ;;  %9 = vst.msk [vmem:[#allocation0] ss:$8 sm:$0x3] %vm8_vm0, %v7_v2  }
  0x7c   :  { %v14_v3 = vpop.permute.xlu0 %13  }
  0x7d   :  { %16 = vst.msk [vmem:[#allocation0] ss:$8 sm:$0x3] %vm15_vm1, %v14_v3  }
  0x84   :  { %v19_v4 = vld [vmem:[#allocation0] sm:$0x1]  ;;  %v24_v5 = vld [vmem:[#allocation0 + $0x8] sm:$0x1] }
  0x85   :  { %22 = vst [vmem:[%s52_s1] sm:$0x1] %v19_v4 }
  0x86   :  { %29 = vst [vmem:[%s52_s1 + $0x1] sm:$0x1] %v24_v5 }

// kernel: image_feature_extractor_simple.4
= control target key start
LH: loop header
LB: loop body
LE: loop exit
PB: predicated region body
PF: predicated region fallthrough
CT: control target
= control target key end

     0   :  { %vm830_vm0 = vcmask 1046528   ;;  %vm831_vm1 = vcmask 1047552   ;;  %v2519_v33 = vmov 65535   ;;  %vm805_vm2 = vcmask 121856   ;;  %s3818_s1 = inlined_call_operand.vmem [shape: bf16[399,512], index: 1, kind: input, shape index: {}]   ;;  %s3819_s0 = inlined_call_operand.vmem [shape: bf16[128,399], index: 0, kind: input, shape index: {}]   ;;  %s3820_s2 = inlined_call_operand.vmem [shape: f32[1,512], index: 2, kind: input, shape index: {}]   ;;  %s3821_s3 = inlined_call_operand.vmem [shape: bf16[128,128], index: 3, kind: output, shape index: {}]  }
   0x1   :  { %v2020_v0 = vld [vmem:[%s3818_s1 + $0xe0] sm:$0xf]  ;;  %v2400_v1 = vld [vmem:[%s3818_s1 + $0xec] sm:$0xf0]  ;;  %v832_v34 = vsel %vm830_vm0, 4294967295, %v2519_v33 }
   0x2   :  { %v2148_v2 = vld [vmem:[%s3818_s1 + $0x1e0] sm:$0xf]  ;;  %v2021_v3 = vor.u32 %v2400_v1, %v2020_v0  ;;  %v2432_v4 = vld [vmem:[%s3818_s1 + $0x1ec] sm:$0xf0]  ;;  %v2620_v38 = vsel %vm831_vm1, %v832_v34, 0 }
   0x3   :  { %v2276_v5 = vld [vmem:[%s3818_s1 + $0x2e0] sm:$0xf]  ;;  %v2464_v6 = vld [vmem:[%s3818_s1 + $0x2ec] sm:$0xf0]  ;;  %v2149_v7 = vor.u32 %v2432_v4, %v2148_v2  ;;  %v2339_v41 = vld [vmem:[%s3819_s0 + $0xc] sm:$0xf] }
   0x4   :  { %v2277_v8 = vor.u32 %v2464_v6, %v2276_v5  ;;  %v2004_v9 = vld [vmem:[%s3818_s1 + $0xc0] sm:$0xf]  ;;  %v2396_v10 = vld [vmem:[%s3818_s1 + $0xcc] sm:$0xf0]  ;;  %846 = vmatpush.bf16.msra.mxu0 %v2021_v3  ;;  %v1790_v42 = vld [vmem:[%s3819_s0 + $0x18] sm:$0xf0] }
   0x5   :  { %v2132_v11 = vld [vmem:[%s3818_s1 + $0x1c0] sm:$0xf]  ;;  %v2005_v12 = vor.u32 %v2396_v10, %v2004_v9  ;;  %v2428_v13 = vld [vmem:[%s3818_s1 + $0x1cc] sm:$0xf0]  ;;  %895 = vmatpush.bf16.msra.mxu1 %v2149_v7  ;;  %v2647_v51 = vor.u32 %v2339_v41, %v1790_v42  ;;  %v2398_v58 = vld [vmem:[%s3818_s1 + $0xe4] sm:$0xf] }
   0x6   :  { %v2260_v14 = vld [vmem:[%s3818_s1 + $0x2c0] sm:$0xf]  ;;  %v2460_v15 = vld [vmem:[%s3818_s1 + $0x2cc] sm:$0xf0]  ;;  %944 = vmatpush.bf16.msra.mxu2 %v2277_v8  ;;  %v2133_v16 = vor.u32 %v2428_v13, %v2132_v11  ;;  %v2022_v59 = vld [vmem:[%s3818_s1 + $0xf0] sm:$0xf0] }
   0x7   :  { %v2261_v17 = vor.u32 %v2460_v15, %v2260_v14  ;;  %v1988_v18 = vld [vmem:[%s3818_s1 + $0xa0] sm:$0xf]  ;;  %v2392_v19 = vld [vmem:[%s3818_s1 + $0xac] sm:$0xf0]  ;;  %3825 = vst [vmem:[#allocation2_spill] sm:$0xff] %v2647_v51  ;;  %v2025_v63 = vor.u32 %v2398_v58, %v2022_v59 }
   0x8   :  { %v2116_v20 = vld [vmem:[%s3818_s1 + $0x1a0] sm:$0xf]  ;;  %v2424_v21 = vld [vmem:[%s3818_s1 + $0x1ac] sm:$0xf0]  ;;  %847 = vmatpush.bf16.msra.mxu0 %v2005_v12  ;;  %v1989_v25 = vor.u32 %v2392_v19, %v1988_v18  ;;  %v2466_v10 = vld [vmem:[%s3818_s1 + $0x304] sm:$0xf] }
   0x9   :  { %v2244_v22 = vld [vmem:[%s3818_s1 + $0x2a0] sm:$0xf]  ;;  %v2456_v23 = vld [vmem:[%s3818_s1 + $0x2ac] sm:$0xf0]  ;;  %896 = vmatpush.bf16.msra.mxu1 %v2133_v16  ;;  %v2117_v29 = vor.u32 %v2424_v21, %v2116_v20  ;;  %v2294_v11 = vld [vmem:[%s3818_s1 + $0x310] sm:$0xf0] }
   0xa   :  { %v1972_v24 = vld [vmem:[%s3818_s1 + $0x80] sm:$0xf]  ;;  %v2388_v26 = vld [vmem:[%s3818_s1 + $0x8c] sm:$0xf0]  ;;  %945 = vmatpush.bf16.msra.mxu2 %v2261_v17  ;;  %v2245_v30 = vor.u32 %v2456_v23, %v2244_v22  ;;  %v2394_v14 = vld [vmem:[%s3818_s1 + $0xc4] sm:$0xf] }
   0xb   :  { %v2100_v27 = vld [vmem:[%s3818_s1 + $0x180] sm:$0xf]  ;;  %v2420_v28 = vld [vmem:[%s3818_s1 + $0x18c] sm:$0xf0]  ;;  %v1973_v39 = vor.u32 %v2388_v26, %v1972_v24  ;;  %v2006_v15 = vld [vmem:[%s3818_s1 + $0xd0] sm:$0xf0] }
   0xc   :  { %v2292_v31 = vld [vmem:[%s3818_s1 + $0x300] sm:$0xf]  ;;  %v2468_v32 = vld [vmem:[%s3818_s1 + $0x30c] sm:$0xf0]  ;;  %848 = vmatpush.bf16.msra.mxu0 %v1989_v25  ;;  %v2101_v43 = vor.u32 %v2420_v28, %v2100_v27  ;;  %v2009_v21 = vor.u32 %v2394_v14, %v2006_v15  ;;  %v2297_v25 = vor.u32 %v2466_v10, %v2294_v11  ;;  %v2338_v26 = vld [vmem:[%s3819_s0 + $0x4] sm:$0xf] }
   0xd   :  { %v2228_v35 = vld [vmem:[%s3818_s1 + $0x280] sm:$0xf]  ;;  %v2452_v36 = vld [vmem:[%s3818_s1 + $0x28c] sm:$0xf0]  ;;  %v2293_v37 = vor.u32 %v2468_v32, %v2292_v31  ;;  %897 = vmatpush.bf16.msra.mxu1 %v2117_v29  ;;  %v1782_v27 = vld [vmem:[%s3819_s0 + $0x10] sm:$0xf0] }
   0xe   :  { %946 = vmatpush.bf16.msra.mxu2 %v2245_v30  ;;  %v2229_v44 = vor.u32 %v2452_v36, %v2228_v35  ;;  %v1956_v45 = vld [vmem:[%s3818_s1 + $0x60] sm:$0xf]  ;;  %v2384_v46 = vld [vmem:[%s3818_s1 + $0x6c] sm:$0xf0]  ;;  %v2343_v28 = vld [vmem:[%s3819_s0 + $0x2c] sm:$0xf] }
   0xf   :  { %v835_v40 = vand.u32 %v2293_v37, %v2620_v38  ;;  %v2084_v47 = vld [vmem:[%s3818_s1 + $0x160] sm:$0xf]  ;;  %v2416_v48 = vld [vmem:[%s3818_s1 + $0x16c] sm:$0xf0]  ;;  %v1957_v52 = vor.u32 %v2384_v46, %v1956_v45  ;;  %v1806_v29 = vld [vmem:[%s3819_s0 + $0x38] sm:$0xf0] }
  0x10   :  { %v2212_v49 = vld [vmem:[%s3818_s1 + $0x260] sm:$0xf]  ;;  %v2448_v50 = vld [vmem:[%s3818_s1 + $0x26c] sm:$0xf0]  ;;  %849 = vmatpush.bf16.msra.mxu0 %v1973_v39  ;;  %v2085_v55 = vor.u32 %v2416_v48, %v2084_v47  ;;  %v1788_v31 = vld [vmem:[%s3819_s0 + $0x8] sm:$0xf]  ;;  %v2760_v41 = vor.u32 %v2343_v28, %v1806_v29  ;;  %v2770_v47 = vor.u32 %v2338_v26, %v1782_v27 }
  0x11   :  { %1000 = vmatpush.bf16.msra.mxu3 %v835_v40  ;;  %v1940_v53 = vld [vmem:[%s3818_s1 + $0x40] sm:$0xf]  ;;  %v2380_v54 = vld [vmem:[%s3818_s1 + $0x4c] sm:$0xf0]  ;;  %898 = vmatpush.bf16.msra.mxu1 %v2101_v43  ;;  %v2213_v56 = vor.u32 %v2448_v50, %v2212_v49  ;;  %v2462_v32 = vld [vmem:[%s3818_s1 + $0x2e4] sm:$0xf]  ;;  %v838_v40 = vand.u32 %v2297_v25, %v2620_v38 }
  0x12   :  { %947 = vmatpush.bf16.msra.mxu2 %v2229_v44  ;;  %v2068_v57 = vld [vmem:[%s3818_s1 + $0x140] sm:$0xf]  ;;  %v2412_v60 = vld [vmem:[%s3818_s1 + $0x14c] sm:$0xf0]  ;;  %v1941_v0 = vor.u32 %v2380_v54, %v1940_v53  ;;  %v2278_v33 = vld [vmem:[%s3818_s1 + $0x2f0] sm:$0xf0] }
  0x13   :  { %v2196_v61 = vld [vmem:[%s3818_s1 + $0x240] sm:$0xf]  ;;  %v2444_v62 = vld [vmem:[%s3818_s1 + $0x24c] sm:$0xf0]  ;;  %v2069_v1 = vor.u32 %v2412_v60, %v2068_v57  ;;  %v2341_v36 = vld [vmem:[%s3819_s0 + $0x14] sm:$0xf0]  ;;  %v2281_v46 = vor.u32 %v2462_v32, %v2278_v33 }
  0x14   :  { %2306 = vmatmul.msk.bf16.vlgmr.msra.gmra.mxu3 %vm805_vm2, %v2647_v51  ;;  %850 = vmatpush.bf16.msra.mxu0 %v1957_v52  ;;  %v2197_v2 = vor.u32 %v2444_v62, %v2196_v61  ;;  %v1924_v3 = vld [vmem:[%s3818_s1 + $0x20] sm:$0xf]  ;;  %v2376_v4 = vld [vmem:[%s3818_s1 + $0x2c] sm:$0xf0]  ;;  %v2390_v37 = vld [vmem:[%s3818_s1 + $0xa4] sm:$0xf]  ;;  %v2772_v48 = vor.u32 %v2341_v36, %v1788_v31 }
  0x15   :  { %1042 = vmatpush.bf16.msrb.mxu3 %v2025_v63  ;;  %899 = vmatpush.bf16.msra.mxu1 %v2085_v55  ;;  %v2052_v5 = vld [vmem:[%s3818_s1 + $0x120] sm:$0xf]  ;;  %v2408_v6 = vld [vmem:[%s3818_s1 + $0x12c] sm:$0xf0]  ;;  %v1925_v12 = vor.u32 %v2376_v4, %v1924_v3  ;;  %v1990_v39 = vld [vmem:[%s3818_s1 + $0xb0] sm:$0xf0] }
  0x16   :  { %948 = vmatpush.bf16.msra.mxu2 %v2213_v56  ;;  %v2180_v7 = vld [vmem:[%s3818_s1 + $0x220] sm:$0xf]  ;;  %v2440_v8 = vld [vmem:[%s3818_s1 + $0x22c] sm:$0xf0]  ;;  %v2053_v16 = vor.u32 %v2408_v6, %v2052_v5  ;;  %v2430_v42 = vld [vmem:[%s3818_s1 + $0x1e4] sm:$0xf]  ;;  %v1993_v44 = vor.u32 %v2390_v37, %v1990_v39 }
  0x17   :  { %v1908_v9 = vld [vmem:[%s3818_s1] sm:$0xf]  ;;  %v2372_v13 = vld [vmem:[%s3818_s1 + $0xc] sm:$0xf0]  ;;  %v2181_v17 = vor.u32 %v2440_v8, %v2180_v7  ;;  %v2150_v43 = vld [vmem:[%s3818_s1 + $0x1f0] sm:$0xf0] }
  0x18   :  { %851 = vmatpush.bf16.msra.mxu0 %v1941_v0  ;;  %v2036_v18 = vld [vmem:[%s3818_s1 + $0x100] sm:$0xf]  ;;  %v2404_v19 = vld [vmem:[%s3818_s1 + $0x10c] sm:$0xf0]  ;;  %v1909_v30 = vor.u32 %v2372_v13, %v1908_v9  ;;  %v2458_v49 = vld [vmem:[%s3818_s1 + $0x2c4] sm:$0xf]  ;;  %v2153_v52 = vor.u32 %v2430_v42, %v2150_v43 }
  0x19   :  { %900 = vmatpush.bf16.msra.mxu1 %v2069_v1  ;;  %v2164_v20 = vld [vmem:[%s3818_s1 + $0x200] sm:$0xf]  ;;  %v2436_v22 = vld [vmem:[%s3818_s1 + $0x20c] sm:$0xf0]  ;;  %1043 = vmatpush.bf16.msrb.mxu3 %v2009_v21  ;;  %v2037_v34 = vor.u32 %v2404_v19, %v2036_v18  ;;  %v2262_v50 = vld [vmem:[%s3818_s1 + $0x2d0] sm:$0xf0] }
  0x1a   :  { %949 = vmatpush.bf16.msra.mxu2 %v2197_v2  ;;  %v1780_v23 = vld [vmem:[%s3819_s0] sm:$0xf]  ;;  %v2340_v24 = vld [vmem:[%s3819_s0 + $0xc] sm:$0xf0]  ;;  %v2165_v35 = vor.u32 %v2436_v22, %v2164_v20  ;;  %v2426_v53 = vld [vmem:[%s3818_s1 + $0x1c4] sm:$0xf]  ;;  %v2265_v55 = vor.u32 %v2458_v49, %v2262_v50 }
  0x1b   :  { %v2768_v45 = vor.u32 %v2340_v24, %v1780_v23  ;;  %v2134_v54 = vld [vmem:[%s3818_s1 + $0x1d0] sm:$0xf0]  ;;  %v2454_v56 = vld [vmem:[%s3818_s1 + $0x2a4] sm:$0xf]  ;;  %v2347_v2 = vld [vmem:[%s3819_s0 + $0x4c] sm:$0xf] }
  0x1c   :  { %852 = vmatpush.bf16.msra.mxu0 %v1925_v12  ;;  %v2137_v57 = vor.u32 %v2426_v53, %v2134_v54  ;;  %v2246_v58 = vld [vmem:[%s3818_s1 + $0x2b0] sm:$0xf0]  ;;  %v2386_v59 = vld [vmem:[%s3818_s1 + $0x84] sm:$0xf]  ;;  %v1822_v3 = vld [vmem:[%s3819_s0 + $0x58] sm:$0xf0] }
  0x1d   :  { %901 = vmatpush.bf16.msra.mxu1 %v2053_v16  ;;  %1044 = vmatpush.bf16.msrb.mxu3 %v1993_v44  ;;  %v1974_v60 = vld [vmem:[%s3818_s1 + $0x90] sm:$0xf0]  ;;  %v2422_v61 = vld [vmem:[%s3818_s1 + $0x1a4] sm:$0xf]  ;;  %v2249_v0 = vor.u32 %v2454_v56, %v2246_v58  ;;  %v1796_v4 = vld [vmem:[%s3819_s0 + $0x20] sm:$0xf]  ;;  %v2833_v10 = vor.u32 %v2347_v2, %v1822_v3 }
  0x1e   :  { %950 = vmatpush.bf16.msra.mxu2 %v2181_v17  ;;  %v2118_v62 = vld [vmem:[%s3818_s1 + $0x1b0] sm:$0xf0]  ;;  %v1977_v63 = vor.u32 %v2386_v59, %v1974_v60  ;;  %v2344_v5 = vld [vmem:[%s3819_s0 + $0x2c] sm:$0xf0]  ;;  %v2342_v6 = vld [vmem:[%s3819_s0 + $0x24] sm:$0xf] }
  0x1f   :  { %v2121_v1 = vor.u32 %v2422_v61, %v2118_v62  ;;  %v1798_v7 = vld [vmem:[%s3819_s0 + $0x30] sm:$0xf0]  ;;  %v1804_v8 = vld [vmem:[%s3819_s0 + $0x28] sm:$0xf]  ;;  %v2345_v9 = vld [vmem:[%s3819_s0 + $0x34] sm:$0xf0]  ;;  %v2835_v11 = vor.u32 %v2344_v5, %v1796_v4 }
  0x20   :  { %853 = vmatpush.bf16.msra.mxu0 %v1909_v30  ;;  %v2837_v12 = vor.u32 %v2342_v6, %v1798_v7  ;;  %v2839_v13 = vor.u32 %v2345_v9, %v1804_v8  ;;  %v2418_v14 = vld [vmem:[%s3818_s1 + $0x184] sm:$0xf]  ;;  %v2102_v15 = vld [vmem:[%s3818_s1 + $0x190] sm:$0xf0]  ;;  %v2351_v23 = vld [vmem:[%s3819_s0 + $0x6c] sm:$0xf] }
  0x21   :  { %902 = vmatpush.bf16.msra.mxu1 %v2037_v34  ;;  %1045 = vmatpush.bf16.msrb.mxu3 %v1977_v63  ;;  %v2450_v16 = vld [vmem:[%s3818_s1 + $0x284] sm:$0xf]  ;;  %v2105_v17 = vor.u32 %v2418_v14, %v2102_v15  ;;  %v2230_v18 = vld [vmem:[%s3818_s1 + $0x290] sm:$0xf0]  ;;  %v1838_v24 = vld [vmem:[%s3819_s0 + $0x78] sm:$0xf0] }
  0x22   :  { %951 = vmatpush.bf16.msra.mxu2 %v2165_v35  ;;  %v2382_v19 = vld [vmem:[%s3818_s1 + $0x64] sm:$0xf]  ;;  %v1958_v20 = vld [vmem:[%s3818_s1 + $0x70] sm:$0xf0]  ;;  %v2233_v21 = vor.u32 %v2450_v16, %v2230_v18  ;;  %v1812_v25 = vld [vmem:[%s3819_s0 + $0x40] sm:$0xf]  ;;  %v2888_v31 = vor.u32 %v2351_v23, %v1838_v24 }
  0x23   :  { %854 = vmatmul.bf16.vlgmr.msra.gmra.mxu0 %v2768_v45  ;;  %v1961_v22 = vor.u32 %v2382_v19, %v1958_v20  ;;  %v2348_v26 = vld [vmem:[%s3819_s0 + $0x4c] sm:$0xf0]  ;;  %v2346_v27 = vld [vmem:[%s3819_s0 + $0x44] sm:$0xf]  ;;  %v1814_v28 = vld [vmem:[%s3819_s0 + $0x50] sm:$0xf0] }
  0x24   :  { %2307 = vmatmul.msk.bf16.gmra.mxu3 %vm805_vm2, %v2760_v41  ;;  %903 = vmatmul.bf16.vlgmr.msra.gmra.mxu1 %v2770_v47  ;;  %v1820_v29 = vld [vmem:[%s3819_s0 + $0x48] sm:$0xf]  ;;  %v2349_v30 = vld [vmem:[%s3819_s0 + $0x54] sm:$0xf0]  ;;  %v2890_v32 = vor.u32 %v2348_v26, %v1812_v25  ;;  %v2892_v33 = vor.u32 %v2346_v27, %v1814_v28  ;;  %v2414_v35 = vld [vmem:[%s3818_s1 + $0x164] sm:$0xf] }
  0x25   :  { %1140 = vmatpush.bf16.msrb.mxu1 %v2281_v46  ;;  %952 = vmatmul.bf16.vlgmr.msra.gmra.mxu2 %v2772_v48  ;;  %v2894_v34 = vor.u32 %v2349_v30, %v1820_v29  ;;  %v2086_v36 = vld [vmem:[%s3818_s1 + $0x170] sm:$0xf0]  ;;  %v2446_v37 = vld [vmem:[%s3818_s1 + $0x264] sm:$0xf]  ;;  %v2355_v49 = vld [vmem:[%s3819_s0 + $0x8c] sm:$0xf] }
  0x26   :  { %1196 = vmatpush.bf16.msrb.mxu2 %v838_v40  ;;  %1091 = vmatpush.bf16.msrb.mxu0 %v2153_v52  ;;  %v2089_v39 = vor.u32 %v2414_v35, %v2086_v36  ;;  %v2214_v40 = vld [vmem:[%s3818_s1 + $0x270] sm:$0xf0]  ;;  %v2378_v42 = vld [vmem:[%s3818_s1 + $0x44] sm:$0xf]  ;;  %v1854_v50 = vld [vmem:[%s3819_s0 + $0x98] sm:$0xf0] }
  0x27   :  { %1046 = vmatpush.bf16.msrb.mxu3 %v1961_v22  ;;  %v1942_v43 = vld [vmem:[%s3818_s1 + $0x50] sm:$0xf0]  ;;  %v2217_v44 = vor.u32 %v2446_v37, %v2214_v40  ;;  %v1828_v52 = vld [vmem:[%s3819_s0 + $0x60] sm:$0xf]  ;;  %v2352_v53 = vld [vmem:[%s3819_s0 + $0x6c] sm:$0xf0]  ;;  %v2943_v58 = vor.u32 %v2355_v49, %v1854_v50 }
  0x28   :  { %v1945_v46 = vor.u32 %v2378_v42, %v1942_v43  ;;  %v2350_v54 = vld [vmem:[%s3819_s0 + $0x64] sm:$0xf]  ;;  %v1836_v56 = vld [vmem:[%s3819_s0 + $0x68] sm:$0xf]  ;;  %v2945_v59 = vor.u32 %v2352_v53, %v1828_v52  ;;  %v2070_v63 = vld [vmem:[%s3818_s1 + $0x150] sm:$0xf0] }
  0x29   :  { %1141 = vmatpush.bf16.msrb.mxu1 %v2265_v55  ;;  %v1830_v55 = vld [vmem:[%s3819_s0 + $0x70] sm:$0xf0]  ;;  %v2410_v62 = vld [vmem:[%s3818_s1 + $0x144] sm:$0xf]  ;;  %v2359_v7 = vld [vmem:[%s3819_s0 + $0xac] sm:$0xf] }
  0x2a   :  { %1092 = vmatpush.bf16.msrb.mxu0 %v2137_v57  ;;  %v2353_v57 = vld [vmem:[%s3819_s0 + $0x74] sm:$0xf0]  ;;  %v2947_v60 = vor.u32 %v2350_v54, %v1830_v55  ;;  %v2198_v2 = vld [vmem:[%s3818_s1 + $0x250] sm:$0xf0]  ;;  %v2374_v3 = vld [vmem:[%s3818_s1 + $0x24] sm:$0xf] }
  0x2b   :  { %1047 = vmatpush.bf16.msrb.mxu3 %v1945_v46  ;;  %v2949_v61 = vor.u32 %v2353_v57, %v1836_v56  ;;  %v1926_v4 = vld [vmem:[%s3818_s1 + $0x30] sm:$0xf0]  ;;  %v1870_v8 = vld [vmem:[%s3819_s0 + $0xb8] sm:$0xf0]  ;;  %v1844_v9 = vld [vmem:[%s3819_s0 + $0x80] sm:$0xf] }
  0x2c   :  { %v1929_v6 = vor.u32 %v2374_v3, %v1926_v4  ;;  %v2356_v14 = vld [vmem:[%s3819_s0 + $0x8c] sm:$0xf0]  ;;  %v2354_v15 = vld [vmem:[%s3819_s0 + $0x84] sm:$0xf]  ;;  %v1846_v16 = vld [vmem:[%s3819_s0 + $0x90] sm:$0xf0]  ;;  %v2998_v19 = vor.u32 %v2359_v7, %v1870_v8 }
  0x2d   :  { %1142 = vmatpush.bf16.msrb.mxu1 %v2249_v0  ;;  %v2442_v0 = vld [vmem:[%s3818_s1 + $0x244] sm:$0xf]  ;;  %v2357_v18 = vld [vmem:[%s3819_s0 + $0x94] sm:$0xf0]  ;;  %v3000_v20 = vor.u32 %v2356_v14, %v1844_v9  ;;  %v2054_v24 = vld [vmem:[%s3818_s1 + $0x130] sm:$0xf0] }
  0x2e   :  { %1093 = vmatpush.bf16.msrb.mxu0 %v2121_v1  ;;  %v2073_v1 = vor.u32 %v2410_v62, %v2070_v63  ;;  %v2201_v5 = vor.u32 %v2442_v0, %v2198_v2  ;;  %v2406_v23 = vld [vmem:[%s3818_s1 + $0x124] sm:$0xf]  ;;  %v2182_v27 = vld [vmem:[%s3818_s1 + $0x230] sm:$0xf0]  ;;  %v2363_v36 = vld [vmem:[%s3819_s0 + $0xcc] sm:$0xf] }
  0x2f   :  { %1048 = vmatpush.bf16.msrb.mxu3 %v1929_v6  ;;  %v2438_v25 = vld [vmem:[%s3818_s1 + $0x224] sm:$0xf]  ;;  %v2057_v26 = vor.u32 %v2406_v23, %v2054_v24  ;;  %v1910_v29 = vld [vmem:[%s3818_s1 + $0x10] sm:$0xf0]  ;;  %v1886_v37 = vld [vmem:[%s3819_s0 + $0xd8] sm:$0xf0] }
  0x30   :  { %v2370_v28 = vld [vmem:[%s3818_s1 + $0x4] sm:$0xf]  ;;  %v2185_v30 = vor.u32 %v2438_v25, %v2182_v27  ;;  %v2360_v40 = vld [vmem:[%s3819_s0 + $0xac] sm:$0xf0]  ;;  %v1862_v43 = vld [vmem:[%s3819_s0 + $0xb0] sm:$0xf0]  ;;  %v3053_v49 = vor.u32 %v2363_v36, %v1886_v37 }
  0x31   :  { %1143 = vmatpush.bf16.msrb.mxu1 %v2233_v21  ;;  %v3002_v21 = vor.u32 %v2354_v15, %v1846_v16  ;;  %v1913_v35 = vor.u32 %v2370_v28, %v1910_v29  ;;  %v2358_v42 = vld [vmem:[%s3819_s0 + $0xa4] sm:$0xf]  ;;  %v2361_v46 = vld [vmem:[%s3819_s0 + $0xb4] sm:$0xf0]  ;;  %v2038_v55 = vld [vmem:[%s3818_s1 + $0x110] sm:$0xf0] }
  0x32   :  { %1094 = vmatpush.bf16.msrb.mxu0 %v2105_v17  ;;  %v1852_v17 = vld [vmem:[%s3819_s0 + $0x88] sm:$0xf]  ;;  %3826 = vst [vmem:[#allocation3_spill] sm:$0xff] %v3053_v49  ;;  %v3057_v52 = vor.u32 %v2358_v42, %v1862_v43  ;;  %v2402_v54 = vld [vmem:[%s3818_s1 + $0x104] sm:$0xf] }
  0x33   :  { %859 = vmatmul.bf16.gmra.mxu0 %v2835_v11  ;;  %v3004_v22 = vor.u32 %v2357_v18, %v1852_v17  ;;  %1049 = vmatpush.bf16.msrb.mxu3 %v1913_v35  ;;  %v2434_v56 = vld [vmem:[%s3818_s1 + $0x204] sm:$0xf]  ;;  %v2041_v57 = vor.u32 %v2402_v54, %v2038_v55  ;;  %v2166_v62 = vld [vmem:[%s3818_s1 + $0x210] sm:$0xf0]  ;;  %v2028_v63 = vld [vmem:[%s3818_s1 + $0xe8] sm:$0xf] }
  0x34   :  { %2308 = vmatmul.msk.bf16.gmra.mxu3 %vm805_vm2, %v2833_v10  ;;  %908 = vmatmul.bf16.gmra.mxu1 %v2837_v12  ;;  %v2401_v0 = vld [vmem:[%s3818_s1 + $0xf4] sm:$0xf0]  ;;  %v2367_v3 = vld [vmem:[%s3819_s0 + $0xec] sm:$0xf]  ;;  %v1902_v4 = vld [vmem:[%s3819_s0 + $0xf8] sm:$0xf0] }
  0x35   :  { %957 = vmatmul.bf16.gmra.mxu2 %v2839_v13  ;;  %1144 = vmatpush.bf16.msrb.mxu1 %v2217_v44  ;;  %v1868_v44 = vld [vmem:[%s3819_s0 + $0xa8] sm:$0xf]  ;;  %v2029_v2 = vor.u32 %v2401_v0, %v2028_v63  ;;  %v2364_v6 = vld [vmem:[%s3819_s0 + $0xcc] sm:$0xf0]  ;;  %v2362_v7 = vld [vmem:[%s3819_s0 + $0xc4] sm:$0xf]  ;;  %v3108_v15 = vor.u32 %v2367_v3, %v1902_v4 }
  0x36   :  { %1095 = vmatpush.bf16.msrb.mxu0 %v2089_v39  ;;  %v1860_v39 = vld [vmem:[%s3819_s0 + $0xa0] sm:$0xf]  ;;  %v3059_v53 = vor.u32 %v2361_v46, %v1868_v44  ;;  %v1878_v8 = vld [vmem:[%s3819_s0 + $0xd0] sm:$0xf0]  ;;  %v1884_v9 = vld [vmem:[%s3819_s0 + $0xc8] sm:$0xf] }
  0x37   :  { %v3055_v50 = vor.u32 %v2360_v40, %v1860_v39  ;;  %1238 = vmatpush.bf16.msra.mxu3 %v2029_v2  ;;  %v2365_v14 = vld [vmem:[%s3819_s0 + $0xd4] sm:$0xf0]  ;;  %v3112_v17 = vor.u32 %v2362_v7, %v1878_v8  ;;  %v2300_v23 = vld [vmem:[%s3818_s1 + $0x308] sm:$0xf]  ;;  %v2368_v35 = vld [vmem:[%s3819_s0 + $0xec] sm:$0xf0] }
  0x38   :  { %v3114_v18 = vor.u32 %v2365_v14, %v1884_v9  ;;  %v2469_v24 = vld [vmem:[%s3818_s1 + $0x314] sm:$0xf0]  ;;  %v2156_v25 = vld [vmem:[%s3818_s1 + $0x1e8] sm:$0xf]  ;;  %v2366_v36 = vld [vmem:[%s3819_s0 + $0xe4] sm:$0xf] }
  0x39   :  { %1145 = vmatpush.bf16.msrb.mxu1 %v2201_v5  ;;  %v1876_v5 = vld [vmem:[%s3819_s0 + $0xc0] sm:$0xf]  ;;  %v2433_v27 = vld [vmem:[%s3818_s1 + $0x1f4] sm:$0xf0]  ;;  %v1894_v37 = vld [vmem:[%s3819_s0 + $0xf0] sm:$0xf0] }
  0x3a   :  { %1096 = vmatpush.bf16.msrb.mxu0 %v2073_v1  ;;  %v2169_v1 = vor.u32 %v2434_v56, %v2166_v62  ;;  %v3110_v16 = vor.u32 %v2364_v6, %v1876_v5  ;;  %3827 = vst [vmem:[#allocation4_spill] sm:$0xff] %v3114_v18  ;;  %v2157_v28 = vor.u32 %v2433_v27, %v2156_v25  ;;  %v2284_v39 = vld [vmem:[%s3818_s1 + $0x2e8] sm:$0xf]  ;;  %v2465_v40 = vld [vmem:[%s3818_s1 + $0x2f4] sm:$0xf0] }
  0x3b   :  { %v2012_v42 = vld [vmem:[%s3818_s1 + $0xc8] sm:$0xf]  ;;  %v2369_v44 = vld [vmem:[%s3819_s0 + $0xf4] sm:$0xf0]  ;;  %v2285_v46 = vor.u32 %v2465_v40, %v2284_v39  ;;  %v3183_v3 = vld [vmem:[%s3820_s2] sm:$0xf] }
  0x3c   :  { %v1900_v43 = vld [vmem:[%s3819_s0 + $0xe8] sm:$0xf]  ;;  %v2397_v54 = vld [vmem:[%s3818_s1 + $0xd4] sm:$0xf0]  ;;  %v3195_v7 = vperm.slane %v3183_v3, 0 }
  0x3d   :  { %1146 = vmatpush.bf16.msrb.mxu1 %v2185_v30  ;;  %v1892_v30 = vld [vmem:[%s3819_s0 + $0xe0] sm:$0xf]  ;;  %v2013_v55 = vor.u32 %v2397_v54, %v2012_v42  ;;  %v3168_v62 = vor.u32 %v2369_v44, %v1900_v43  ;;  %v2140_v63 = vld [vmem:[%s3818_s1 + $0x1c8] sm:$0xf]  ;;  %v2429_v0 = vld [vmem:[%s3818_s1 + $0x1d4] sm:$0xf0] }
  0x3e   :  { %1097 = vmatpush.bf16.msrb.mxu0 %v2057_v26  ;;  %v2301_v26 = vor.u32 %v2469_v24, %v2300_v23  ;;  %v3164_v56 = vor.u32 %v2368_v35, %v1892_v30  ;;  %v2141_v2 = vor.u32 %v2429_v0, %v2140_v63  ;;  %v2268_v4 = vld [vmem:[%s3818_s1 + $0x2c8] sm:$0xf]  ;;  %v2461_v5 = vld [vmem:[%s3818_s1 + $0x2d4] sm:$0xf0] }
  0x3f   :  { %1239 = vmatpush.bf16.msra.mxu3 %v2013_v55  ;;  %v1996_v6 = vld [vmem:[%s3818_s1 + $0xa8] sm:$0xf]  ;;  %v2269_v9 = vor.u32 %v2461_v5, %v2268_v4  ;;  %v2393_v14 = vld [vmem:[%s3818_s1 + $0xb4] sm:$0xf0] }
  0x40   :  { %v841_v29 = vand.u32 %v2301_v26, %v2620_v38  ;;  %v1997_v23 = vor.u32 %v2393_v14, %v1996_v6  ;;  %v2457_v54 = vld [vmem:[%s3818_s1 + $0x2b4] sm:$0xf0]  ;;  %v1980_v0 = vld [vmem:[%s3818_s1 + $0x88] sm:$0xf] }
  0x41   :  { %1147 = vmatpush.bf16.msrb.mxu1 %v2169_v1 }
  0x42   :  { %1098 = vmatpush.bf16.msrb.mxu0 %v2041_v57  ;;  %1392 = vmatpush.bf16.msra.mxu2 %v841_v29  ;;  %v3166_v57 = vor.u32 %v2366_v36, %v1894_v37  ;;  %v2425_v29 = vld [vmem:[%s3818_s1 + $0x1b4] sm:$0xf0] }
  0x43   :  { %864 = vmatmul.bf16.gmra.mxu0 %v2890_v32  ;;  %1240 = vmatpush.bf16.msra.mxu3 %v1997_v23 }
  0x44   :  { %2309 = vmatmul.msk.bf16.gmra.mxu3 %vm805_vm2, %v2888_v31  ;;  %913 = vmatmul.bf16.gmra.mxu1 %v2892_v33 }
  0x45   :  { %962 = vmatmul.bf16.gmra.mxu2 %v2894_v34  ;;  %1336 = vmatpush.bf16.msra.mxu1 %v2285_v46  ;;  %v2252_v46 = vld [vmem:[%s3818_s1 + $0x2a8] sm:$0xf] }
  0x46   :  { %1287 = vmatpush.bf16.msra.mxu0 %v2157_v28  ;;  %v2124_v28 = vld [vmem:[%s3818_s1 + $0x1a8] sm:$0xf]  ;;  %v2253_v63 = vor.u32 %v2457_v54, %v2252_v46 }
  0x47   :  { %v2125_v35 = vor.u32 %v2425_v29, %v2124_v28 }
  0x49   :  { %1337 = vmatpush.bf16.msra.mxu1 %v2269_v9 }
  0x4a   :  { %1288 = vmatpush.bf16.msra.mxu0 %v2141_v2 }
  0x4d   :  { %1338 = vmatpush.bf16.msra.mxu1 %v2253_v63  ;;  %v1964_v63 = vld [vmem:[%s3818_s1 + $0x68] sm:$0xf] }
  0x4e   :  { %1289 = vmatpush.bf16.msra.mxu0 %v2125_v35 }
  0x53   :  { %869 = vmatmul.bf16.gmra.mxu0 %v2945_v59 }
  0x54   :  { %2310 = vmatmul.msk.bf16.gmra.mxu3 %vm805_vm2, %v2943_v58  ;;  %918 = vmatmul.bf16.gmra.mxu1 %v2947_v60 }
  0x55   :  { %967 = vmatmul.bf16.gmra.mxu2 %v2949_v61 }
  0x63   :  { %874 = vmatmul.bf16.gmra.mxu0 %v3000_v20 }
  0x64   :  { %2311 = vmatmul.msk.bf16.gmra.mxu3 %vm805_vm2, %v2998_v19  ;;  %923 = vmatmul.bf16.gmra.mxu1 %v3002_v21 }
  0x65   :  { %972 = vmatmul.bf16.gmra.mxu2 %v3004_v22 }
  0x73   :  { %879 = vmatmul.bf16.gmra.mxu0 %v3055_v50 }
  0x74   :  { %2312 = vmatmul.msk.bf16.gmra.mxu3 %vm805_vm2, %v3053_v49  ;;  %928 = vmatmul.bf16.gmra.mxu1 %v3057_v52 }
  0x75   :  { %977 = vmatmul.bf16.gmra.mxu2 %v3059_v53 }
  0x83   :  { %884 = vmatmul.bf16.gmra.mxu0 %v3110_v16 }
  0x84   :  { %2313 = vmatmul.msk.bf16.gmra.mxu3 %vm805_vm2, %v3108_v15  ;;  %933 = vmatmul.bf16.gmra.mxu1 %v3112_v17 }
  0x85   :  { %982 = vmatmul.bf16.gmra.mxu2 %v3114_v18 }
  0x93   :  { %889 = vmatmul.bf16.gmra.mxu0 %v3164_v56 }
  0x94   :  { %1050 = vmatmul.bf16.vlgmr.msrb.gmra.mxu3 %v2768_v45  ;;  %938 = vmatmul.bf16.gmra.mxu1 %v3166_v57 }
  0x95   :  { %987 = vmatmul.bf16.gmra.mxu2 %v3168_v62 }
  0x97   :  { %v1002_v1 = vpop.f32.mrf.mxu3 }
  0x9f   :  { %v1004_v8 = vpop.f32.mrf.mxu3 }
  0xa0   :  { %v855_v24 = vpop.f32.mrf.mxu0 }
  0xa1   :  { %v856_v25 = vadd.f32 %v855_v24, %v3195_v7  ;;  %v904_v26 = vpop.f32.mrf.mxu1 }
  0xa3   :  { %v905_v27 = vadd.f32 %v904_v26, %v856_v25  ;;  %1099 = vmatmul.bf16.vlgmr.msrb.gmra.mxu0 %v2770_v47  ;;  %v2108_v25 = vld [vmem:[%s3818_s1 + $0x188] sm:$0xf]  ;;  %v2421_v26 = vld [vmem:[%s3818_s1 + $0x194] sm:$0xf0] }
  0xa4   :  { %1055 = vmatmul.bf16.gmra.mxu3 %v2835_v11  ;;  %1148 = vmatmul.bf16.vlgmr.msrb.gmra.mxu1 %v2772_v48 }
  0xa5   :  { %2314 = vmatmul.msk.bf16.vlgmr.msrb.gmra.mxu2 %vm805_vm2, %v2647_v51 }
  0xa7   :  { %v1007_v30 = vpop.f32.mrf.mxu3 }
  0xa8   :  { %v953_v36 = vpop.f32.mrf.mxu2  ;;  %v857_v39 = vpop.f32.mrf.mxu0 }
  0xa9   :  { %v954_v37 = vadd.f32 %v953_v36, %v905_v27  ;;  %v858_v40 = vadd.f32 %v857_v39, %v3195_v7  ;;  %v906_v42 = vpop.f32.mrf.mxu1  ;;  %v2109_v27 = vor.u32 %v2421_v26, %v2108_v25  ;;  %v2417_v25 = vld [vmem:[%s3818_s1 + $0x174] sm:$0xf0] }
  0xab   :  { %v3213_v43 = vadd.f32 %v1002_v1, %v954_v37  ;;  %v907_v44 = vadd.f32 %v906_v42, %v858_v40  ;;  %v2389_v1 = vld [vmem:[%s3818_s1 + $0x94] sm:$0xf0]  ;;  %1290 = vmatpush.bf16.msra.mxu0 %v2109_v27  ;;  %v2236_v42 = vld [vmem:[%s3818_s1 + $0x288] sm:$0xf] }
  0xac   :  { %v1981_v2 = vor.u32 %v2389_v1, %v1980_v0 }
  0xae   :  { %1241 = vmatpush.bf16.msra.mxu3 %v1981_v2 }
  0xaf   :  { %v1009_v55 = vpop.f32.mrf.mxu3 }
  0xb0   :  { %v955_v4 = vpop.f32.mrf.mxu2  ;;  %v860_v6 = vpop.f32.mrf.mxu0 }
  0xb1   :  { %v956_v5 = vadd.f32 %v955_v4, %v907_v44  ;;  %v861_v9 = vadd.f32 %v860_v6, %v3195_v7  ;;  %v909_v14 = vpop.f32.mrf.mxu1  ;;  %v2453_v44 = vld [vmem:[%s3818_s1 + $0x294] sm:$0xf0] }
  0xb2   :  { %v2237_v54 = vor.u32 %v2453_v44, %v2236_v42  ;;  %v2220_v42 = vld [vmem:[%s3818_s1 + $0x268] sm:$0xf]  ;;  %v2449_v44 = vld [vmem:[%s3818_s1 + $0x274] sm:$0xf0] }
  0xb3   :  { %v3228_v23 = vadd.f32 %v1004_v8, %v956_v5  ;;  %v910_v24 = vadd.f32 %v909_v14, %v861_v9  ;;  %1104 = vmatmul.bf16.gmra.mxu0 %v2837_v12 }
  0xb4   :  { %1060 = vmatmul.bf16.gmra.mxu3 %v2890_v32  ;;  %1153 = vmatmul.bf16.gmra.mxu1 %v2839_v13 }
  0xb5   :  { %2315 = vmatmul.msk.bf16.gmra.mxu2 %vm805_vm2, %v2760_v41  ;;  %1339 = vmatpush.bf16.msra.mxu1 %v2237_v54 }
  0xb7   :  { %v1012_v8 = vpop.f32.mrf.mxu3 }
  0xb8   :  { %v958_v28 = vpop.f32.mrf.mxu2  ;;  %v862_v35 = vpop.f32.mrf.mxu0 }
  0xb9   :  { %v959_v29 = vadd.f32 %v958_v28, %v910_v24  ;;  %v863_v36 = vadd.f32 %v862_v35, %v3195_v7  ;;  %v911_v37 = vpop.f32.mrf.mxu1  ;;  %v2092_v24 = vld [vmem:[%s3818_s1 + $0x168] sm:$0xf] }
  0xba   :  { %v2093_v26 = vor.u32 %v2417_v25, %v2092_v24  ;;  %v2076_v25 = vld [vmem:[%s3818_s1 + $0x148] sm:$0xf] }
  0xbb   :  { %v3242_v39 = vadd.f32 %v1007_v30, %v959_v29  ;;  %v912_v40 = vadd.f32 %v911_v37, %v863_v36  ;;  %v2385_v30 = vld [vmem:[%s3818_s1 + $0x74] sm:$0xf0] }
  0xbc   :  { %v1965_v0 = vor.u32 %v2385_v30, %v1964_v63  ;;  %1291 = vmatpush.bf16.msra.mxu0 %v2093_v26  ;;  %v2221_v63 = vor.u32 %v2449_v44, %v2220_v42  ;;  %v1948_v30 = vld [vmem:[%s3818_s1 + $0x48] sm:$0xf]  ;;  %v2413_v26 = vld [vmem:[%s3818_s1 + $0x154] sm:$0xf0] }
  0xbe   :  { %1242 = vmatpush.bf16.msra.mxu3 %v1965_v0  ;;  %1340 = vmatpush.bf16.msra.mxu1 %v2221_v63  ;;  %v2204_v63 = vld [vmem:[%s3818_s1 + $0x248] sm:$0xf] }
  0xbf   :  { %v1014_v46 = vpop.f32.mrf.mxu3 }
  0xc0   :  { %v960_v1 = vpop.f32.mrf.mxu2  ;;  %v865_v4 = vpop.f32.mrf.mxu0 }
  0xc1   :  { %v961_v2 = vadd.f32 %v960_v1, %v912_v40  ;;  %v866_v5 = vadd.f32 %v865_v4, %v3195_v7  ;;  %v914_v6 = vpop.f32.mrf.mxu1 }
  0xc3   :  { %v3257_v9 = vadd.f32 %v1009_v55, %v961_v2  ;;  %v915_v14 = vadd.f32 %v914_v6, %v866_v5  ;;  %1109 = vmatmul.bf16.gmra.mxu0 %v2892_v33 }
  0xc4   :  { %1065 = vmatmul.bf16.gmra.mxu3 %v2945_v59  ;;  %1158 = vmatmul.bf16.gmra.mxu1 %v2894_v34 }
  0xc5   :  { %2316 = vmatmul.msk.bf16.gmra.mxu2 %vm805_vm2, %v2833_v10 }
  0xc7   :  { %v1017_v55 = vpop.f32.mrf.mxu3 }
  0xc8   :  { %v963_v27 = vpop.f32.mrf.mxu2  ;;  %v867_v29 = vpop.f32.mrf.mxu0 }
  0xc9   :  { %v964_v28 = vadd.f32 %v963_v27, %v915_v14  ;;  %v868_v35 = vadd.f32 %v867_v29, %v3195_v7  ;;  %v916_v36 = vpop.f32.mrf.mxu1  ;;  %v2077_v27 = vor.u32 %v2413_v26, %v2076_v25 }
  0xcb   :  { %v3271_v37 = vadd.f32 %v1012_v8, %v964_v28  ;;  %v917_v40 = vadd.f32 %v916_v36, %v868_v35  ;;  %v2381_v8 = vld [vmem:[%s3818_s1 + $0x54] sm:$0xf0]  ;;  %1292 = vmatpush.bf16.msra.mxu0 %v2077_v27 }
  0xcc   :  { %v1949_v0 = vor.u32 %v2381_v8, %v1948_v30  ;;  %v2445_v30 = vld [vmem:[%s3818_s1 + $0x254] sm:$0xf0] }
  0xce   :  { %1243 = vmatpush.bf16.msra.mxu3 %v1949_v0  ;;  %v2205_v0 = vor.u32 %v2445_v30, %v2204_v63 }
  0xcf   :  { %v1019_v54 = vpop.f32.mrf.mxu3 }
  0xd0   :  { %v965_v1 = vpop.f32.mrf.mxu2  ;;  %v870_v4 = vpop.f32.mrf.mxu0  ;;  %1341 = vmatpush.bf16.msra.mxu1 %v2205_v0 }
  0xd1   :  { %v966_v2 = vadd.f32 %v965_v1, %v917_v40  ;;  %v871_v5 = vadd.f32 %v870_v4, %v3195_v7  ;;  %v919_v6 = vpop.f32.mrf.mxu1  ;;  %v1932_v1 = vld [vmem:[%s3818_s1 + $0x28] sm:$0xf] }
  0xd3   :  { %v3286_v14 = vadd.f32 %v1014_v46, %v966_v2  ;;  %v920_v24 = vadd.f32 %v919_v6, %v871_v5  ;;  %1114 = vmatmul.bf16.gmra.mxu0 %v2947_v60 }
  0xd4   :  { %1070 = vmatmul.bf16.gmra.mxu3 %v3000_v20  ;;  %1163 = vmatmul.bf16.gmra.mxu1 %v2949_v61 }
  0xd5   :  { %2317 = vmatmul.msk.bf16.gmra.mxu2 %vm805_vm2, %v2888_v31 }
  0xd7   :  { %v1022_v46 = vpop.f32.mrf.mxu3 }
  0xd8   :  { %v968_v28 = vpop.f32.mrf.mxu2  ;;  %v872_v35 = vpop.f32.mrf.mxu0 }
  0xd9   :  { %v969_v29 = vadd.f32 %v968_v28, %v920_v24  ;;  %v873_v36 = vadd.f32 %v872_v35, %v3195_v7  ;;  %v921_v40 = vpop.f32.mrf.mxu1  ;;  %v2060_v28 = vld [vmem:[%s3818_s1 + $0x128] sm:$0xf] }
  0xdb   :  { %v3300_v42 = vadd.f32 %v1017_v55, %v969_v29  ;;  %v922_v44 = vadd.f32 %v921_v40, %v873_v36  ;;  %v2377_v55 = vld [vmem:[%s3818_s1 + $0x34] sm:$0xf0] }
  0xdc   :  { %v1933_v2 = vor.u32 %v2377_v55, %v1932_v1  ;;  %v2409_v29 = vld [vmem:[%s3818_s1 + $0x134] sm:$0xf0]  ;;  %v2188_v55 = vld [vmem:[%s3818_s1 + $0x228] sm:$0xf] }
  0xdd   :  { %v2061_v35 = vor.u32 %v2409_v29, %v2060_v28 }
  0xde   :  { %1244 = vmatpush.bf16.msra.mxu3 %v1933_v2  ;;  %v2441_v2 = vld [vmem:[%s3818_s1 + $0x234] sm:$0xf0] }
  0xdf   :  { %v1024_v8 = vpop.f32.mrf.mxu3  ;;  %1293 = vmatpush.bf16.msra.mxu0 %v2061_v35 }
  0xe0   :  { %v970_v4 = vpop.f32.mrf.mxu2  ;;  %v875_v6 = vpop.f32.mrf.mxu0 }
  0xe1   :  { %v971_v5 = vadd.f32 %v970_v4, %v922_v44  ;;  %v876_v24 = vadd.f32 %v875_v6, %v3195_v7  ;;  %v924_v25 = vpop.f32.mrf.mxu1  ;;  %v1916_v6 = vld [vmem:[%s3818_s1 + $0x8] sm:$0xf] }
  0xe3   :  { %v3315_v26 = vadd.f32 %v1019_v54, %v971_v5  ;;  %v925_v27 = vadd.f32 %v924_v25, %v876_v24  ;;  %1119 = vmatmul.bf16.gmra.mxu0 %v3002_v21  ;;  %v2189_v5 = vor.u32 %v2441_v2, %v2188_v55 }
  0xe4   :  { %1075 = vmatmul.bf16.gmra.mxu3 %v3055_v50  ;;  %1168 = vmatmul.bf16.gmra.mxu1 %v3004_v22 }
  0xe5   :  { %2318 = vmatmul.msk.bf16.gmra.mxu2 %vm805_vm2, %v2943_v58  ;;  %1342 = vmatpush.bf16.msra.mxu1 %v2189_v5 }
  0xe7   :  { %v1027_v54 = vpop.f32.mrf.mxu3 }
  0xe8   :  { %v973_v36 = vpop.f32.mrf.mxu2  ;;  %v877_v44 = vpop.f32.mrf.mxu0 }
  0xe9   :  { %v974_v40 = vadd.f32 %v973_v36, %v925_v27  ;;  %v878_v63 = vadd.f32 %v877_v44, %v3195_v7  ;;  %v926_v30 = vpop.f32.mrf.mxu1  ;;  %v2044_v44 = vld [vmem:[%s3818_s1 + $0x108] sm:$0xf] }
  0xeb   :  { %v3329_v0 = vadd.f32 %v1022_v46, %v974_v40  ;;  %v927_v1 = vadd.f32 %v926_v30, %v878_v63  ;;  %v2373_v46 = vld [vmem:[%s3818_s1 + $0x14] sm:$0xf0] }
  0xec   :  { %v1917_v24 = vor.u32 %v2373_v46, %v1916_v6  ;;  %v2405_v63 = vld [vmem:[%s3818_s1 + $0x114] sm:$0xf0] }
  0xed   :  { %v2045_v30 = vor.u32 %v2405_v63, %v2044_v44 }
  0xee   :  { %1245 = vmatpush.bf16.msra.mxu3 %v1917_v24 }
  0xef   :  { %v1029_v4 = vpop.f32.mrf.mxu3  ;;  %1294 = vmatpush.bf16.msra.mxu0 %v2045_v30 }
  0xf0   :  { %v975_v25 = vpop.f32.mrf.mxu2  ;;  %v880_v28 = vpop.f32.mrf.mxu0 }
  0xf1   :  { %v976_v27 = vadd.f32 %v975_v25, %v927_v1  ;;  %v881_v29 = vadd.f32 %v880_v28, %v3195_v7  ;;  %v929_v35 = vpop.f32.mrf.mxu1  ;;  %v2172_v25 = vld [vmem:[%s3818_s1 + $0x208] sm:$0xf] }
  0xf3   :  { %v3344_v36 = vadd.f32 %v1024_v8, %v976_v27  ;;  %v930_v40 = vadd.f32 %v929_v35, %v881_v29  ;;  %1124 = vmatmul.bf16.gmra.mxu0 %v3057_v52  ;;  %v2437_v27 = vld [vmem:[%s3818_s1 + $0x214] sm:$0xf0]  ;;  %v2399_v35 = vld [vmem:[%s3818_s1 + $0xec] sm:$0xf] }
  0xf4   :  { %1080 = vmatmul.bf16.gmra.mxu3 %v3110_v16  ;;  %1173 = vmatmul.bf16.gmra.mxu1 %v3059_v53  ;;  %v2173_v29 = vor.u32 %v2437_v27, %v2172_v25  ;;  %v2431_v27 = vld [vmem:[%s3818_s1 + $0x1ec] sm:$0xf] }
  0xf5   :  { %2319 = vmatmul.msk.bf16.gmra.mxu2 %vm805_vm2, %v2998_v19 }
  0xf6   :  { %1343 = vmatpush.bf16.msra.mxu1 %v2173_v29  ;;  %v2158_v29 = vld [vmem:[%s3818_s1 + $0x1f8] sm:$0xf0] }
  0xf7   :  { %v1032_v8 = vpop.f32.mrf.mxu3 }
  0xf8   :  { %v978_v1 = vpop.f32.mrf.mxu2  ;;  %v882_v2 = vpop.f32.mrf.mxu0 }
  0xf9   :  { %v979_v55 = vadd.f32 %v978_v1, %v930_v40  ;;  %v883_v5 = vadd.f32 %v882_v2, %v3195_v7  ;;  %v931_v6 = vpop.f32.mrf.mxu1 }
  0xfb   :  { %v3358_v46 = vadd.f32 %v1027_v54, %v979_v55  ;;  %v932_v24 = vadd.f32 %v931_v6, %v883_v5  ;;  %v2030_v54 = vld [vmem:[%s3818_s1 + $0xf8] sm:$0xf0]  ;;  %v2467_v6 = vld [vmem:[%s3818_s1 + $0x30c] sm:$0xf] }
  0xfc   :  { %v2033_v40 = vor.u32 %v2399_v35, %v2030_v54  ;;  %v2161_v35 = vor.u32 %v2431_v27, %v2158_v29  ;;  %v2286_v27 = vld [vmem:[%s3818_s1 + $0x2f8] sm:$0xf0] }
  0xfe   :  { %1434 = vmatpush.bf16.msrb.mxu3 %v2033_v40  ;;  %1483 = vmatpush.bf16.msrb.mxu0 %v2161_v35 }
  0xff   :  { %v1034_v28 = vpop.f32.mrf.mxu3 }
 0x100   :  { %v980_v44 = vpop.f32.mrf.mxu2  ;;  %v885_v30 = vpop.f32.mrf.mxu0 }
 0x101   :  { %v981_v63 = vadd.f32 %v980_v44, %v932_v24  ;;  %v886_v1 = vadd.f32 %v885_v30, %v3195_v7  ;;  %v934_v55 = vpop.f32.mrf.mxu1  ;;  %v2302_v24 = vld [vmem:[%s3818_s1 + $0x318] sm:$0xf0] }
 0x102   :  { %v2305_v25 = vor.u32 %v2467_v6, %v2302_v24  ;;  %v2463_v24 = vld [vmem:[%s3818_s1 + $0x2ec] sm:$0xf] }
 0x103   :  { %v3373_v2 = vadd.f32 %v1029_v4, %v981_v63  ;;  %v935_v5 = vadd.f32 %v934_v55, %v886_v1  ;;  %1129 = vmatmul.bf16.gmra.mxu0 %v3112_v17 }
 0x104   :  { %1085 = vmatmul.bf16.gmra.mxu3 %v3164_v56  ;;  %1178 = vmatmul.bf16.gmra.mxu1 %v3114_v18  ;;  %v844_v40 = vand.u32 %v2305_v25, %v2620_v38  ;;  %v2289_v38 = vor.u32 %v2463_v24, %v2286_v27  ;;  %v2142_v24 = vld [vmem:[%s3818_s1 + $0x1d8] sm:$0xf0] }
 0x105   :  { %2320 = vmatmul.msk.bf16.gmra.mxu2 %vm805_vm2, %v3053_v49 }
 0x106   :  { %1588 = vmatpush.bf16.msrb.mxu2 %v844_v40  ;;  %1532 = vmatpush.bf16.msrb.mxu1 %v2289_v38 }
 0x107   :  { %v1037_v4 = vpop.f32.mrf.mxu3 }
 0x108   :  { %v983_v54 = vpop.f32.mrf.mxu2  ;;  %v887_v63 = vpop.f32.mrf.mxu0 }
 0x109   :  { %v984_v44 = vadd.f32 %v983_v54, %v935_v5  ;;  %v888_v30 = vadd.f32 %v887_v63, %v3195_v7  ;;  %v936_v1 = vpop.f32.mrf.mxu1  ;;  %v2395_v5 = vld [vmem:[%s3818_s1 + $0xcc] sm:$0xf] }
 0x10b   :  { %v3394_v55 = vadd.f32 %v1032_v8, %v984_v44  ;;  %v937_v6 = vadd.f32 %v936_v1, %v888_v30  ;;  %v2014_v8 = vld [vmem:[%s3818_s1 + $0xd8] sm:$0xf0] }
 0x10c   :  { %v2017_v25 = vor.u32 %v2395_v5, %v2014_v8 }
 0x10e   :  { %1435 = vmatpush.bf16.msrb.mxu3 %v2017_v25 }
 0x10f   :  { %v1039_v29 = vpop.f32.mrf.mxu3 }
 0x110   :  { %v985_v35 = vpop.f32.mrf.mxu2  ;;  %v890_v40 = vpop.f32.mrf.mxu0 }
 0x111   :  { %v986_v54 = vadd.f32 %v985_v35, %v937_v6  ;;  %v891_v44 = vadd.f32 %v890_v40, %v3195_v7  ;;  %v939_v63 = vpop.f32.mrf.mxu1  ;;  %v2427_v6 = vld [vmem:[%s3818_s1 + $0x1cc] sm:$0xf] }
 0x112   :  { %v2145_v27 = vor.u32 %v2427_v6, %v2142_v24  ;;  %v2270_v6 = vld [vmem:[%s3818_s1 + $0x2d8] sm:$0xf0] }
 0x113   :  { %v3409_v30 = vadd.f32 %v1034_v28, %v986_v54  ;;  %v940_v1 = vadd.f32 %v939_v63, %v891_v44  ;;  %1134 = vmatmul.bf16.gmra.mxu0 %v3166_v57  ;;  %v3424_v54 = vperm.slane %v3183_v3, 1  ;;  %v2459_v63 = vld [vmem:[%s3818_s1 + $0x2cc] sm:$0xf] }
 0x114   :  { %1246 = vmatmul.bf16.vlgmr.msra.gmra.mxu3 %v2768_v45  ;;  %1183 = vmatmul.bf16.gmra.mxu1 %v3168_v62  ;;  %v2391_v3 = vld [vmem:[%s3818_s1 + $0xac] sm:$0xf] }
 0x115   :  { %2321 = vmatmul.msk.bf16.gmra.mxu2 %vm805_vm2, %v3108_v15  ;;  %1484 = vmatpush.bf16.msrb.mxu0 %v2145_v27  ;;  %v2273_v27 = vor.u32 %v2459_v63, %v2270_v6  ;;  %v2126_v63 = vld [vmem:[%s3818_s1 + $0x1b8] sm:$0xf0] }
 0x117   :  { %v1051_v28 = vpop.f32.mrf.mxu3  ;;  %1533 = vmatpush.bf16.msrb.mxu1 %v2273_v27 }
 0x118   :  { %v988_v38 = vpop.f32.mrf.mxu2  ;;  %v892_v8 = vpop.f32.mrf.mxu0 }
 0x119   :  { %v989_v5 = vadd.f32 %v988_v38, %v940_v1  ;;  %v893_v25 = vadd.f32 %v892_v8, %v3195_v7  ;;  %v941_v35 = vpop.f32.mrf.mxu1  ;;  %v1052_v1 = vadd.f32 %v1051_v28, %v3424_v54  ;;  %v1998_v7 = vld [vmem:[%s3818_s1 + $0xb8] sm:$0xf0] }
 0x11b   :  { %v3426_v40 = vadd.f32 %v1037_v4, %v989_v5  ;;  %v942_v44 = vadd.f32 %v941_v35, %v893_v25  ;;  %v2001_v4 = vor.u32 %v2391_v3, %v1998_v7 }
 0x11d   :  { %3828 = vst [vmem:[#allocation5_spill] sm:$0xff] %v3426_v40  ;;  %1436 = vmatpush.bf16.msrb.mxu3 %v2001_v4 }
 0x11f   :  { %v1053_v24 = vpop.f32.mrf.mxu3 }
 0x120   :  { %v990_v38 = vpop.f32.mrf.mxu2  ;;  %v1100_v8 = vpop.f32.mrf.mxu0 }
 0x121   :  { %v991_v5 = vadd.f32 %v990_v38, %v942_v44  ;;  %v1101_v25 = vadd.f32 %v1100_v8, %v1052_v1  ;;  %v1149_v35 = vpop.f32.mrf.mxu1  ;;  %v2423_v44 = vld [vmem:[%s3818_s1 + $0x1ac] sm:$0xf]  ;;  %v1054_v1 = vadd.f32 %v1053_v24, %v3424_v54  ;;  %v2254_v24 = vld [vmem:[%s3818_s1 + $0x2b8] sm:$0xf0] }
 0x122   :  { %v2129_v6 = vor.u32 %v2423_v44, %v2126_v63 }
 0x123   :  { %v3441_v40 = vadd.f32 %v1039_v29, %v991_v5  ;;  %v1150_v28 = vadd.f32 %v1149_v35, %v1101_v25  ;;  %1295 = vmatmul.bf16.vlgmr.msra.gmra.mxu0 %v2770_v47  ;;  %v1630_v5 = vmax.f32 %v3213_v43, 0.0 }
 0x124   :  { %1251 = vmatmul.bf16.gmra.mxu3 %v2835_v11  ;;  %1344 = vmatmul.bf16.vlgmr.msra.gmra.mxu1 %v2772_v48 }
 0x125   :  { %2322 = vmatmul.msk.bf16.vlgmr.msra.gmra.mxu2 %vm805_vm2, %v2647_v51  ;;  %1485 = vmatpush.bf16.msrb.mxu0 %v2129_v6  ;;  %v2455_v51 = vld [vmem:[%s3818_s1 + $0x2ac] sm:$0xf]  ;;  %v1982_v6 = vld [vmem:[%s3818_s1 + $0x98] sm:$0xf0] }
 0x126   :  { %v2257_v43 = vor.u32 %v2455_v51, %v2254_v24 }
 0x127   :  { %v1056_v29 = vpop.f32.mrf.mxu3 }
 0x128   :  { %v1198_v27 = vpop.f32.mrf.mxu2  ;;  %v1102_v7 = vpop.f32.mrf.mxu0  ;;  %v1057_v44 = vadd.f32 %v1056_v29, %v3424_v54  ;;  %1534 = vmatpush.bf16.msrb.mxu1 %v2257_v43 }
 0x129   :  { %v1199_v3 = vadd.f32 %v1198_v27, %v1150_v28  ;;  %v1103_v4 = vadd.f32 %v1102_v7, %v1054_v1  ;;  %v1151_v38 = vpop.f32.mrf.mxu1  ;;  %v2387_v28 = vld [vmem:[%s3818_s1 + $0x8c] sm:$0xf] }
 0x12a   :  { %v1985_v1 = vor.u32 %v2387_v28, %v1982_v6 }
 0x12b   :  { %v1631_v8 = vmax.f32 %v1199_v3, 0.0  ;;  %v1152_v25 = vadd.f32 %v1151_v38, %v1103_v4 }
 0x12c   :  { %1437 = vmatpush.bf16.msrb.mxu3 %v1985_v1 }
 0x12d   :  { %v3456_v35 = vmax.f32 %v1630_v5, %v1631_v8  ;;  %v1634_v5 = vmax.f32 %v3228_v23, 0.0  ;;  %v2110_v23 = vld [vmem:[%s3818_s1 + $0x198] sm:$0xf0] }
 0x12f   :  { %v1058_v63 = vpop.f32.mrf.mxu3 }
 0x130   :  { %v1200_v27 = vpop.f32.mrf.mxu2  ;;  %v1105_v7 = vpop.f32.mrf.mxu0 }
 0x131   :  { %v1201_v3 = vadd.f32 %v1200_v27, %v1152_v25  ;;  %v1106_v4 = vadd.f32 %v1105_v7, %v1057_v44  ;;  %v1154_v38 = vpop.f32.mrf.mxu1  ;;  %v2419_v25 = vld [vmem:[%s3818_s1 + $0x18c] sm:$0xf]  ;;  %v1059_v44 = vadd.f32 %v1058_v63, %v3424_v54  ;;  %v1638_v7 = vmax.f32 %v3242_v39, 0.0  ;;  %v2238_v63 = vld [vmem:[%s3818_s1 + $0x298] sm:$0xf0] }
 0x132   :  { %v2113_v28 = vor.u32 %v2419_v25, %v2110_v23 }
 0x133   :  { %v1635_v8 = vmax.f32 %v1201_v3, 0.0  ;;  %v1155_v29 = vadd.f32 %v1154_v38, %v1106_v4  ;;  %1300 = vmatmul.bf16.gmra.mxu0 %v2837_v12 }
 0x134   :  { %1256 = vmatmul.bf16.gmra.mxu3 %v2890_v32  ;;  %1349 = vmatmul.bf16.gmra.mxu1 %v2839_v13 }
 0x135   :  { %v3474_v51 = vmax.f32 %v1634_v5, %v1635_v8  ;;  %2323 = vmatmul.msk.bf16.gmra.mxu2 %vm805_vm2, %v2760_v41  ;;  %1486 = vmatpush.bf16.msrb.mxu0 %v2113_v28  ;;  %v2451_v8 = vld [vmem:[%s3818_s1 + $0x28c] sm:$0xf]  ;;  %v1966_v28 = vld [vmem:[%s3818_s1 + $0x78] sm:$0xf0] }
 0x136   :  { %v2241_v39 = vor.u32 %v2451_v8, %v2238_v63 }
 0x137   :  { %v1061_v24 = vpop.f32.mrf.mxu3 }
 0x138   :  { %v1203_v43 = vpop.f32.mrf.mxu2  ;;  %v1107_v1 = vpop.f32.mrf.mxu0  ;;  %v1062_v25 = vadd.f32 %v1061_v24, %v3424_v54  ;;  %1535 = vmatpush.bf16.msrb.mxu1 %v2241_v39 }
 0x139   :  { %v1204_v6 = vadd.f32 %v1203_v43, %v1155_v29  ;;  %v1108_v27 = vadd.f32 %v1107_v1, %v1059_v44  ;;  %v1156_v3 = vpop.f32.mrf.mxu1  ;;  %v2383_v29 = vld [vmem:[%s3818_s1 + $0x6c] sm:$0xf] }
 0x13a   :  { %v1969_v44 = vor.u32 %v2383_v29, %v1966_v28 }
 0x13b   :  { %v1639_v4 = vmax.f32 %v1204_v6, 0.0  ;;  %v1157_v38 = vadd.f32 %v1156_v3, %v1108_v27 }
 0x13c   :  { %1438 = vmatpush.bf16.msrb.mxu3 %v1969_v44 }
 0x13d   :  { %v3487_v5 = vmax.f32 %v1638_v7, %v1639_v4  ;;  %v1642_v7 = vmax.f32 %v3257_v9, 0.0  ;;  %v2094_v9 = vld [vmem:[%s3818_s1 + $0x178] sm:$0xf0] }
 0x13f   :  { %v1063_v23 = vpop.f32.mrf.mxu3 }
 0x140   :  { %v1205_v43 = vpop.f32.mrf.mxu2  ;;  %v1110_v1 = vpop.f32.mrf.mxu0 }
 0x141   :  { %v1206_v6 = vadd.f32 %v1205_v43, %v1157_v38  ;;  %v1111_v27 = vadd.f32 %v1110_v1, %v1062_v25  ;;  %v1159_v3 = vpop.f32.mrf.mxu1  ;;  %v2415_v38 = vld [vmem:[%s3818_s1 + $0x16c] sm:$0xf]  ;;  %v1064_v25 = vadd.f32 %v1063_v23, %v3424_v54  ;;  %v1646_v1 = vmax.f32 %v3271_v37, 0.0  ;;  %v2222_v23 = vld [vmem:[%s3818_s1 + $0x278] sm:$0xf0] }
 0x142   :  { %v2097_v29 = vor.u32 %v2415_v38, %v2094_v9 }
 0x143   :  { %v1643_v4 = vmax.f32 %v1206_v6, 0.0  ;;  %v1160_v24 = vadd.f32 %v1159_v3, %v1111_v27  ;;  %1305 = vmatmul.bf16.gmra.mxu0 %v2892_v33 }
 0x144   :  { %1261 = vmatmul.bf16.gmra.mxu3 %v2945_v59  ;;  %1354 = vmatmul.bf16.gmra.mxu1 %v2894_v34 }
 0x145   :  { %v3505_v8 = vmax.f32 %v1642_v7, %v1643_v4  ;;  %2324 = vmatmul.msk.bf16.gmra.mxu2 %vm805_vm2, %v2833_v10  ;;  %1487 = vmatpush.bf16.msrb.mxu0 %v2097_v29  ;;  %v2447_v4 = vld [vmem:[%s3818_s1 + $0x26c] sm:$0xf]  ;;  %v1950_v29 = vld [vmem:[%s3818_s1 + $0x58] sm:$0xf0] }
 0x146   :  { %v2225_v37 = vor.u32 %v2447_v4, %v2222_v23 }
 0x147   :  { %v1066_v63 = vpop.f32.mrf.mxu3 }
 0x148   :  { %v1208_v39 = vpop.f32.mrf.mxu2  ;;  %v1112_v44 = vpop.f32.mrf.mxu0  ;;  %v1067_v38 = vadd.f32 %v1066_v63, %v3424_v54  ;;  %1536 = vmatpush.bf16.msrb.mxu1 %v2225_v37 }
 0x149   :  { %v1209_v28 = vadd.f32 %v1208_v39, %v1160_v24  ;;  %v1113_v43 = vadd.f32 %v1112_v44, %v1064_v25  ;;  %v1161_v6 = vpop.f32.mrf.mxu1  ;;  %v2379_v24 = vld [vmem:[%s3818_s1 + $0x4c] sm:$0xf] }
 0x14a   :  { %v1953_v25 = vor.u32 %v2379_v24, %v1950_v29 }
 0x14b   :  { %v1647_v27 = vmax.f32 %v1209_v28, 0.0  ;;  %v1162_v3 = vadd.f32 %v1161_v6, %v1113_v43 }
 0x14c   :  { %1439 = vmatpush.bf16.msrb.mxu3 %v1953_v25 }
 0x14d   :  { %v3518_v7 = vmax.f32 %v1646_v1, %v1647_v27  ;;  %v1650_v1 = vmax.f32 %v3286_v14, 0.0  ;;  %v2078_v14 = vld [vmem:[%s3818_s1 + $0x158] sm:$0xf0] }
 0x14f   :  { %v1068_v9 = vpop.f32.mrf.mxu3 }
 0x150   :  { %v1210_v39 = vpop.f32.mrf.mxu2  ;;  %v1115_v44 = vpop.f32.mrf.mxu0 }
 0x151   :  { %v1211_v28 = vadd.f32 %v1210_v39, %v1162_v3  ;;  %v1116_v43 = vadd.f32 %v1115_v44, %v1067_v38  ;;  %v1164_v6 = vpop.f32.mrf.mxu1  ;;  %v2411_v3 = vld [vmem:[%s3818_s1 + $0x14c] sm:$0xf]  ;;  %v1069_v38 = vadd.f32 %v1068_v9, %v3424_v54  ;;  %v1654_v44 = vmax.f32 %v3300_v42, 0.0  ;;  %v2206_v9 = vld [vmem:[%s3818_s1 + $0x258] sm:$0xf0] }
 0x152   :  { %v2081_v24 = vor.u32 %v2411_v3, %v2078_v14 }
 0x153   :  { %v1651_v27 = vmax.f32 %v1211_v28, 0.0  ;;  %v1165_v63 = vadd.f32 %v1164_v6, %v1116_v43  ;;  %1310 = vmatmul.bf16.gmra.mxu0 %v2947_v60 }
 0x154   :  { %1266 = vmatmul.bf16.gmra.mxu3 %v3000_v20  ;;  %1359 = vmatmul.bf16.gmra.mxu1 %v2949_v61 }
 0x155   :  { %v3536_v4 = vmax.f32 %v1650_v1, %v1651_v27  ;;  %2325 = vmatmul.msk.bf16.gmra.mxu2 %vm805_vm2, %v2888_v31  ;;  %1488 = vmatpush.bf16.msrb.mxu0 %v2081_v24  ;;  %v2443_v27 = vld [vmem:[%s3818_s1 + $0x24c] sm:$0xf]  ;;  %v1934_v24 = vld [vmem:[%s3818_s1 + $0x38] sm:$0xf0] }
 0x156   :  { %v2209_v42 = vor.u32 %v2443_v27, %v2206_v9 }
 0x157   :  { %v1071_v23 = vpop.f32.mrf.mxu3 }
 0x158   :  { %v1213_v37 = vpop.f32.mrf.mxu2  ;;  %v1117_v25 = vpop.f32.mrf.mxu0  ;;  %v1072_v3 = vadd.f32 %v1071_v23, %v3424_v54  ;;  %1537 = vmatpush.bf16.msrb.mxu1 %v2209_v42 }
 0x159   :  { %v1214_v29 = vadd.f32 %v1213_v37, %v1165_v63  ;;  %v1118_v39 = vadd.f32 %v1117_v25, %v1069_v38  ;;  %v1166_v28 = vpop.f32.mrf.mxu1  ;;  %v2375_v63 = vld [vmem:[%s3818_s1 + $0x2c] sm:$0xf] }
 0x15a   :  { %v1937_v38 = vor.u32 %v2375_v63, %v1934_v24 }
 0x15b   :  { %v1655_v43 = vmax.f32 %v1214_v29, 0.0  ;;  %v1167_v6 = vadd.f32 %v1166_v28, %v1118_v39 }
 0x15c   :  { %1440 = vmatpush.bf16.msrb.mxu3 %v1937_v38 }
 0x15d   :  { %v3549_v1 = vmax.f32 %v1654_v44, %v1655_v43  ;;  %v1658_v44 = vmax.f32 %v3315_v26, 0.0  ;;  %v2062_v26 = vld [vmem:[%s3818_s1 + $0x138] sm:$0xf0] }
 0x15f   :  { %v1073_v14 = vpop.f32.mrf.mxu3 }
 0x160   :  { %v1215_v37 = vpop.f32.mrf.mxu2  ;;  %v1120_v25 = vpop.f32.mrf.mxu0 }
 0x161   :  { %v1216_v29 = vadd.f32 %v1215_v37, %v1167_v6  ;;  %v1121_v39 = vadd.f32 %v1120_v25, %v1072_v3  ;;  %v1169_v28 = vpop.f32.mrf.mxu1  ;;  %v2407_v6 = vld [vmem:[%s3818_s1 + $0x12c] sm:$0xf]  ;;  %v1074_v3 = vadd.f32 %v1073_v14, %v3424_v54  ;;  %v1662_v25 = vmax.f32 %v3329_v0, 0.0  ;;  %v2190_v14 = vld [vmem:[%s3818_s1 + $0x238] sm:$0xf0] }
 0x162   :  { %v2065_v63 = vor.u32 %v2407_v6, %v2062_v26 }
 0x163   :  { %v1659_v43 = vmax.f32 %v1216_v29, 0.0  ;;  %v1170_v23 = vadd.f32 %v1169_v28, %v1121_v39  ;;  %1315 = vmatmul.bf16.gmra.mxu0 %v3002_v21 }
 0x164   :  { %1271 = vmatmul.bf16.gmra.mxu3 %v3055_v50  ;;  %1364 = vmatmul.bf16.gmra.mxu1 %v3004_v22 }
 0x165   :  { %v3567_v27 = vmax.f32 %v1658_v44, %v1659_v43  ;;  %2326 = vmatmul.msk.bf16.gmra.mxu2 %vm805_vm2, %v2943_v58  ;;  %1489 = vmatpush.bf16.msrb.mxu0 %v2065_v63  ;;  %v2439_v43 = vld [vmem:[%s3818_s1 + $0x22c] sm:$0xf]  ;;  %v1918_v63 = vld [vmem:[%s3818_s1 + $0x18] sm:$0xf0] }
 0x166   :  { %v2193_v0 = vor.u32 %v2439_v43, %v2190_v14 }
 0x167   :  { %v1076_v9 = vpop.f32.mrf.mxu3 }
 0x168   :  { %v1218_v42 = vpop.f32.mrf.mxu2  ;;  %v1122_v38 = vpop.f32.mrf.mxu0  ;;  %v1077_v6 = vadd.f32 %v1076_v9, %v3424_v54  ;;  %1538 = vmatpush.bf16.msrb.mxu1 %v2193_v0 }
 0x169   :  { %v1219_v24 = vadd.f32 %v1218_v42, %v1170_v23  ;;  %v1123_v37 = vadd.f32 %v1122_v38, %v1074_v3  ;;  %v1171_v29 = vpop.f32.mrf.mxu1  ;;  %v2371_v23 = vld [vmem:[%s3818_s1 + $0xc] sm:$0xf] }
 0x16a   :  { %v1921_v3 = vor.u32 %v2371_v23, %v1918_v63 }
 0x16b   :  { %v1663_v39 = vmax.f32 %v1219_v24, 0.0  ;;  %v1172_v28 = vadd.f32 %v1171_v29, %v1123_v37 }
 0x16c   :  { %1441 = vmatpush.bf16.msrb.mxu3 %v1921_v3 }
 0x16d   :  { %v3580_v44 = vmax.f32 %v1662_v25, %v1663_v39  ;;  %v1666_v25 = vmax.f32 %v3344_v36, 0.0  ;;  %v2046_v36 = vld [vmem:[%s3818_s1 + $0x118] sm:$0xf0] }
 0x16f   :  { %v1078_v26 = vpop.f32.mrf.mxu3 }
 0x170   :  { %v1220_v42 = vpop.f32.mrf.mxu2  ;;  %v1125_v38 = vpop.f32.mrf.mxu0 }
 0x171   :  { %v1221_v24 = vadd.f32 %v1220_v42, %v1172_v28  ;;  %v1126_v37 = vadd.f32 %v1125_v38, %v1077_v6  ;;  %v1174_v29 = vpop.f32.mrf.mxu1  ;;  %v2403_v28 = vld [vmem:[%s3818_s1 + $0x10c] sm:$0xf]  ;;  %v1079_v6 = vadd.f32 %v1078_v26, %v3424_v54  ;;  %v1670_v38 = vmax.f32 %v3358_v46, 0.0  ;;  %v2174_v26 = vld [vmem:[%s3818_s1 + $0x218] sm:$0xf0] }
 0x172   :  { %v2049_v23 = vor.u32 %v2403_v28, %v2046_v36 }
 0x173   :  { %v1667_v39 = vmax.f32 %v1221_v24, 0.0  ;;  %v1175_v9 = vadd.f32 %v1174_v29, %v1126_v37  ;;  %1320 = vmatmul.bf16.gmra.mxu0 %v3057_v52 }
 0x174   :  { %1276 = vmatmul.bf16.gmra.mxu3 %v3110_v16  ;;  %1369 = vmatmul.bf16.gmra.mxu1 %v3059_v53 }
 0x175   :  { %v3598_v43 = vmax.f32 %v1666_v25, %v1667_v39  ;;  %2327 = vmatmul.msk.bf16.gmra.mxu2 %vm805_vm2, %v2998_v19  ;;  %1490 = vmatpush.bf16.msrb.mxu0 %v2049_v23  ;;  %v2435_v39 = vld [vmem:[%s3818_s1 + $0x20c] sm:$0xf] }
 0x176   :  { %v2177_v36 = vor.u32 %v2435_v39, %v2174_v26 }
 0x177   :  { %v1081_v14 = vpop.f32.mrf.mxu3 }
 0x178   :  { %v1223_v0 = vpop.f32.mrf.mxu2  ;;  %v1127_v3 = vpop.f32.mrf.mxu0  ;;  %v1082_v28 = vadd.f32 %v1081_v14, %v3424_v54  ;;  %1539 = vmatpush.bf16.msrb.mxu1 %v2177_v36  ;;  %v1678_v36 = vmax.f32 %v3394_v55, 0.0 }
 0x179   :  { %v1224_v63 = vadd.f32 %v1223_v0, %v1175_v9  ;;  %v1128_v42 = vadd.f32 %v1127_v3, %v1079_v6  ;;  %v1176_v24 = vpop.f32.mrf.mxu1  ;;  %v1674_v3 = vmax.f32 %v3373_v2, 0.0 }
 0x17b   :  { %v1671_v37 = vmax.f32 %v1224_v63, 0.0  ;;  %v1177_v29 = vadd.f32 %v1176_v24, %v1128_v42 }
 0x17d   :  { %v3611_v25 = vmax.f32 %v1670_v38, %v1671_v37 }
 0x17f   :  { %v1083_v9 = vpop.f32.mrf.mxu3 }
 0x180   :  { %v1225_v23 = vpop.f32.mrf.mxu2  ;;  %v1130_v46 = vpop.f32.mrf.mxu0  ;;  %v1084_v37 = vadd.f32 %v1083_v9, %v3424_v54  ;;  %v1682_v9 = vmax.f32 %v3409_v30, 0.0 }
 0x181   :  { %v1226_v6 = vadd.f32 %v1225_v23, %v1177_v29  ;;  %v1131_v0 = vadd.f32 %v1130_v46, %v1082_v28  ;;  %v1179_v63 = vpop.f32.mrf.mxu1 }
 0x183   :  { %v1675_v42 = vmax.f32 %v1226_v6, 0.0  ;;  %v1180_v24 = vadd.f32 %v1179_v63, %v1131_v0  ;;  %1325 = vmatmul.bf16.gmra.mxu0 %v3112_v17 }
 0x184   :  { %1281 = vmatmul.bf16.gmra.mxu3 %v3164_v56  ;;  %1374 = vmatmul.bf16.gmra.mxu1 %v3114_v18 }
 0x185   :  { %v3623_v38 = vmax.f32 %v1674_v3, %v1675_v42  ;;  %2328 = vmatmul.msk.bf16.gmra.mxu2 %vm805_vm2, %v3053_v49 }
 0x187   :  { %3829 = vst [vmem:[#allocation6_spill] sm:$0xff] %v3623_v38  ;;  %v1086_v14 = vpop.f32.mrf.mxu3 }
 0x188   :  { %v1228_v29 = vpop.f32.mrf.mxu2  ;;  %v1132_v26 = vpop.f32.mrf.mxu0  ;;  %v1087_v0 = vadd.f32 %v1086_v14, %v3424_v54 }
 0x189   :  { %v1229_v39 = vadd.f32 %v1228_v29, %v1180_v24  ;;  %v1133_v2 = vadd.f32 %v1132_v26, %v1084_v37  ;;  %v1181_v28 = vpop.f32.mrf.mxu1 }
 0x18b   :  { %v1679_v23 = vmax.f32 %v1229_v39, 0.0  ;;  %v1182_v6 = vadd.f32 %v1181_v28, %v1133_v2 }
 0x18d   :  { %v3630_v46 = vmax.f32 %v1678_v36, %v1679_v23 }
 0x18f   :  { %v1088_v63 = vpop.f32.mrf.mxu3 }
 0x190   :  { %v1230_v3 = vpop.f32.mrf.mxu2  ;;  %v1135_v49 = vpop.f32.mrf.mxu0  ;;  %v1089_v29 = vadd.f32 %v1088_v63, %v3424_v54 }
 0x191   :  { %v1231_v42 = vadd.f32 %v1230_v3, %v1182_v6  ;;  %v1136_v18 = vadd.f32 %v1135_v49, %v1087_v0  ;;  %v1184_v38 = vpop.f32.mrf.mxu1 }
 0x193   :  { %v1683_v24 = vmax.f32 %v1231_v42, 0.0  ;;  %v1185_v37 = vadd.f32 %v1184_v38, %v1136_v18  ;;  %1330 = vmatmul.bf16.gmra.mxu0 %v3166_v57  ;;  %v3830_v38 = vld [vmem:[#allocation5_spill] sm:$0xff] }
 0x194   :  { %1442 = vmatmul.bf16.vlgmr.msrb.gmra.mxu3 %v2768_v45  ;;  %1379 = vmatmul.bf16.gmra.mxu1 %v3168_v62  ;;  %v3645_v45 = vld [vmem:[%s3820_s2] sm:$0xf]  ;;  %v1686_v28 = vmax.f32 %v3830_v38, 0.0 }
 0x195   :  { %v3636_v55 = vmax.f32 %v1682_v9, %v1683_v24  ;;  %2329 = vmatmul.msk.bf16.gmra.mxu2 %vm805_vm2, %v3108_v15  ;;  %v3648_v18 = vperm.slane %v3645_v45, 2 }
 0x197   :  { %v1247_v14 = vpop.f32.mrf.mxu3 }
 0x198   :  { %v1233_v49 = vpop.f32.mrf.mxu2  ;;  %v1137_v26 = vpop.f32.mrf.mxu0  ;;  %v1248_v54 = vadd.f32 %v1247_v14, %v3648_v18 }
 0x199   :  { %v1234_v39 = vadd.f32 %v1233_v49, %v1185_v37  ;;  %v1138_v30 = vadd.f32 %v1137_v26, %v1089_v29  ;;  %v1186_v2 = vpop.f32.mrf.mxu1  ;;  %v1690_v37 = vmax.f32 %v3441_v40, 0.0  ;;  %v3831_v26 = vld [vmem:[#allocation2_spill] sm:$0xff] }
 0x19b   :  { %v1687_v36 = vmax.f32 %v1234_v39, 0.0  ;;  %v1187_v23 = vadd.f32 %v1186_v2, %v1138_v30 }
 0x19d   :  { %v3651_v6 = vmax.f32 %v1686_v28, %v1687_v36 }
 0x19f   :  { %v1249_v0 = vpop.f32.mrf.mxu3 }
 0x1a0   :  { %v1235_v63 = vpop.f32.mrf.mxu2  ;;  %v1296_v42 = vpop.f32.mrf.mxu0  ;;  %v1250_v30 = vadd.f32 %v1249_v0, %v3648_v18 }
 0x1a1   :  { %v1236_v3 = vadd.f32 %v1235_v63, %v1187_v23  ;;  %v1297_v9 = vadd.f32 %v1296_v42, %v1248_v54  ;;  %v1345_v24 = vpop.f32.mrf.mxu1 }
 0x1a3   :  { %v1691_v29 = vmax.f32 %v1236_v3, 0.0  ;;  %v1346_v49 = vadd.f32 %v1345_v24, %v1297_v9  ;;  %1491 = vmatmul.bf16.vlgmr.msrb.gmra.mxu0 %v2770_v47 }
 0x1a4   :  { %1447 = vmatmul.bf16.gmra.mxu3 %v2835_v11  ;;  %1540 = vmatmul.bf16.vlgmr.msrb.gmra.mxu1 %v2772_v48 }
 0x1a5   :  { %v3657_v39 = vmax.f32 %v1690_v37, %v1691_v29  ;;  %2330 = vmatmul.msk.bf16.vlgmr.msrb.gmra.mxu2 %vm805_vm2, %v3831_v26 }
 0x1a7   :  { %v1252_v14 = vpop.f32.mrf.mxu3 }
 0x1a8   :  { %v1394_v2 = vpop.f32.mrf.mxu2  ;;  %v1298_v28 = vpop.f32.mrf.mxu0  ;;  %v1253_v47 = vadd.f32 %v1252_v14, %v3648_v18 }
 0x1a9   :  { %v1395_v38 = vadd.f32 %v1394_v2, %v1346_v49  ;;  %v1299_v40 = vadd.f32 %v1298_v28, %v1250_v30  ;;  %v1347_v36 = vpop.f32.mrf.mxu1 }
 0x1ab   :  { %v1632_v23 = vmax.f32 %v1395_v38, 0.0  ;;  %v1348_v11 = vadd.f32 %v1347_v36, %v1299_v40 }
 0x1ad   :  { %v3664_v54 = vmax.f32 %v3456_v35, %v1632_v23 }
 0x1af   :  { %v1254_v63 = vpop.f32.mrf.mxu3 }
 0x1b0   :  { %v1396_v48 = vpop.f32.mrf.mxu2  ;;  %v1301_v42 = vpop.f32.mrf.mxu0  ;;  %v1255_v49 = vadd.f32 %v1254_v63, %v3648_v18 }
 0x1b1   :  { %v1397_v3 = vadd.f32 %v1396_v48, %v1348_v11  ;;  %v1302_v9 = vadd.f32 %v1301_v42, %v1253_v47  ;;  %v1350_v24 = vpop.f32.mrf.mxu1 }
 0x1b3   :  { %v1636_v37 = vmax.f32 %v1397_v3, 0.0  ;;  %v1351_v0 = vadd.f32 %v1350_v24, %v1302_v9  ;;  %1496 = vmatmul.bf16.gmra.mxu0 %v2837_v12 }
 0x1b4   :  { %1452 = vmatmul.bf16.gmra.mxu3 %v2890_v32  ;;  %1545 = vmatmul.bf16.gmra.mxu1 %v2839_v13 }
 0x1b5   :  { %v3670_v29 = vmax.f32 %v3474_v51, %v1636_v37  ;;  %2331 = vmatmul.msk.bf16.gmra.mxu2 %vm805_vm2, %v2760_v41 }
 0x1b7   :  { %v1257_v35 = vpop.f32.mrf.mxu3 }
 0x1b8   :  { %v1399_v26 = vpop.f32.mrf.mxu2  ;;  %v1303_v30 = vpop.f32.mrf.mxu0  ;;  %v1258_v51 = vadd.f32 %v1257_v35, %v3648_v18 }
 0x1b9   :  { %v1400_v14 = vadd.f32 %v1399_v26, %v1351_v0  ;;  %v1304_v2 = vadd.f32 %v1303_v30, %v1255_v49  ;;  %v1352_v38 = vpop.f32.mrf.mxu1 }
 0x1bb   :  { %v1640_v32 = vmax.f32 %v1400_v14, 0.0  ;;  %v1353_v28 = vadd.f32 %v1352_v38, %v1304_v2 }
 0x1bd   :  { %v3677_v12 = vmax.f32 %v3487_v5, %v1640_v32 }
 0x1bf   :  { %v1259_v40 = vpop.f32.mrf.mxu3 }
 0x1c0   :  { %v1401_v13 = vpop.f32.mrf.mxu2  ;;  %v1306_v23 = vpop.f32.mrf.mxu0  ;;  %v1260_v3 = vadd.f32 %v1259_v40, %v3648_v18 }
 0x1c1   :  { %v1402_v36 = vadd.f32 %v1401_v13, %v1353_v28  ;;  %v1307_v41 = vadd.f32 %v1306_v23, %v1258_v51  ;;  %v1355_v11 = vpop.f32.mrf.mxu1 }
 0x1c3   :  { %v1644_v47 = vmax.f32 %v1402_v36, 0.0  ;;  %v1356_v63 = vadd.f32 %v1355_v11, %v1307_v41  ;;  %1501 = vmatmul.bf16.gmra.mxu0 %v2892_v33 }
 0x1c4   :  { %1457 = vmatmul.bf16.gmra.mxu3 %v2945_v59  ;;  %1550 = vmatmul.bf16.gmra.mxu1 %v2894_v34 }
 0x1c5   :  { %v3683_v48 = vmax.f32 %v3505_v8, %v1644_v47  ;;  %2332 = vmatmul.msk.bf16.gmra.mxu2 %vm805_vm2, %v2833_v10 }
 0x1c7   :  { %v1262_v5 = vpop.f32.mrf.mxu3 }
 0x1c8   :  { %v1404_v42 = vpop.f32.mrf.mxu2  ;;  %v1308_v24 = vpop.f32.mrf.mxu0  ;;  %v1263_v8 = vadd.f32 %v1262_v5, %v3648_v18 }
 0x1c9   :  { %v1405_v9 = vadd.f32 %v1404_v42, %v1356_v63  ;;  %v1309_v37 = vadd.f32 %v1308_v24, %v1260_v3  ;;  %v1357_v0 = vpop.f32.mrf.mxu1 }
 0x1cb   :  { %v1648_v59 = vmax.f32 %v1405_v9, 0.0  ;;  %v1358_v35 = vadd.f32 %v1357_v0, %v1309_v37 }
 0x1cd   :  { %v3690_v33 = vmax.f32 %v3518_v7, %v1648_v59 }
 0x1cf   :  { %v1264_v49 = vpop.f32.mrf.mxu3 }
 0x1d0   :  { %v1406_v34 = vpop.f32.mrf.mxu2  ;;  %v1311_v14 = vpop.f32.mrf.mxu0  ;;  %v1265_v28 = vadd.f32 %v1264_v49, %v3648_v18 }
 0x1d1   :  { %v1407_v26 = vadd.f32 %v1406_v34, %v1358_v35  ;;  %v1312_v10 = vadd.f32 %v1311_v14, %v1263_v8  ;;  %v1360_v30 = vpop.f32.mrf.mxu1 }
 0x1d3   :  { %v1652_v2 = vmax.f32 %v1407_v26, 0.0  ;;  %v1361_v38 = vadd.f32 %v1360_v30, %v1312_v10  ;;  %1506 = vmatmul.bf16.gmra.mxu0 %v2947_v60 }
 0x1d4   :  { %1462 = vmatmul.bf16.gmra.mxu3 %v3000_v20  ;;  %1555 = vmatmul.bf16.gmra.mxu1 %v2949_v61 }
 0x1d5   :  { %v3696_v32 = vmax.f32 %v3536_v4, %v1652_v2  ;;  %2333 = vmatmul.msk.bf16.gmra.mxu2 %vm805_vm2, %v2888_v31 }
 0x1d7   :  { %v1267_v7 = vpop.f32.mrf.mxu3 }
 0x1d8   :  { %v1409_v51 = vpop.f32.mrf.mxu2  ;;  %v1313_v13 = vpop.f32.mrf.mxu0  ;;  %v1268_v4 = vadd.f32 %v1267_v7, %v3648_v18 }
 0x1d9   :  { %v1410_v40 = vadd.f32 %v1409_v51, %v1361_v38  ;;  %v1314_v36 = vadd.f32 %v1313_v13, %v1265_v28  ;;  %v1362_v23 = vpop.f32.mrf.mxu1 }
 0x1db   :  { %v1656_v20 = vmax.f32 %v1410_v40, 0.0  ;;  %v1363_v41 = vadd.f32 %v1362_v23, %v1314_v36 }
 0x1dd   :  { %v3703_v60 = vmax.f32 %v3549_v1, %v1656_v20 }
 0x1df   :  { %v1269_v11 = vpop.f32.mrf.mxu3 }
 0x1e0   :  { %v1411_v61 = vpop.f32.mrf.mxu2  ;;  %v1316_v63 = vpop.f32.mrf.mxu0  ;;  %v1270_v24 = vadd.f32 %v1269_v11, %v3648_v18 }
 0x1e1   :  { %v1412_v47 = vadd.f32 %v1411_v61, %v1363_v41  ;;  %v1317_v31 = vadd.f32 %v1316_v63, %v1268_v4  ;;  %v1365_v5 = vpop.f32.mrf.mxu1  ;;  %v3832_v63 = vld [vmem:[#allocation6_spill] sm:$0xff] }
 0x1e3   :  { %v1660_v3 = vmax.f32 %v1412_v47, 0.0  ;;  %v1366_v42 = vadd.f32 %v1365_v5, %v1317_v31  ;;  %1511 = vmatmul.bf16.gmra.mxu0 %v3002_v21  ;;  %v3833_v5 = vld [vmem:[#allocation4_spill] sm:$0xff] }
 0x1e4   :  { %1467 = vmatmul.bf16.gmra.mxu3 %v3055_v50  ;;  %1560 = vmatmul.bf16.gmra.mxu1 %v3004_v22 }
 0x1e5   :  { %v3709_v9 = vmax.f32 %v3567_v27, %v1660_v3  ;;  %2334 = vmatmul.msk.bf16.gmra.mxu2 %vm805_vm2, %v2943_v58 }
 0x1e7   :  { %v1272_v1 = vpop.f32.mrf.mxu3 }
 0x1e8   :  { %v1414_v37 = vpop.f32.mrf.mxu2  ;;  %v1318_v59 = vpop.f32.mrf.mxu0  ;;  %v1273_v27 = vadd.f32 %v1272_v1, %v3648_v18 }
 0x1e9   :  { %v1415_v0 = vadd.f32 %v1414_v37, %v1366_v42  ;;  %v1319_v35 = vadd.f32 %v1318_v59, %v1270_v24  ;;  %v1367_v8 = vpop.f32.mrf.mxu1 }
 0x1eb   :  { %v1664_v50 = vmax.f32 %v1415_v0, 0.0  ;;  %v1368_v49 = vadd.f32 %v1367_v8, %v1319_v35 }
 0x1ed   :  { %v3716_v21 = vmax.f32 %v3580_v44, %v1664_v50 }
 0x1ef   :  { %v1274_v34 = vpop.f32.mrf.mxu3 }
 0x1f0   :  { %v1416_v22 = vpop.f32.mrf.mxu2  ;;  %v1321_v14 = vpop.f32.mrf.mxu0  ;;  %v1275_v7 = vadd.f32 %v1274_v34, %v3648_v18 }
 0x1f1   :  { %v1417_v26 = vadd.f32 %v1416_v22, %v1368_v49  ;;  %v1322_v58 = vadd.f32 %v1321_v14, %v1273_v27  ;;  %v1370_v10 = vpop.f32.mrf.mxu1 }
 0x1f3   :  { %v1668_v30 = vmax.f32 %v1417_v26, 0.0  ;;  %v1371_v2 = vadd.f32 %v1370_v10, %v1322_v58  ;;  %1516 = vmatmul.bf16.gmra.mxu0 %v3057_v52 }
 0x1f4   :  { %1472 = vmatmul.bf16.gmra.mxu3 %v3110_v16  ;;  %1565 = vmatmul.bf16.gmra.mxu1 %v3059_v53 }
 0x1f5   :  { %v3722_v38 = vmax.f32 %v3598_v43, %v1668_v30  ;;  %2335 = vmatmul.msk.bf16.gmra.mxu2 %vm805_vm2, %v2998_v19 }
 0x1f7   :  { %v1277_v44 = vpop.f32.mrf.mxu3 }
 0x1f8   :  { %v1419_v28 = vpop.f32.mrf.mxu2  ;;  %v1323_v40 = vpop.f32.mrf.mxu0  ;;  %v1278_v43 = vadd.f32 %v1277_v44, %v3648_v18 }
 0x1f9   :  { %v1420_v51 = vadd.f32 %v1419_v28, %v1371_v2  ;;  %v1324_v13 = vadd.f32 %v1323_v40, %v1275_v7  ;;  %v1372_v36 = vpop.f32.mrf.mxu1 }
 0x1fb   :  { %v1672_v16 = vmax.f32 %v1420_v51, 0.0  ;;  %v1373_v23 = vadd.f32 %v1372_v36, %v1324_v13 }
 0x1fd   :  { %v3729_v52 = vmax.f32 %v3611_v25, %v1672_v16  ;;  %v3834_v25 = vld [vmem:[#allocation3_spill] sm:$0xff] }
 0x1ff   :  { %v1279_v20 = vpop.f32.mrf.mxu3 }
 0x200   :  { %v1421_v53 = vpop.f32.mrf.mxu2  ;;  %v1326_v4 = vpop.f32.mrf.mxu0  ;;  %v1280_v42 = vadd.f32 %v1279_v20, %v3648_v18 }
 0x201   :  { %v1422_v41 = vadd.f32 %v1421_v53, %v1373_v23  ;;  %v1327_v19 = vadd.f32 %v1326_v4, %v1278_v43  ;;  %v1375_v11 = vpop.f32.mrf.mxu1 }
 0x203   :  { %v1676_v61 = vmax.f32 %v1422_v41, 0.0  ;;  %v1376_v47 = vadd.f32 %v1375_v11, %v1327_v19  ;;  %1521 = vmatmul.bf16.gmra.mxu0 %v3112_v17 }
 0x204   :  { %1477 = vmatmul.bf16.gmra.mxu3 %v3164_v56  ;;  %1570 = vmatmul.bf16.gmra.mxu1 %v3833_v5 }
 0x205   :  { %v3735_v31 = vmax.f32 %v3832_v63, %v1676_v61  ;;  %2336 = vmatmul.msk.bf16.gmra.mxu2 %vm805_vm2, %v3834_v25 }
 0x207   :  { %v1282_v3 = vpop.f32.mrf.mxu3 }
 0x208   :  { %v1424_v1 = vpop.f32.mrf.mxu2  ;;  %v1328_v37 = vpop.f32.mrf.mxu0  ;;  %v1283_v8 = vadd.f32 %v1282_v3, %v3648_v18 }
 0x209   :  { %v1425_v24 = vadd.f32 %v1424_v1, %v1376_v47  ;;  %v1329_v0 = vadd.f32 %v1328_v37, %v1280_v42  ;;  %v1377_v59 = vpop.f32.mrf.mxu1 }
 0x20b   :  { %v1680_v56 = vmax.f32 %v1425_v24, 0.0  ;;  %v1378_v35 = vadd.f32 %v1377_v59, %v1329_v0 }
 0x20d   :  { %v3742_v17 = vmax.f32 %v3630_v46, %v1680_v56 }
 0x20f   :  { %v1284_v50 = vpop.f32.mrf.mxu3 }
 0x210   :  { %v1426_v49 = vpop.f32.mrf.mxu2  ;;  %v1331_v34 = vpop.f32.mrf.mxu0  ;;  %v1285_v30 = vadd.f32 %v1284_v50, %v3648_v18 }
 0x211   :  { %v1427_v27 = vadd.f32 %v1426_v49, %v1378_v35  ;;  %v1332_v22 = vadd.f32 %v1331_v34, %v1283_v8  ;;  %v1380_v26 = vpop.f32.mrf.mxu1 }
 0x213   :  { %v1684_v14 = vmax.f32 %v1427_v27, 0.0  ;;  %v1381_v58 = vadd.f32 %v1380_v26, %v1332_v22  ;;  %1526 = vmatmul.bf16.gmra.mxu0 %v3166_v57 }
 0x214   :  { %1575 = vmatmul.bf16.gmra.mxu1 %v3168_v62 }
 0x215   :  { %v3747_v10 = vmax.f32 %v3636_v55, %v1684_v14  ;;  %2337 = vmatmul.msk.bf16.gmra.mxu2 %vm805_vm2, %v3108_v15  ;;  %v3757_v55 = vperm.slane %v3645_v45, 3 }
 0x217   :  { %v1443_v46 = vpop.f32.mrf.mxu3 }
 0x218   :  { %v1429_v2 = vpop.f32.mrf.mxu2  ;;  %v1333_v7 = vpop.f32.mrf.mxu0  ;;  %v1444_v15 = vadd.f32 %v1443_v46, %v3757_v55 }
 0x219   :  { %v1430_v44 = vadd.f32 %v1429_v2, %v1381_v58  ;;  %v1334_v28 = vadd.f32 %v1333_v7, %v1285_v30  ;;  %v1382_v51 = vpop.f32.mrf.mxu1 }
 0x21b   :  { %v1688_v40 = vmax.f32 %v1430_v44, 0.0  ;;  %v1383_v13 = vadd.f32 %v1382_v51, %v1334_v28 }
 0x21d   :  { %v3754_v57 = vmax.f32 %v3651_v6, %v1688_v40 }
 0x21f   :  { %v1445_v62 = vpop.f32.mrf.mxu3 }
 0x220   :  { %v1431_v36 = vpop.f32.mrf.mxu2  ;;  %v1492_v23 = vpop.f32.mrf.mxu0  ;;  %v1446_v6 = vadd.f32 %v1445_v62, %v3757_v55 }
 0x221   :  { %v1432_v16 = vadd.f32 %v1431_v36, %v1383_v13  ;;  %v1541_v18 = vpop.f32.mrf.mxu1  ;;  %v1493_v53 = vadd.f32 %v1492_v23, %v1444_v15 }
 0x223   :  { %v1692_v43 = vmax.f32 %v1432_v16, 0.0  ;;  %v1542_v19 = vadd.f32 %v1541_v18, %v1493_v53 }
 0x225   :  { %v3761_v20 = vmax.f32 %v3657_v39, %v1692_v43 }
 0x227   :  { %v1448_v41 = vpop.f32.mrf.mxu3 }
 0x228   :  { %v1590_v4 = vpop.f32.mrf.mxu2  ;;  %v1494_v11 = vpop.f32.mrf.mxu0  ;;  %v1449_v42 = vadd.f32 %v1448_v41, %v3757_v55 }
 0x229   :  { %v1543_v45 = vpop.f32.mrf.mxu1  ;;  %v1495_v61 = vadd.f32 %v1494_v11, %v1446_v6  ;;  %v1591_v47 = vadd.f32 %v1590_v4, %v1542_v19 }
 0x22b   :  { %v1544_v5 = vadd.f32 %v1543_v45, %v1495_v61  ;;  %v1633_v3 = vmax.f32 %v1591_v47, 0.0 }
 0x22d   :  { %v1726_v0 = vmax.f32 %v3664_v54, %v1633_v3 }
 0x22f   :  { %v1450_v63 = vpop.f32.mrf.mxu3 }
 0x230   :  { %v1592_v25 = vpop.f32.mrf.mxu2  ;;  %v1497_v24 = vpop.f32.mrf.mxu0  ;;  %v1451_v49 = vadd.f32 %v1450_v63, %v3757_v55 }
 0x231   :  { %v1593_v1 = vadd.f32 %v1592_v25, %v1544_v5  ;;  %v1546_v39 = vpop.f32.mrf.mxu1  ;;  %v1498_v56 = vadd.f32 %v1497_v24, %v1449_v42 }
 0x233   :  { %v1637_v37 = vmax.f32 %v1593_v1, 0.0  ;;  %v1547_v27 = vadd.f32 %v1546_v39, %v1498_v56 }
 0x235   :  { %v1727_v59 = vmax.f32 %v3670_v29, %v1637_v37 }
 0x237   :  { %v1453_v35 = vpop.f32.mrf.mxu3  ;;  %v2473_v8 = vpack.c.bf16 %v1727_v59, %v1726_v0 }
 0x238   :  { %v1595_v50 = vpop.f32.mrf.mxu2  ;;  %v1499_v34 = vpop.f32.mrf.mxu0  ;;  %v1454_v29 = vadd.f32 %v1453_v35, %v3757_v55 }
 0x239   :  { %2474 = vst [vmem:[%s3821_s3] sm:$0xff] %v2473_v8   ;;  %v1548_v22 = vpop.f32.mrf.mxu1  ;;  %v1500_v26 = vadd.f32 %v1499_v34, %v1451_v49  ;;  %v1596_v14 = vadd.f32 %v1595_v50, %v1547_v27 }
 0x23b   :  { %v1549_v46 = vadd.f32 %v1548_v22, %v1500_v26  ;;  %v1641_v30 = vmax.f32 %v1596_v14, 0.0 }
 0x23d   :  { %v1728_v51 = vmax.f32 %v3677_v12, %v1641_v30 }
 0x23f   :  { %v1455_v58 = vpop.f32.mrf.mxu3 }
 0x240   :  { %v1597_v54 = vpop.f32.mrf.mxu2  ;;  %v1502_v44 = vpop.f32.mrf.mxu0  ;;  %v1456_v16 = vadd.f32 %v1455_v58, %v3757_v55 }
 0x241   :  { %v1598_v2 = vadd.f32 %v1597_v54, %v1549_v46  ;;  %v1551_v7 = vpop.f32.mrf.mxu1  ;;  %v1503_v13 = vadd.f32 %v1502_v44, %v1454_v29 }
 0x243   :  { %v1645_v28 = vmax.f32 %v1598_v2, 0.0  ;;  %v1552_v23 = vadd.f32 %v1551_v7, %v1503_v13 }
 0x245   :  { %v1729_v40 = vmax.f32 %v3683_v48, %v1645_v28 }
 0x247   :  { %v1458_v62 = vpop.f32.mrf.mxu3  ;;  %v2478_v36 = vpack.c.bf16 %v1729_v40, %v1728_v51 }
 0x248   :  { %v1600_v15 = vpop.f32.mrf.mxu2  ;;  %v1504_v18 = vpop.f32.mrf.mxu0  ;;  %v1459_v48 = vadd.f32 %v1458_v62, %v3757_v55 }
 0x249   :  { %2510 = vst [vmem:[%s3821_s3 + $0x8] sm:$0xff] %v2478_v36   ;;  %v1553_v43 = vpop.f32.mrf.mxu1  ;;  %v1505_v53 = vadd.f32 %v1504_v18, %v1456_v16  ;;  %v1601_v41 = vadd.f32 %v1600_v15, %v1552_v23 }
 0x24b   :  { %v1554_v6 = vadd.f32 %v1553_v43, %v1505_v53  ;;  %v1649_v19 = vmax.f32 %v1601_v41, 0.0 }
 0x24d   :  { %v1730_v63 = vmax.f32 %v3690_v33, %v1649_v19 }
 0x24f   :  { %v1460_v4 = vpop.f32.mrf.mxu3 }
 0x250   :  { %v1602_v12 = vpop.f32.mrf.mxu2  ;;  %v1507_v45 = vpop.f32.mrf.mxu0  ;;  %v1461_v24 = vadd.f32 %v1460_v4, %v3757_v55 }
 0x251   :  { %v1603_v11 = vadd.f32 %v1602_v12, %v1554_v6  ;;  %v1556_v61 = vpop.f32.mrf.mxu1  ;;  %v1508_v25 = vadd.f32 %v1507_v45, %v1459_v48 }
 0x253   :  { %v1653_v47 = vmax.f32 %v1603_v11, 0.0  ;;  %v1557_v39 = vadd.f32 %v1556_v61, %v1508_v25 }
 0x255   :  { %v1731_v5 = vmax.f32 %v3696_v32, %v1653_v47 }
 0x257   :  { %v1463_v3 = vpop.f32.mrf.mxu3  ;;  %v2483_v42 = vpack.c.bf16 %v1731_v5, %v1730_v63 }
 0x258   :  { %v1605_v1 = vpop.f32.mrf.mxu2  ;;  %v1509_v37 = vpop.f32.mrf.mxu0  ;;  %v1464_v32 = vadd.f32 %v1463_v3, %v3757_v55 }
 0x259   :  { %2511 = vst [vmem:[%s3821_s3 + $0x10] sm:$0xff] %v2483_v42   ;;  %v1558_v0 = vpop.f32.mrf.mxu1  ;;  %v1510_v59 = vadd.f32 %v1509_v37, %v1461_v24  ;;  %v1606_v56 = vadd.f32 %v1605_v1, %v1557_v39 }
 0x25b   :  { %v1559_v8 = vadd.f32 %v1558_v0, %v1510_v59  ;;  %v1657_v50 = vmax.f32 %v1606_v56, 0.0 }
 0x25d   :  { %v1732_v26 = vmax.f32 %v3703_v60, %v1657_v50 }
 0x25f   :  { %v1465_v35 = vpop.f32.mrf.mxu3 }
 0x260   :  { %v1607_v33 = vpop.f32.mrf.mxu2  ;;  %v1512_v27 = vpop.f32.mrf.mxu0  ;;  %v1466_v29 = vadd.f32 %v1465_v35, %v3757_v55 }
 0x261   :  { %v1608_v49 = vadd.f32 %v1607_v33, %v1559_v8  ;;  %v1561_v34 = vpop.f32.mrf.mxu1  ;;  %v1513_v58 = vadd.f32 %v1512_v27, %v1464_v32 }
 0x263   :  { %v1661_v22 = vmax.f32 %v1608_v49, 0.0  ;;  %v1562_v2 = vadd.f32 %v1561_v34, %v1513_v58 }
 0x265   :  { %v1733_v14 = vmax.f32 %v3709_v9, %v1661_v22 }
 0x267   :  { %v1468_v46 = vpop.f32.mrf.mxu3  ;;  %v2488_v54 = vpack.c.bf16 %v1733_v14, %v1732_v26 }
 0x268   :  { %v1610_v30 = vpop.f32.mrf.mxu2  ;;  %v1514_v44 = vpop.f32.mrf.mxu0  ;;  %v1469_v9 = vadd.f32 %v1468_v46, %v3757_v55 }
 0x269   :  { %2512 = vst [vmem:[%s3821_s3 + $0x18] sm:$0xff] %v2488_v54   ;;  %v1563_v7 = vpop.f32.mrf.mxu1  ;;  %v1515_v28 = vadd.f32 %v1514_v44, %v1466_v29  ;;  %v1611_v51 = vadd.f32 %v1610_v30, %v1562_v2 }
 0x26b   :  { %v1564_v13 = vadd.f32 %v1563_v7, %v1515_v28  ;;  %v1665_v62 = vmax.f32 %v1611_v51, 0.0 }
 0x26d   :  { %v1734_v18 = vmax.f32 %v3716_v21, %v1665_v62 }
 0x26f   :  { %v1470_v40 = vpop.f32.mrf.mxu3 }
 0x270   :  { %v1612_v60 = vpop.f32.mrf.mxu2  ;;  %v1517_v15 = vpop.f32.mrf.mxu0  ;;  %v1471_v12 = vadd.f32 %v1470_v40, %v3757_v55 }
 0x271   :  { %v1613_v36 = vadd.f32 %v1612_v60, %v1564_v13  ;;  %v1566_v16 = vpop.f32.mrf.mxu1  ;;  %v1518_v53 = vadd.f32 %v1517_v15, %v1469_v9 }
 0x273   :  { %v1669_v23 = vmax.f32 %v1613_v36, 0.0  ;;  %v1567_v19 = vadd.f32 %v1566_v16, %v1518_v53 }
 0x275   :  { %v1735_v43 = vmax.f32 %v3722_v38, %v1669_v23 }
 0x277   :  { %v2493_v41 = vpack.c.bf16 %v1735_v43, %v1734_v18  ;;  %v1473_v6 = vpop.f32.mrf.mxu3 }
 0x278   :  { %v1615_v4 = vpop.f32.mrf.mxu2  ;;  %v1519_v48 = vpop.f32.mrf.mxu0  ;;  %v1474_v38 = vadd.f32 %v1473_v6, %v3757_v55 }
 0x279   :  { %2513 = vst [vmem:[%s3821_s3 + $0x20] sm:$0xff] %v2493_v41   ;;  %v1568_v11 = vpop.f32.mrf.mxu1  ;;  %v1520_v45 = vadd.f32 %v1519_v48, %v1471_v12  ;;  %v1616_v61 = vadd.f32 %v1615_v4, %v1567_v19 }
 0x27b   :  { %v1569_v47 = vadd.f32 %v1568_v11, %v1520_v45  ;;  %v1673_v21 = vmax.f32 %v1616_v61, 0.0 }
 0x27d   :  { %v1736_v24 = vmax.f32 %v3729_v52, %v1673_v21 }
 0x27f   :  { %v1475_v3 = vpop.f32.mrf.mxu3 }
 0x280   :  { %v1617_v63 = vpop.f32.mrf.mxu2  ;;  %v1522_v25 = vpop.f32.mrf.mxu0  ;;  %v1476_v56 = vadd.f32 %v1475_v3, %v3757_v55 }
 0x281   :  { %v1618_v5 = vadd.f32 %v1617_v63, %v1569_v47  ;;  %v1571_v42 = vpop.f32.mrf.mxu1  ;;  %v1523_v37 = vadd.f32 %v1522_v25, %v1474_v38 }
 0x283   :  { %v1677_v1 = vmax.f32 %v1618_v5, 0.0  ;;  %v1572_v35 = vadd.f32 %v1571_v42, %v1523_v37 }
 0x285   :  { %v1737_v39 = vmax.f32 %v3735_v31, %v1677_v1 }
 0x287   :  { %v2498_v0 = vpack.c.bf16 %v1737_v39, %v1736_v24  ;;  %v1478_v32 = vpop.f32.mrf.mxu3 }
 0x288   :  { %v1620_v59 = vpop.f32.mrf.mxu2  ;;  %v1524_v8 = vpop.f32.mrf.mxu0  ;;  %v1479_v31 = vadd.f32 %v1478_v32, %v3757_v55 }
 0x289   :  { %2514 = vst [vmem:[%s3821_s3 + $0x28] sm:$0xff] %v2498_v0   ;;  %v1573_v33 = vpop.f32.mrf.mxu1  ;;  %v1525_v50 = vadd.f32 %v1524_v8, %v1476_v56  ;;  %v1621_v49 = vadd.f32 %v1620_v59, %v1572_v35 }
 0x28b   :  { %v1574_v27 = vadd.f32 %v1573_v33, %v1525_v50  ;;  %v1681_v52 = vmax.f32 %v1621_v49, 0.0 }
 0x28d   :  { %v1738_v46 = vmax.f32 %v3742_v17, %v1681_v52 }
 0x28f   :  { %v1480_v29 = vpop.f32.mrf.mxu3 }
 0x290   :  { %v1622_v34 = vpop.f32.mrf.mxu2  ;;  %v1527_v26 = vpop.f32.mrf.mxu0  ;;  %v1481_v7 = vadd.f32 %v1480_v29, %v3757_v55 }
 0x291   :  { %v1623_v22 = vadd.f32 %v1622_v34, %v1574_v27  ;;  %v1576_v58 = vpop.f32.mrf.mxu1  ;;  %v1528_v30 = vadd.f32 %v1527_v26, %v1479_v31 }
 0x293   :  { %v1685_v14 = vmax.f32 %v1623_v22, 0.0  ;;  %v1577_v28 = vadd.f32 %v1576_v58, %v1528_v30 }
 0x295   :  { %v1739_v54 = vmax.f32 %v3747_v10, %v1685_v14 }
 0x297   :  { %v2503_v2 = vpack.c.bf16 %v1739_v54, %v1738_v46 }
 0x298   :  { %v1625_v44 = vpop.f32.mrf.mxu2  ;;  %v1529_v51 = vpop.f32.mrf.mxu0 }
 0x299   :  { %2515 = vst [vmem:[%s3821_s3 + $0x30] sm:$0xff] %v2503_v2   ;;  %v1530_v40 = vadd.f32 %v1529_v51, %v1481_v7  ;;  %v1626_v13 = vadd.f32 %v1625_v44, %v1577_v28  ;;  %v1578_v60 = vpop.f32.mrf.mxu1 }
 0x29b   :  { %v1579_v62 = vadd.f32 %v1578_v60, %v1530_v40  ;;  %v1689_v17 = vmax.f32 %v1626_v13, 0.0 }
 0x29d   :  { %v1740_v15 = vmax.f32 %v3754_v57, %v1689_v17 }
 0x2a0   :  { %v1627_v9 = vpop.f32.mrf.mxu2 }
 0x2a1   :  { %v1628_v36 = vadd.f32 %v1627_v9, %v1579_v62 }
 0x2a3   :  { %v1693_v10 = vmax.f32 %v1628_v36, 0.0 }
 0x2a5   :  { %v1741_v16 = vmax.f32 %v3761_v20, %v1693_v10 }
 0x2a7   :  { %v2508_v23 = vpack.c.bf16 %v1741_v16, %v1740_v15 }
 0x2a9   :  { %2516 = vst [vmem:[%s3821_s3 + $0x38] sm:$0xff] %v2508_v23  }

// kernel: image_feature_extractor_simple.5
= control target key start
LH: loop header
LB: loop body
LE: loop exit
PB: predicated region body
PF: predicated region fallthrough
CT: control target
= control target key end

     0   :  { %vm707_vm0 = vcmask 261120   ;;  %vm1036_vm1 = vcmask 519168   ;;  %s2470_s1 = inlined_call_operand.vmem [shape: bf16[800,256], index: 1, kind: input, shape index: {}]   ;;  %s2471_s0 = inlined_call_operand.vmem [shape: bf16[32,800], index: 0, kind: input, shape index: {}]   ;;  %s2472_s2 = inlined_call_operand.vmem [shape: f32[1,256], index: 2, kind: input, shape index: {}]   ;;  %s2473_s3 = inlined_call_operand.vmem [shape: bf16[32,64], index: 3, kind: output, shape index: {}]  }
   0x1   :  { %v1159_v0 = vld [vmem:[%s2470_s1 + $0x70] sm:$0xf]  ;;  %v1534_v1 = vld [vmem:[%s2470_s1 + $0x74] sm:$0xf0]  ;;  %v1151_v11 = vld [vmem:[%s2470_s1 + $0x60] sm:$0xf] }
   0x2   :  { %v1223_v2 = vld [vmem:[%s2470_s1 + $0xf0] sm:$0xf]  ;;  %v1160_v3 = vor.u32 %v1534_v1, %v1159_v0  ;;  %v1550_v4 = vld [vmem:[%s2470_s1 + $0xf4] sm:$0xf0]  ;;  %v1532_v13 = vld [vmem:[%s2470_s1 + $0x64] sm:$0xf0] }
   0x3   :  { %v1287_v5 = vld [vmem:[%s2470_s1 + $0x170] sm:$0xf]  ;;  %v1566_v6 = vld [vmem:[%s2470_s1 + $0x174] sm:$0xf0]  ;;  %v1224_v7 = vor.u32 %v1550_v4, %v1223_v2  ;;  %v1215_v14 = vld [vmem:[%s2470_s1 + $0xe0] sm:$0xf]  ;;  %v1152_v16 = vor.u32 %v1532_v13, %v1151_v11 }
   0x4   :  { %v1288_v8 = vor.u32 %v1566_v6, %v1287_v5  ;;  %v1351_v9 = vld [vmem:[%s2470_s1 + $0x1f0] sm:$0xf]  ;;  %v1582_v10 = vld [vmem:[%s2470_s1 + $0x1f4] sm:$0xf0]  ;;  %714 = vmatpush.bf16.msra.mxu0 %v1160_v3  ;;  %v1548_v15 = vld [vmem:[%s2470_s1 + $0xe4] sm:$0xf0] }
   0x5   :  { %v1352_v12 = vor.u32 %v1582_v10, %v1351_v9  ;;  %733 = vmatpush.bf16.msra.mxu1 %v1224_v7  ;;  %v1216_v17 = vor.u32 %v1548_v15, %v1215_v14  ;;  %v1279_v18 = vld [vmem:[%s2470_s1 + $0x160] sm:$0xf]  ;;  %v1564_v19 = vld [vmem:[%s2470_s1 + $0x164] sm:$0xf0]  ;;  %v1143_v23 = vld [vmem:[%s2470_s1 + $0x50] sm:$0xf] }
   0x6   :  { %752 = vmatpush.bf16.msra.mxu2 %v1288_v8  ;;  %v1343_v20 = vld [vmem:[%s2470_s1 + $0x1e0] sm:$0xf]  ;;  %v1280_v21 = vor.u32 %v1564_v19, %v1279_v18  ;;  %v1580_v22 = vld [vmem:[%s2470_s1 + $0x1e4] sm:$0xf0]  ;;  %v1530_v24 = vld [vmem:[%s2470_s1 + $0x54] sm:$0xf0] }
   0x7   :  { %771 = vmatpush.bf16.msra.mxu3 %v1352_v12  ;;  %v1344_v25 = vor.u32 %v1580_v22, %v1343_v20  ;;  %v1207_v26 = vld [vmem:[%s2470_s1 + $0xd0] sm:$0xf]  ;;  %v1546_v27 = vld [vmem:[%s2470_s1 + $0xd4] sm:$0xf0]  ;;  %v1144_v29 = vor.u32 %v1530_v24, %v1143_v23  ;;  %v1135_v35 = vld [vmem:[%s2470_s1 + $0x40] sm:$0xf] }
   0x8   :  { %v1271_v28 = vld [vmem:[%s2470_s1 + $0x150] sm:$0xf]  ;;  %715 = vmatpush.bf16.msra.mxu0 %v1152_v16  ;;  %v1562_v30 = vld [vmem:[%s2470_s1 + $0x154] sm:$0xf0]  ;;  %v1208_v33 = vor.u32 %v1546_v27, %v1207_v26  ;;  %v1528_v36 = vld [vmem:[%s2470_s1 + $0x44] sm:$0xf0] }
   0x9   :  { %v1335_v31 = vld [vmem:[%s2470_s1 + $0x1d0] sm:$0xf]  ;;  %v1578_v32 = vld [vmem:[%s2470_s1 + $0x1d4] sm:$0xf0]  ;;  %734 = vmatpush.bf16.msra.mxu1 %v1216_v17  ;;  %v1272_v34 = vor.u32 %v1562_v30, %v1271_v28  ;;  %v1199_v37 = vld [vmem:[%s2470_s1 + $0xc0] sm:$0xf]  ;;  %v1136_v44 = vor.u32 %v1528_v36, %v1135_v35 }
   0xa   :  { %753 = vmatpush.bf16.msra.mxu2 %v1280_v21  ;;  %v1336_v38 = vor.u32 %v1578_v32, %v1335_v31  ;;  %v1544_v39 = vld [vmem:[%s2470_s1 + $0xc4] sm:$0xf0]  ;;  %v1263_v40 = vld [vmem:[%s2470_s1 + $0x140] sm:$0xf]  ;;  %v1127_v47 = vld [vmem:[%s2470_s1 + $0x30] sm:$0xf] }
   0xb   :  { %772 = vmatpush.bf16.msra.mxu3 %v1344_v25  ;;  %v1560_v41 = vld [vmem:[%s2470_s1 + $0x144] sm:$0xf0]  ;;  %v1327_v42 = vld [vmem:[%s2470_s1 + $0x1c0] sm:$0xf]  ;;  %v1200_v45 = vor.u32 %v1544_v39, %v1199_v37  ;;  %v1526_v48 = vld [vmem:[%s2470_s1 + $0x34] sm:$0xf0] }
   0xc   :  { %v1576_v43 = vld [vmem:[%s2470_s1 + $0x1c4] sm:$0xf0]  ;;  %716 = vmatpush.bf16.msra.mxu0 %v1144_v29  ;;  %v1264_v46 = vor.u32 %v1560_v41, %v1263_v40  ;;  %v1191_v49 = vld [vmem:[%s2470_s1 + $0xb0] sm:$0xf]  ;;  %v1542_v51 = vld [vmem:[%s2470_s1 + $0xb4] sm:$0xf0]  ;;  %v1128_v56 = vor.u32 %v1526_v48, %v1127_v47 }
   0xd   :  { %735 = vmatpush.bf16.msra.mxu1 %v1208_v33  ;;  %v1328_v50 = vor.u32 %v1576_v43, %v1327_v42  ;;  %v1255_v52 = vld [vmem:[%s2470_s1 + $0x130] sm:$0xf]  ;;  %v1558_v53 = vld [vmem:[%s2470_s1 + $0x134] sm:$0xf0]  ;;  %v1192_v57 = vor.u32 %v1542_v51, %v1191_v49  ;;  %v1119_v59 = vld [vmem:[%s2470_s1 + $0x20] sm:$0xf] }
   0xe   :  { %754 = vmatpush.bf16.msra.mxu2 %v1272_v34  ;;  %v1319_v54 = vld [vmem:[%s2470_s1 + $0x1b0] sm:$0xf]  ;;  %v1574_v55 = vld [vmem:[%s2470_s1 + $0x1b4] sm:$0xf0]  ;;  %v1256_v58 = vor.u32 %v1558_v53, %v1255_v52  ;;  %v1524_v60 = vld [vmem:[%s2470_s1 + $0x24] sm:$0xf0] }
   0xf   :  { %773 = vmatpush.bf16.msra.mxu3 %v1336_v38  ;;  %v1183_v61 = vld [vmem:[%s2470_s1 + $0xa0] sm:$0xf]  ;;  %v1320_v62 = vor.u32 %v1574_v55, %v1319_v54  ;;  %v1540_v63 = vld [vmem:[%s2470_s1 + $0xa4] sm:$0xf0]  ;;  %v1120_v4 = vor.u32 %v1524_v60, %v1119_v59  ;;  %v1111_v7 = vld [vmem:[%s2470_s1 + $0x10] sm:$0xf] }
  0x10   :  { %717 = vmatpush.bf16.msra.mxu0 %v1136_v44  ;;  %v1247_v0 = vld [vmem:[%s2470_s1 + $0x120] sm:$0xf]  ;;  %v1556_v1 = vld [vmem:[%s2470_s1 + $0x124] sm:$0xf0]  ;;  %v1184_v5 = vor.u32 %v1540_v63, %v1183_v61  ;;  %v1522_v8 = vld [vmem:[%s2470_s1 + $0x14] sm:$0xf0] }
  0x11   :  { %736 = vmatpush.bf16.msra.mxu1 %v1200_v45  ;;  %v1311_v2 = vld [vmem:[%s2470_s1 + $0x1a0] sm:$0xf]  ;;  %v1572_v3 = vld [vmem:[%s2470_s1 + $0x1a4] sm:$0xf0]  ;;  %v1248_v6 = vor.u32 %v1556_v1, %v1247_v0  ;;  %v1175_v9 = vld [vmem:[%s2470_s1 + $0x90] sm:$0xf]  ;;  %v1112_v17 = vor.u32 %v1522_v8, %v1111_v7 }
  0x12   :  { %755 = vmatpush.bf16.msra.mxu2 %v1264_v46  ;;  %v1312_v10 = vor.u32 %v1572_v3, %v1311_v2  ;;  %v1538_v11 = vld [vmem:[%s2470_s1 + $0x94] sm:$0xf0]  ;;  %v1239_v12 = vld [vmem:[%s2470_s1 + $0x110] sm:$0xf]  ;;  %v1103_v16 = vld [vmem:[%s2470_s1] sm:$0xf] }
  0x13   :  { %774 = vmatpush.bf16.msra.mxu3 %v1328_v50  ;;  %v1554_v13 = vld [vmem:[%s2470_s1 + $0x114] sm:$0xf0]  ;;  %v1303_v14 = vld [vmem:[%s2470_s1 + $0x190] sm:$0xf]  ;;  %v1520_v18 = vld [vmem:[%s2470_s1 + $0x4] sm:$0xf0]  ;;  %v1176_v21 = vor.u32 %v1538_v11, %v1175_v9 }
  0x14   :  { %718 = vmatpush.bf16.msra.mxu0 %v1128_v56  ;;  %v1570_v15 = vld [vmem:[%s2470_s1 + $0x194] sm:$0xf0]  ;;  %v1167_v19 = vld [vmem:[%s2470_s1 + $0x80] sm:$0xf]  ;;  %v1536_v20 = vld [vmem:[%s2470_s1 + $0x84] sm:$0xf0]  ;;  %v1240_v22 = vor.u32 %v1554_v13, %v1239_v12  ;;  %v1104_v34 = vor.u32 %v1520_v18, %v1103_v16 }
  0x15   :  { %737 = vmatpush.bf16.msra.mxu1 %v1192_v57  ;;  %v1231_v23 = vld [vmem:[%s2470_s1 + $0x100] sm:$0xf]  ;;  %v1552_v24 = vld [vmem:[%s2470_s1 + $0x104] sm:$0xf0]  ;;  %v1304_v26 = vor.u32 %v1570_v15, %v1303_v14  ;;  %v1508_v29 = vld [vmem:[%s2471_s0 + $0x18] sm:$0xf0]  ;;  %v1168_v38 = vor.u32 %v1536_v20, %v1167_v19 }
  0x16   :  { %756 = vmatpush.bf16.msra.mxu2 %v1256_v58  ;;  %v1295_v25 = vld [vmem:[%s2470_s1 + $0x180] sm:$0xf]  ;;  %v1568_v27 = vld [vmem:[%s2470_s1 + $0x184] sm:$0xf0]  ;;  %v1505_v30 = vld [vmem:[%s2471_s0 + $0x4] sm:$0xf]  ;;  %v1232_v39 = vor.u32 %v1552_v24, %v1231_v23 }
  0x17   :  { %775 = vmatpush.bf16.msra.mxu3 %v1320_v62  ;;  %v1047_v28 = vld [vmem:[%s2471_s0] sm:$0xf]  ;;  %v1415_v32 = vld [vmem:[%s2470_s1 + $0x270] sm:$0xf]  ;;  %v1598_v33 = vld [vmem:[%s2470_s1 + $0x274] sm:$0xf0]  ;;  %v1296_v43 = vor.u32 %v1568_v27, %v1295_v25 }
  0x18   :  { %719 = vmatpush.bf16.msra.mxu0 %v1120_v4  ;;  %v1049_v31 = vld [vmem:[%s2471_s0 + $0x1c] sm:$0xf0]  ;;  %v1055_v35 = vld [vmem:[%s2471_s0 + $0x8] sm:$0xf]  ;;  %v1479_v36 = vld [vmem:[%s2470_s1 + $0x2f0] sm:$0xf]  ;;  %v1416_v44 = vor.u32 %v1598_v33, %v1415_v32  ;;  %v1908_v48 = vor.u32 %v1508_v29, %v1047_v28 }
  0x19   :  { %738 = vmatpush.bf16.msra.mxu1 %v1184_v5  ;;  %v1614_v37 = vld [vmem:[%s2470_s1 + $0x2f4] sm:$0xf0]  ;;  %v1509_v40 = vld [vmem:[%s2471_s0 + $0x20] sm:$0xf0]  ;;  %v1506_v41 = vld [vmem:[%s2471_s0 + $0xc] sm:$0xf]  ;;  %v1919_v53 = vor.u32 %v1505_v30, %v1049_v31 }
  0x1a   :  { %757 = vmatpush.bf16.msra.mxu2 %v1248_v6  ;;  %v1057_v42 = vld [vmem:[%s2471_s0 + $0x24] sm:$0xf0]  ;;  %v1533_v45 = vld [vmem:[%s2470_s1 + $0x74] sm:$0xf]  ;;  %v1495_v46 = vld [vmem:[%s2470_s1 + $0x310] sm:$0xf]  ;;  %v1480_v49 = vor.u32 %v1614_v37, %v1479_v36  ;;  %v1921_v54 = vor.u32 %v1509_v40, %v1055_v35 }
  0x1b   :  { %776 = vmatpush.bf16.msra.mxu3 %v1312_v10  ;;  %v1618_v47 = vld [vmem:[%s2470_s1 + $0x314] sm:$0xf0]  ;;  %v1161_v50 = vld [vmem:[%s2470_s1 + $0x78] sm:$0xf0]  ;;  %v1407_v51 = vld [vmem:[%s2470_s1 + $0x260] sm:$0xf]  ;;  %v1929_v57 = vor.u32 %v1506_v41, %v1057_v42 }
  0x1c   :  { %720 = vmatpush.bf16.msra.mxu0 %v1112_v17  ;;  %v1596_v52 = vld [vmem:[%s2470_s1 + $0x264] sm:$0xf0]  ;;  %v1471_v55 = vld [vmem:[%s2470_s1 + $0x2e0] sm:$0xf]  ;;  %v1496_v58 = vor.u32 %v1618_v47, %v1495_v46  ;;  %v1164_v59 = vor.u32 %v1533_v45, %v1161_v50  ;;  %v1531_v61 = vld [vmem:[%s2470_s1 + $0x64] sm:$0xf] }
  0x1d   :  { %739 = vmatpush.bf16.msra.mxu1 %v1176_v21  ;;  %v1612_v56 = vld [vmem:[%s2470_s1 + $0x2e4] sm:$0xf0]  ;;  %v1408_v60 = vor.u32 %v1596_v52, %v1407_v51  ;;  %v1153_v63 = vld [vmem:[%s2470_s1 + $0x68] sm:$0xf0]  ;;  %v1399_v0 = vld [vmem:[%s2470_s1 + $0x250] sm:$0xf] }
  0x1e   :  { %758 = vmatpush.bf16.msra.mxu2 %v1240_v22  ;;  %v1472_v62 = vor.u32 %v1612_v56, %v1471_v55  ;;  %v1594_v1 = vld [vmem:[%s2470_s1 + $0x254] sm:$0xf0]  ;;  %v1463_v2 = vld [vmem:[%s2470_s1 + $0x2d0] sm:$0xf]  ;;  %v1156_v4 = vor.u32 %v1531_v61, %v1153_v63  ;;  %v1529_v6 = vld [vmem:[%s2470_s1 + $0x54] sm:$0xf] }
  0x1f   :  { %777 = vmatpush.bf16.msra.mxu3 %v1304_v26  ;;  %v1610_v3 = vld [vmem:[%s2470_s1 + $0x2d4] sm:$0xf0]  ;;  %v1400_v5 = vor.u32 %v1594_v1, %v1399_v0  ;;  %v1487_v7 = vld [vmem:[%s2470_s1 + $0x300] sm:$0xf]  ;;  %v1616_v8 = vld [vmem:[%s2470_s1 + $0x304] sm:$0xf0] }
  0x20   :  { %721 = vmatpush.bf16.msra.mxu0 %v1104_v34  ;;  %v1464_v9 = vor.u32 %v1610_v3, %v1463_v2  ;;  %v1145_v10 = vld [vmem:[%s2470_s1 + $0x58] sm:$0xf0]  ;;  %v1391_v11 = vld [vmem:[%s2470_s1 + $0x240] sm:$0xf]  ;;  %v1592_v12 = vld [vmem:[%s2470_s1 + $0x244] sm:$0xf0]  ;;  %v1488_v13 = vor.u32 %v1616_v8, %v1487_v7 }
  0x21   :  { %740 = vmatpush.bf16.msra.mxu1 %v1168_v38  ;;  %v1455_v14 = vld [vmem:[%s2470_s1 + $0x2c0] sm:$0xf]  ;;  %v1608_v15 = vld [vmem:[%s2470_s1 + $0x2c4] sm:$0xf0]  ;;  %v1148_v16 = vor.u32 %v1529_v6, %v1145_v10  ;;  %v1392_v17 = vor.u32 %v1592_v12, %v1391_v11  ;;  %v1527_v18 = vld [vmem:[%s2470_s1 + $0x44] sm:$0xf] }
  0x22   :  { %759 = vmatpush.bf16.msra.mxu2 %v1232_v39  ;;  %v1137_v19 = vld [vmem:[%s2470_s1 + $0x48] sm:$0xf0]  ;;  %v1075_v20 = vld [vmem:[%s2471_s0 + $0x38] sm:$0xf]  ;;  %v1456_v21 = vor.u32 %v1608_v15, %v1455_v14  ;;  %v1515_v22 = vld [vmem:[%s2471_s0 + $0x50] sm:$0xf0] }
  0x23   :  { %778 = vmatpush.bf16.msra.mxu3 %v1296_v43  ;;  %722 = vmatmul.bf16.vlgmr.msra.gmra.mxu0 %v1908_v48  ;;  %v1383_v23 = vld [vmem:[%s2470_s1 + $0x230] sm:$0xf]  ;;  %v1590_v24 = vld [vmem:[%s2470_s1 + $0x234] sm:$0xf0]  ;;  %v1512_v25 = vld [vmem:[%s2471_s0 + $0x3c] sm:$0xf]  ;;  %v1140_v31 = vor.u32 %v1527_v18, %v1137_v19  ;;  %v2022_v36 = vor.u32 %v1515_v22, %v1075_v20 }
  0x24   :  { %790 = vmatpush.bf16.msrb.mxu0 %v1416_v44  ;;  %741 = vmatmul.bf16.vlgmr.msra.gmra.mxu1 %v1919_v53  ;;  %v1447_v26 = vld [vmem:[%s2470_s1 + $0x2b0] sm:$0xf]  ;;  %v1606_v27 = vld [vmem:[%s2470_s1 + $0x2b4] sm:$0xf0]  ;;  %v1083_v29 = vld [vmem:[%s2471_s0 + $0x40] sm:$0xf]  ;;  %v1384_v34 = vor.u32 %v1590_v24, %v1383_v23 }
  0x25   :  { %809 = vmatpush.bf16.msrb.mxu1 %v1480_v49  ;;  %760 = vmatmul.bf16.vlgmr.msra.gmra.mxu2 %v1921_v54  ;;  %v1077_v28 = vld [vmem:[%s2471_s0 + $0x54] sm:$0xf0]  ;;  %v1516_v30 = vld [vmem:[%s2471_s0 + $0x58] sm:$0xf0]  ;;  %v1513_v32 = vld [vmem:[%s2471_s0 + $0x44] sm:$0xf]  ;;  %v1448_v37 = vor.u32 %v1606_v27, %v1447_v26 }
  0x26   :  { %779 = vmatmul.bf16.vlgmr.msra.gmra.mxu3 %v1929_v57  ;;  %834 = vmatpush.bf16.msrb.mxu2 %v1496_v58  ;;  %v1085_v33 = vld [vmem:[%s2471_s0 + $0x5c] sm:$0xf0]  ;;  %v1525_v35 = vld [vmem:[%s2470_s1 + $0x34] sm:$0xf]  ;;  %v1129_v38 = vld [vmem:[%s2470_s1 + $0x38] sm:$0xf0]  ;;  %v2033_v41 = vor.u32 %v1512_v25, %v1077_v28  ;;  %v2035_v42 = vor.u32 %v1516_v30, %v1083_v29 }
  0x27   :  { %847 = vmatpush.bf16.msrb.mxu3 %v1164_v59  ;;  %v1375_v39 = vld [vmem:[%s2470_s1 + $0x220] sm:$0xf]  ;;  %v1588_v40 = vld [vmem:[%s2470_s1 + $0x224] sm:$0xf0]  ;;  %v1581_v45 = vld [vmem:[%s2470_s1 + $0x1f4] sm:$0xf]  ;;  %v2046_v46 = vor.u32 %v1513_v32, %v1085_v33  ;;  %v1132_v49 = vor.u32 %v1525_v35, %v1129_v38 }
  0x28   :  { %791 = vmatpush.bf16.msrb.mxu0 %v1408_v60  ;;  %v1439_v43 = vld [vmem:[%s2470_s1 + $0x2a0] sm:$0xf]  ;;  %v1604_v44 = vld [vmem:[%s2470_s1 + $0x2a4] sm:$0xf0]  ;;  %v1353_v47 = vld [vmem:[%s2470_s1 + $0x1f8] sm:$0xf0]  ;;  %v1376_v50 = vor.u32 %v1588_v40, %v1375_v39 }
  0x29   :  { %810 = vmatpush.bf16.msrb.mxu1 %v1472_v62  ;;  %v1523_v51 = vld [vmem:[%s2470_s1 + $0x24] sm:$0xf]  ;;  %v1121_v52 = vld [vmem:[%s2470_s1 + $0x28] sm:$0xf0]  ;;  %v1367_v55 = vld [vmem:[%s2470_s1 + $0x210] sm:$0xf]  ;;  %v1356_v56 = vor.u32 %v1581_v45, %v1353_v47  ;;  %v1440_v58 = vor.u32 %v1604_v44, %v1439_v43 }
  0x2a   :  { %835 = vmatpush.bf16.msrb.mxu2 %v1488_v13  ;;  %v1586_v59 = vld [vmem:[%s2470_s1 + $0x214] sm:$0xf0]  ;;  %v1579_v60 = vld [vmem:[%s2470_s1 + $0x1e4] sm:$0xf]  ;;  %v1345_v61 = vld [vmem:[%s2470_s1 + $0x1e8] sm:$0xf0]  ;;  %v1124_v2 = vor.u32 %v1523_v51, %v1121_v52 }
  0x2b   :  { %848 = vmatpush.bf16.msrb.mxu3 %v1156_v4  ;;  %v1431_v62 = vld [vmem:[%s2470_s1 + $0x290] sm:$0xf]  ;;  %v1602_v63 = vld [vmem:[%s2470_s1 + $0x294] sm:$0xf0]  ;;  %v1521_v0 = vld [vmem:[%s2470_s1 + $0x14] sm:$0xf]  ;;  %v1348_v1 = vor.u32 %v1579_v60, %v1345_v61  ;;  %v1368_v3 = vor.u32 %v1586_v59, %v1367_v55 }
  0x2c   :  { %792 = vmatpush.bf16.msrb.mxu0 %v1400_v5  ;;  %v1113_v4 = vld [vmem:[%s2470_s1 + $0x18] sm:$0xf0]  ;;  %v1577_v5 = vld [vmem:[%s2470_s1 + $0x1d4] sm:$0xf]  ;;  %v1432_v7 = vor.u32 %v1602_v63, %v1431_v62  ;;  %v1359_v8 = vld [vmem:[%s2470_s1 + $0x200] sm:$0xf] }
  0x2d   :  { %811 = vmatpush.bf16.msrb.mxu1 %v1464_v9  ;;  %v1337_v6 = vld [vmem:[%s2470_s1 + $0x1d8] sm:$0xf0]  ;;  %v1584_v9 = vld [vmem:[%s2470_s1 + $0x204] sm:$0xf0]  ;;  %v1423_v10 = vld [vmem:[%s2470_s1 + $0x280] sm:$0xf] }
  0x2e   :  { %904 = vmatpush.bf16.msra.mxu2 %v1356_v56  ;;  %v1600_v11 = vld [vmem:[%s2470_s1 + $0x284] sm:$0xf0]  ;;  %v1549_v12 = vld [vmem:[%s2470_s1 + $0xf4] sm:$0xf]  ;;  %v1225_v13 = vld [vmem:[%s2470_s1 + $0xf8] sm:$0xf0]  ;;  %v1360_v18 = vor.u32 %v1584_v9, %v1359_v8 }
  0x2f   :  { %849 = vmatpush.bf16.msrb.mxu3 %v1148_v16  ;;  %v1565_v14 = vld [vmem:[%s2470_s1 + $0x174] sm:$0xf]  ;;  %v1289_v15 = vld [vmem:[%s2470_s1 + $0x178] sm:$0xf0]  ;;  %v1340_v16 = vor.u32 %v1577_v5, %v1337_v6  ;;  %v1519_v19 = vld [vmem:[%s2470_s1 + $0x4] sm:$0xf]  ;;  %v1424_v22 = vor.u32 %v1600_v11, %v1423_v10  ;;  %v1228_v26 = vor.u32 %v1549_v12, %v1225_v13 }
  0x30   :  { %793 = vmatpush.bf16.msrb.mxu0 %v1392_v17  ;;  %v1116_v17 = vor.u32 %v1521_v0, %v1113_v4  ;;  %v1575_v20 = vld [vmem:[%s2470_s1 + $0x1c4] sm:$0xf]  ;;  %v1105_v23 = vld [vmem:[%s2470_s1 + $0x8] sm:$0xf0]  ;;  %v1063_v24 = vld [vmem:[%s2471_s0 + $0x10] sm:$0xf]  ;;  %v1292_v28 = vor.u32 %v1565_v14, %v1289_v15 }
  0x31   :  { %812 = vmatpush.bf16.msrb.mxu1 %v1456_v21  ;;  %v1329_v21 = vld [vmem:[%s2470_s1 + $0x1c8] sm:$0xf0]  ;;  %v1507_v27 = vld [vmem:[%s2471_s0 + $0x14] sm:$0xf]  ;;  %v1417_v30 = vld [vmem:[%s2470_s1 + $0x278] sm:$0xf0]  ;;  %v1108_v35 = vor.u32 %v1519_v19, %v1105_v23 }
  0x32   :  { %905 = vmatpush.bf16.msra.mxu2 %v1348_v1  ;;  %v1510_v25 = vld [vmem:[%s2471_s0 + $0x28] sm:$0xf0]  ;;  %v1597_v29 = vld [vmem:[%s2470_s1 + $0x274] sm:$0xf]  ;;  %v1071_v32 = vld [vmem:[%s2471_s0 + $0x18] sm:$0xf] }
  0x33   :  { %850 = vmatpush.bf16.msrb.mxu3 %v1140_v31  ;;  %727 = vmatmul.bf16.gmra.mxu0 %v2022_v36  ;;  %v1065_v31 = vld [vmem:[%s2471_s0 + $0x2c] sm:$0xf0]  ;;  %v1511_v33 = vld [vmem:[%s2471_s0 + $0x30] sm:$0xf0]  ;;  %v1217_v38 = vld [vmem:[%s2470_s1 + $0xe8] sm:$0xf0]  ;;  %v2160_v40 = vor.u32 %v1510_v25, %v1063_v24  ;;  %v1420_v43 = vor.u32 %v1597_v29, %v1417_v30 }
  0x34   :  { %794 = vmatpush.bf16.msrb.mxu0 %v1384_v34  ;;  %746 = vmatmul.bf16.gmra.mxu1 %v2033_v41  ;;  %v1332_v34 = vor.u32 %v1575_v20, %v1329_v21  ;;  %v1563_v39 = vld [vmem:[%s2470_s1 + $0x164] sm:$0xf]  ;;  %v1281_v44 = vld [vmem:[%s2470_s1 + $0x168] sm:$0xf0]  ;;  %v1573_v45 = vld [vmem:[%s2470_s1 + $0x1b4] sm:$0xf] }
  0x35   :  { %813 = vmatpush.bf16.msrb.mxu1 %v1448_v37  ;;  %765 = vmatmul.bf16.gmra.mxu2 %v2035_v42  ;;  %v1547_v37 = vld [vmem:[%s2470_s1 + $0xe4] sm:$0xf]  ;;  %v1321_v47 = vld [vmem:[%s2470_s1 + $0x1b8] sm:$0xf0]  ;;  %v1409_v52 = vld [vmem:[%s2470_s1 + $0x268] sm:$0xf0]  ;;  %v1284_v56 = vor.u32 %v1563_v39, %v1281_v44 }
  0x36   :  { %784 = vmatmul.bf16.gmra.mxu3 %v2046_v46  ;;  %906 = vmatpush.bf16.msra.mxu2 %v1340_v16  ;;  %v1595_v51 = vld [vmem:[%s2470_s1 + $0x264] sm:$0xf]  ;;  %v1220_v55 = vor.u32 %v1547_v37, %v1217_v38  ;;  %v1209_v59 = vld [vmem:[%s2470_s1 + $0xd8] sm:$0xf0]  ;;  %v1561_v60 = vld [vmem:[%s2470_s1 + $0x154] sm:$0xf]  ;;  %v1324_v61 = vor.u32 %v1573_v45, %v1321_v47 }
  0x37   :  { %851 = vmatpush.bf16.msrb.mxu3 %v1132_v49  ;;  %v2171_v49 = vor.u32 %v1507_v27, %v1065_v31  ;;  %v1412_v62 = vor.u32 %v1595_v51, %v1409_v52  ;;  %v1273_v63 = vld [vmem:[%s2470_s1 + $0x158] sm:$0xf0]  ;;  %v1571_v0 = vld [vmem:[%s2470_s1 + $0x1a4] sm:$0xf]  ;;  %v1313_v1 = vld [vmem:[%s2470_s1 + $0x1a8] sm:$0xf0] }
  0x38   :  { %795 = vmatpush.bf16.msrb.mxu0 %v1376_v50  ;;  %v2173_v50 = vor.u32 %v1511_v33, %v1071_v32  ;;  %v1276_v5 = vor.u32 %v1561_v60, %v1273_v63  ;;  %v1543_v6 = vld [vmem:[%s2470_s1 + $0xc4] sm:$0xf]  ;;  %v1316_v9 = vor.u32 %v1571_v0, %v1313_v1  ;;  %v1265_v10 = vld [vmem:[%s2470_s1 + $0x148] sm:$0xf0]  ;;  %v1569_v11 = vld [vmem:[%s2470_s1 + $0x194] sm:$0xf] }
  0x39   :  { %814 = vmatpush.bf16.msrb.mxu1 %v1440_v58  ;;  %v1545_v58 = vld [vmem:[%s2470_s1 + $0xd4] sm:$0xf]  ;;  %v1559_v8 = vld [vmem:[%s2470_s1 + $0x144] sm:$0xf]  ;;  %v1305_v12 = vld [vmem:[%s2470_s1 + $0x198] sm:$0xf0] }
  0x3a   :  { %907 = vmatpush.bf16.msra.mxu2 %v1332_v34  ;;  %v1212_v4 = vor.u32 %v1545_v58, %v1209_v59  ;;  %v1591_v13 = vld [vmem:[%s2470_s1 + $0x244] sm:$0xf]  ;;  %v1393_v14 = vld [vmem:[%s2470_s1 + $0x248] sm:$0xf0]  ;;  %v1268_v16 = vor.u32 %v1559_v8, %v1265_v10  ;;  %v1541_v19 = vld [vmem:[%s2470_s1 + $0xb4] sm:$0xf] }
  0x3b   :  { %852 = vmatpush.bf16.msrb.mxu3 %v1124_v2  ;;  %v1593_v2 = vld [vmem:[%s2470_s1 + $0x254] sm:$0xf]  ;;  %v1193_v20 = vld [vmem:[%s2470_s1 + $0xb8] sm:$0xf0]  ;;  %v1396_v23 = vor.u32 %v1591_v13, %v1393_v14  ;;  %v1567_v25 = vld [vmem:[%s2470_s1 + $0x184] sm:$0xf] }
  0x3c   :  { %796 = vmatpush.bf16.msrb.mxu0 %v1368_v3  ;;  %v1401_v3 = vld [vmem:[%s2470_s1 + $0x258] sm:$0xf0]  ;;  %v1557_v21 = vld [vmem:[%s2470_s1 + $0x134] sm:$0xf]  ;;  %v1514_v27 = vld [vmem:[%s2471_s0 + $0x4c] sm:$0xf]  ;;  %v1196_v33 = vor.u32 %v1541_v19, %v1193_v20 }
  0x3d   :  { %815 = vmatpush.bf16.msrb.mxu1 %v1432_v7  ;;  %v1201_v7 = vld [vmem:[%s2470_s1 + $0xc8] sm:$0xf0]  ;;  %v1257_v24 = vld [vmem:[%s2470_s1 + $0x138] sm:$0xf0]  ;;  %v1093_v30 = vld [vmem:[%s2471_s0 + $0x64] sm:$0xf0] }
  0x3e   :  { %908 = vmatpush.bf16.msra.mxu2 %v1324_v61  ;;  %v1204_v15 = vor.u32 %v1543_v6, %v1201_v7  ;;  %v1385_v29 = vld [vmem:[%s2470_s1 + $0x238] sm:$0xf0]  ;;  %v1099_v31 = vld [vmem:[%s2471_s0 + $0x50] sm:$0xf]  ;;  %v1518_v32 = vld [vmem:[%s2471_s0 + $0x68] sm:$0xf0]  ;;  %v1260_v34 = vor.u32 %v1557_v21, %v1257_v24  ;;  %v2296_v52 = vor.u32 %v1514_v27, %v1093_v30 }
  0x3f   :  { %853 = vmatpush.bf16.msrb.mxu3 %v1116_v17  ;;  %v1091_v17 = vld [vmem:[%s2471_s0 + $0x48] sm:$0xf]  ;;  %v1185_v37 = vld [vmem:[%s2470_s1 + $0xa8] sm:$0xf0]  ;;  %v1555_v38 = vld [vmem:[%s2470_s1 + $0x124] sm:$0xf] }
  0x40   :  { %797 = vmatpush.bf16.msrb.mxu0 %v1360_v18  ;;  %v1517_v18 = vld [vmem:[%s2471_s0 + $0x60] sm:$0xf0]  ;;  %v1249_v45 = vld [vmem:[%s2470_s1 + $0x128] sm:$0xf0]  ;;  %v1613_v47 = vld [vmem:[%s2470_s1 + $0x2f4] sm:$0xf] }
  0x41   :  { %816 = vmatpush.bf16.msrb.mxu1 %v1424_v22  ;;  %v1308_v22 = vor.u32 %v1569_v11, %v1305_v12  ;;  %v1481_v51 = vld [vmem:[%s2470_s1 + $0x2f8] sm:$0xf0]  ;;  %v1377_v58 = vld [vmem:[%s2470_s1 + $0x228] sm:$0xf0]  ;;  %v1252_v60 = vor.u32 %v1555_v38, %v1249_v45  ;;  %v1537_v61 = vld [vmem:[%s2470_s1 + $0x94] sm:$0xf] }
  0x42   :  { %909 = vmatpush.bf16.msra.mxu2 %v1316_v9  ;;  %v1553_v63 = vld [vmem:[%s2470_s1 + $0x114] sm:$0xf]  ;;  %v1484_v0 = vor.u32 %v1613_v47, %v1481_v51  ;;  %v1369_v6 = vld [vmem:[%s2470_s1 + $0x218] sm:$0xf0]  ;;  %v1535_v9 = vld [vmem:[%s2470_s1 + $0x84] sm:$0xf] }
  0x43   :  { %854 = vmatpush.bf16.msrb.mxu3 %v1108_v35  ;;  %798 = vmatmul.bf16.vlgmr.msrb.gmra.mxu0 %v2160_v40  ;;  %v1539_v35 = vld [vmem:[%s2470_s1 + $0xa4] sm:$0xf]  ;;  %v1233_v12 = vld [vmem:[%s2470_s1 + $0x108] sm:$0xf0]  ;;  %v1465_v19 = vld [vmem:[%s2470_s1 + $0x2d8] sm:$0xf0] }
  0x44   :  { %866 = vmatpush.bf16.msra.mxu0 %v1228_v26  ;;  %817 = vmatmul.bf16.vlgmr.msrb.gmra.mxu1 %v2171_v49  ;;  %v1297_v26 = vld [vmem:[%s2470_s1 + $0x188] sm:$0xf0]  ;;  %v1188_v59 = vor.u32 %v1539_v35, %v1185_v37  ;;  %v1583_v13 = vld [vmem:[%s2470_s1 + $0x204] sm:$0xf]  ;;  %v1605_v30 = vld [vmem:[%s2470_s1 + $0x2b4] sm:$0xf] }
  0x45   :  { %885 = vmatpush.bf16.msra.mxu1 %v1292_v28  ;;  %1501 = vmatmul.msk.bf16.vlgmr.msrb.gmra.mxu2 %vm707_vm0, %v2173_v50  ;;  %v1589_v28 = vld [vmem:[%s2470_s1 + $0x234] sm:$0xf]  ;;  %v1300_v39 = vor.u32 %v1567_v25, %v1297_v26  ;;  %v1361_v14 = vld [vmem:[%s2470_s1 + $0x208] sm:$0xf0]  ;;  %v1615_v24 = vld [vmem:[%s2470_s1 + $0x304] sm:$0xf] }
  0x46   :  { %855 = vmatmul.bf16.vlgmr.msrb.gmra.mxu3 %v1908_v48  ;;  %v1404_v48 = vor.u32 %v1593_v2, %v1401_v3  ;;  %910 = vmatpush.bf16.msra.mxu2 %v1308_v22  ;;  %v1388_v44 = vor.u32 %v1589_v28, %v1385_v29  ;;  %v1241_v2 = vld [vmem:[%s2470_s1 + $0x118] sm:$0xf0]  ;;  %v1611_v3 = vld [vmem:[%s2470_s1 + $0x2e4] sm:$0xf]  ;;  %v1364_v21 = vor.u32 %v1583_v13, %v1361_v14  ;;  %v1489_v25 = vld [vmem:[%s2470_s1 + $0x308] sm:$0xf0] }
  0x47   :  { %923 = vmatpush.bf16.msra.mxu3 %v1420_v43  ;;  %v2285_v43 = vor.u32 %v1517_v18, %v1091_v17  ;;  %v1244_v8 = vor.u32 %v1553_v63, %v1241_v2  ;;  %v1609_v18 = vld [vmem:[%s2470_s1 + $0x2d4] sm:$0xf]  ;;  %v1607_v26 = vld [vmem:[%s2470_s1 + $0x2c4] sm:$0xf]  ;;  %v1457_v27 = vld [vmem:[%s2470_s1 + $0x2c8] sm:$0xf0]  ;;  %v1492_v28 = vor.u32 %v1615_v24, %v1489_v25 }
  0x48   :  { %867 = vmatpush.bf16.msra.mxu0 %v1220_v55  ;;  %v2298_v55 = vor.u32 %v1518_v32, %v1099_v31  ;;  %v1460_v29 = vor.u32 %v1607_v26, %v1457_v27  ;;  %v1449_v31 = vld [vmem:[%s2470_s1 + $0x2b8] sm:$0xf0]  ;;  %v1599_v35 = vld [vmem:[%s2470_s1 + $0x284] sm:$0xf]  ;;  %v1425_v37 = vld [vmem:[%s2470_s1 + $0x288] sm:$0xf0] }
  0x49   :  { %886 = vmatpush.bf16.msra.mxu1 %v1284_v56  ;;  %v1587_v56 = vld [vmem:[%s2470_s1 + $0x224] sm:$0xf]  ;;  %v1452_v32 = vor.u32 %v1605_v30, %v1449_v31  ;;  %v1428_v38 = vor.u32 %v1599_v35, %v1425_v37 }
  0x4a   :  { %911 = vmatpush.bf16.msra.mxu2 %v1300_v39  ;;  %v1380_v1 = vor.u32 %v1587_v56, %v1377_v58 }
  0x4b   :  { %924 = vmatpush.bf16.msra.mxu3 %v1412_v62  ;;  %v1177_v62 = vld [vmem:[%s2470_s1 + $0x98] sm:$0xf0] }
  0x4c   :  { %868 = vmatpush.bf16.msra.mxu0 %v1212_v4  ;;  %v1473_v4 = vld [vmem:[%s2470_s1 + $0x2e8] sm:$0xf0]  ;;  %v1180_v7 = vor.u32 %v1537_v61, %v1177_v62 }
  0x4d   :  { %887 = vmatpush.bf16.msra.mxu1 %v1276_v5  ;;  %v1585_v5 = vld [vmem:[%s2470_s1 + $0x214] sm:$0xf]  ;;  %v1476_v10 = vor.u32 %v1611_v3, %v1473_v4 }
  0x4e   :  { %1619 = vmatpush.bf16.msrb.mxu2 %v1484_v0  ;;  %v1372_v11 = vor.u32 %v1585_v5, %v1369_v6 }
  0x4f   :  { %925 = vmatpush.bf16.msra.mxu3 %v1404_v48  ;;  %v1169_v48 = vld [vmem:[%s2470_s1 + $0x88] sm:$0xf0] }
  0x50   :  { %869 = vmatpush.bf16.msra.mxu0 %v1204_v15  ;;  %v1617_v15 = vld [vmem:[%s2470_s1 + $0x314] sm:$0xf]  ;;  %v1172_v17 = vor.u32 %v1535_v9, %v1169_v48 }
  0x51   :  { %888 = vmatpush.bf16.msra.mxu1 %v1268_v16  ;;  %v1497_v16 = vld [vmem:[%s2470_s1 + $0x318] sm:$0xf0] }
  0x52   :  { %1620 = vmatpush.bf16.msrb.mxu2 %v1476_v10  ;;  %v1500_v22 = vor.u32 %v1617_v15, %v1497_v16 }
  0x53   :  { %926 = vmatpush.bf16.msra.mxu3 %v1396_v23  ;;  %803 = vmatmul.bf16.gmra.mxu0 %v2285_v43  ;;  %v1468_v23 = vor.u32 %v1609_v18, %v1465_v19 }
  0x54   :  { %870 = vmatpush.bf16.msra.mxu0 %v1196_v33  ;;  %822 = vmatmul.bf16.gmra.mxu1 %v2296_v52  ;;  %v1603_v33 = vld [vmem:[%s2470_s1 + $0x2a4] sm:$0xf] }
  0x55   :  { %889 = vmatpush.bf16.msra.mxu1 %v1260_v34  ;;  %1502 = vmatmul.msk.bf16.gmra.mxu2 %vm707_vm0, %v2298_v55  ;;  %v1441_v34 = vld [vmem:[%s2470_s1 + $0x2a8] sm:$0xf0] }
  0x56   :  { %860 = vmatmul.bf16.gmra.mxu3 %v2022_v36  ;;  %v1551_v36 = vld [vmem:[%s2470_s1 + $0x104] sm:$0xf]  ;;  %1621 = vmatpush.bf16.msrb.mxu2 %v1468_v23 }
  0x57   :  { %927 = vmatpush.bf16.msra.mxu3 %v1388_v44  ;;  %v1236_v20 = vor.u32 %v1551_v36, %v1233_v12 }
  0x58   :  { %871 = vmatpush.bf16.msra.mxu0 %v1188_v59 }
  0x59   :  { %890 = vmatpush.bf16.msra.mxu1 %v1252_v60 }
  0x5a   :  { %1622 = vmatpush.bf16.msrb.mxu2 %v1460_v29 }
  0x5b   :  { %928 = vmatpush.bf16.msra.mxu3 %v1380_v1 }
  0x5c   :  { %872 = vmatpush.bf16.msra.mxu0 %v1180_v7 }
  0x5d   :  { %891 = vmatpush.bf16.msra.mxu1 %v1244_v8 }
  0x5e   :  { %1623 = vmatpush.bf16.msrb.mxu2 %v1452_v32 }
  0x5f   :  { %929 = vmatpush.bf16.msra.mxu3 %v1372_v11 }
  0x60   :  { %873 = vmatpush.bf16.msra.mxu0 %v1172_v17 }
  0x61   :  { %892 = vmatpush.bf16.msra.mxu1 %v1236_v20 }
  0x63   :  { %930 = vmatpush.bf16.msra.mxu3 %v1364_v21  ;;  %874 = vmatmul.bf16.vlgmr.msra.gmra.mxu0 %v1919_v53  ;;  %v1444_v53 = vor.u32 %v1603_v33, %v1441_v34 }
  0x64   :  { %942 = vmatpush.bf16.msrb.mxu0 %v1484_v0  ;;  %893 = vmatmul.bf16.vlgmr.msra.gmra.mxu1 %v1921_v54  ;;  %v1601_v54 = vld [vmem:[%s2470_s1 + $0x294] sm:$0xf] }
  0x65   :  { %967 = vmatpush.bf16.msrb.mxu1 %v1500_v22  ;;  %912 = vmatmul.bf16.vlgmr.msra.gmra.mxu2 %v1929_v57  ;;  %v1433_v57 = vld [vmem:[%s2470_s1 + $0x298] sm:$0xf0] }
  0x66   :  { %931 = vmatmul.bf16.vlgmr.msra.gmra.mxu3 %v2160_v40  ;;  %1624 = vmatpush.bf16.msrb.mxu2 %v1444_v53  ;;  %v1436_v40 = vor.u32 %v1601_v54, %v1433_v57 }
  0x67   :  { %1627 = vmatpush.bf16.msrb.mxu3 %v1500_v22 }
  0x68   :  { %943 = vmatpush.bf16.msrb.mxu0 %v1476_v10 }
  0x69   :  { %968 = vmatpush.bf16.msrb.mxu1 %v1492_v28 }
  0x6a   :  { %1625 = vmatpush.bf16.msrb.mxu2 %v1436_v40 }
  0x6b   :  { %1628 = vmatpush.bf16.msrb.mxu3 %v1492_v28 }
  0x6c   :  { %944 = vmatpush.bf16.msrb.mxu0 %v1468_v23 }
  0x6e   :  { %1626 = vmatpush.bf16.msrb.mxu2 %v1428_v38 }
  0x70   :  { %945 = vmatpush.bf16.msrb.mxu0 %v1460_v29 }
  0x73   :  { %879 = vmatmul.bf16.gmra.mxu0 %v2033_v41 }
  0x74   :  { %946 = vmatpush.bf16.msrb.mxu0 %v1452_v32  ;;  %898 = vmatmul.bf16.gmra.mxu1 %v2035_v42 }
  0x75   :  { %917 = vmatmul.bf16.gmra.mxu2 %v2046_v46 }
  0x76   :  { %936 = vmatmul.bf16.gmra.mxu3 %v2285_v43 }
  0x78   :  { %947 = vmatpush.bf16.msrb.mxu0 %v1444_v53 }
  0x7c   :  { %948 = vmatpush.bf16.msrb.mxu0 %v1436_v40 }
  0x80   :  { %949 = vmatpush.bf16.msrb.mxu0 %v1428_v38 }
  0x83   :  { %950 = vmatmul.bf16.vlgmr.msrb.gmra.mxu0 %v2171_v49  ;;  %v2418_v49 = vld [vmem:[%s2472_s2] sm:$0x3]  ;;  %s1650_s2 = smov 64  }
  0x84   :  { %1503 = vmatmul.msk.bf16.vlgmr.msrb.gmra.mxu1 %vm707_vm0, %v2173_v50  ;;  %v133_v50 = vperm.slane %v2418_v49, 0 }
  0x85   :  { %955 = vmatmul.bf16.vlgmr.msrb.gmra.mxu2 %v2296_v52 }
  0x86   :  { %1504 = vmatmul.msk.bf16.vlgmr.msrb.gmra.mxu3 %vm707_vm0, %v2298_v55 }
  0xa0   :  { %v723_v41 = vpop.f32.mrf.mxu0 }
  0xa1   :  { %v742_v39 = vpop.f32.mrf.mxu1  ;;  %v724_v60 = vadd.f32 %v723_v41, %v133_v50 }
  0xa3   :  { %v743_v63 = vadd.f32 %v742_v39, %v724_v60 }
  0xa8   :  { %v761_v42 = vpop.f32.mrf.mxu2  ;;  %v725_v46 = vpop.f32.mrf.mxu0 }
  0xa9   :  { %v780_v44 = vpop.f32.mrf.mxu3  ;;  %v744_v45 = vpop.f32.mrf.mxu1  ;;  %v726_v61 = vadd.f32 %v725_v46, %v133_v50  ;;  %v762_v3 = vadd.f32 %v761_v42, %v743_v63 }
  0xab   :  { %v745_v4 = vadd.f32 %v744_v45, %v726_v61  ;;  %v781_v6 = vadd.f32 %v780_v44, %v762_v3 }
  0xb0   :  { %v763_v43 = vpop.f32.mrf.mxu2  ;;  %v728_v51 = vpop.f32.mrf.mxu0 }
  0xb1   :  { %v782_v47 = vpop.f32.mrf.mxu3  ;;  %v747_v56 = vpop.f32.mrf.mxu1  ;;  %v764_v5 = vadd.f32 %v763_v43, %v745_v4  ;;  %v729_v12 = vadd.f32 %v728_v51, %v133_v50 }
  0xb3   :  { %v783_v8 = vadd.f32 %v782_v47, %v764_v5  ;;  %v748_v18 = vadd.f32 %v747_v56, %v729_v12 }
  0xb8   :  { %v766_v52 = vpop.f32.mrf.mxu2  ;;  %v730_v55 = vpop.f32.mrf.mxu0 }
  0xb9   :  { %v785_v58 = vpop.f32.mrf.mxu3  ;;  %v749_v59 = vpop.f32.mrf.mxu1  ;;  %v731_v14 = vadd.f32 %v730_v55, %v133_v50  ;;  %v767_v23 = vadd.f32 %v766_v52, %v748_v18 }
  0xbb   :  { %v750_v24 = vadd.f32 %v749_v59, %v731_v14  ;;  %v786_v29 = vadd.f32 %v785_v58, %v767_v23  ;;  %v134_v59 = vperm.slane %v2418_v49, 1 }
  0xc0   :  { %v768_v62 = vpop.f32.mrf.mxu2  ;;  %v799_v1 = vpop.f32.mrf.mxu0 }
  0xc1   :  { %v787_v0 = vpop.f32.mrf.mxu3  ;;  %v818_v2 = vpop.f32.mrf.mxu1  ;;  %v800_v9 = vadd.f32 %v799_v1, %v781_v6  ;;  %v769_v27 = vadd.f32 %v768_v62, %v750_v24 }
  0xc3   :  { %v819_v13 = vadd.f32 %v818_v2, %v800_v9  ;;  %v788_v31 = vadd.f32 %v787_v0, %v769_v27 }
  0xc8   :  { %v837_v7 = vpop.f32.mrf.mxu2  ;;  %v801_v10 = vpop.f32.mrf.mxu0 }
  0xc9   :  { %v856_v48 = vpop.f32.mrf.mxu3  ;;  %v820_v11 = vpop.f32.mrf.mxu1  ;;  %v802_v36 = vadd.f32 %v801_v10, %v783_v8  ;;  %v2421_v15 = vadd.f32 %v837_v7, %v819_v13 }
  0xca   :  { %v857_v60 = vadd.f32 %v856_v48, %v134_v59 }
  0xcb   :  { %v821_v16 = vadd.f32 %v820_v11, %v802_v36  ;;  %v980_v25 = vmax.f32 %v2421_v15, 0.0 }
  0xd0   :  { %v839_v17 = vpop.f32.mrf.mxu2  ;;  %v804_v21 = vpop.f32.mrf.mxu0 }
  0xd1   :  { %v2423_v19 = vadd.f32 %v839_v17, %v821_v16  ;;  %v858_v20 = vpop.f32.mrf.mxu3  ;;  %v823_v22 = vpop.f32.mrf.mxu1  ;;  %v805_v32 = vadd.f32 %v804_v21, %v786_v29 }
  0xd2   :  { %v859_v2 = vadd.f32 %v858_v20, %v134_v59 }
  0xd3   :  { %v982_v26 = vmax.f32 %v2423_v19, 0.0  ;;  %v824_v57 = vadd.f32 %v823_v22, %v805_v32 }
  0xd5   :  { %v1630_v28 = vpack.i.bf16 %v982_v26, %v980_v25 }
  0xd7   :  { %1631 = vrot.lane.b32.xlu0 %v1630_v28, %s1650_s2 }
  0xd8   :  { %v842_v30 = vpop.f32.mrf.mxu2  ;;  %v806_v34 = vpop.f32.mrf.mxu0 }
  0xd9   :  { %v861_v33 = vpop.f32.mrf.mxu3  ;;  %v825_v53 = vpop.f32.mrf.mxu1  ;;  %v807_v54 = vadd.f32 %v806_v34, %v788_v31  ;;  %v2432_v40 = vadd.f32 %v842_v30, %v824_v57 }
  0xda   :  { %v862_v5 = vadd.f32 %v861_v33, %v134_v59 }
  0xdb   :  { %v826_v35 = vadd.f32 %v825_v53, %v807_v54  ;;  %v984_v44 = vmax.f32 %v2432_v40, 0.0 }
  0xe0   :  { %v844_v37 = vpop.f32.mrf.mxu2  ;;  %v875_v39 = vpop.f32.mrf.mxu0 }
  0xe1   :  { %v2434_v38 = vadd.f32 %v844_v37, %v826_v35  ;;  %v863_v41 = vpop.f32.mrf.mxu3  ;;  %v894_v42 = vpop.f32.mrf.mxu1  ;;  %v876_v0 = vadd.f32 %v875_v39, %v857_v60 }
  0xe2   :  { %v864_v12 = vadd.f32 %v863_v41, %v134_v59 }
  0xe3   :  { %v986_v46 = vmax.f32 %v2434_v38, 0.0  ;;  %v895_v3 = vadd.f32 %v894_v42, %v876_v0 }
  0xe5   :  { %v1635_v45 = vpack.i.bf16 %v986_v46, %v984_v44 }
  0xe7   :  { %1636 = vrot.lane.b32.xlu0 %v1635_v45, %s1650_s2 }
  0xe8   :  { %v913_v43 = vpop.f32.mrf.mxu2  ;;  %v877_v51 = vpop.f32.mrf.mxu0 }
  0xe9   :  { %v932_v47 = vpop.f32.mrf.mxu3  ;;  %v896_v56 = vpop.f32.mrf.mxu1  ;;  %v878_v4 = vadd.f32 %v877_v51, %v859_v2  ;;  %v914_v6 = vadd.f32 %v913_v43, %v895_v3 }
  0xeb   :  { %v897_v10 = vadd.f32 %v896_v56, %v878_v4  ;;  %v933_v13 = vadd.f32 %v932_v47, %v914_v6 }
  0xf0   :  { %v915_v52 = vpop.f32.mrf.mxu2  ;;  %v880_v58 = vpop.f32.mrf.mxu0 }
  0xf1   :  { %v934_v50 = vpop.f32.mrf.mxu3  ;;  %v899_v55 = vpop.f32.mrf.mxu1  ;;  %v881_v11 = vadd.f32 %v880_v58, %v862_v5  ;;  %v916_v49 = vadd.f32 %v915_v52, %v897_v10 }
  0xf3   :  { %v900_v14 = vadd.f32 %v899_v55, %v881_v11  ;;  %v935_v17 = vadd.f32 %v934_v50, %v916_v49 }
  0xf8   :  { %v918_v61 = vpop.f32.mrf.mxu2  ;;  %v882_v63 = vpop.f32.mrf.mxu0 }
  0xf9   :  { %v937_v62 = vpop.f32.mrf.mxu3  ;;  %v901_v1 = vpop.f32.mrf.mxu1  ;;  %v883_v48 = vadd.f32 %v882_v63, %v864_v12  ;;  %v919_v18 = vadd.f32 %v918_v61, %v900_v14 }
  0xfb   :  { %v902_v20 = vadd.f32 %v901_v1, %v883_v48  ;;  %v938_v30 = vadd.f32 %v937_v62, %v919_v18 }
 0x100   :  { %v920_v7 = vpop.f32.mrf.mxu2  ;;  %v951_v9 = vpop.f32.mrf.mxu0 }
 0x101   :  { %v939_v8 = vpop.f32.mrf.mxu3  ;;  %v970_v36 = vpop.f32.mrf.mxu1  ;;  %v952_v16 = vadd.f32 %v951_v9, %v933_v13  ;;  %v921_v28 = vadd.f32 %v920_v7, %v902_v20 }
 0x103   :  { %v971_v24 = vadd.f32 %v970_v36, %v952_v16  ;;  %v940_v53 = vadd.f32 %v939_v8, %v921_v28 }
 0x105   :  { %v981_v32 = vmax.f32 %v971_v24, 0.0 }
 0x108   :  { %v956_v21 = vpop.f32.mrf.mxu2  ;;  %v953_v23 = vpop.f32.mrf.mxu0 }
 0x109   :  { %v975_v22 = vpop.f32.mrf.mxu3  ;;  %v954_v27 = vadd.f32 %v953_v23, %v935_v17  ;;  %v972_v29 = vpop.f32.mrf.mxu1  ;;  %v957_v33 = vadd.f32 %v956_v21, %v938_v30 }
 0x10b   :  { %v973_v31 = vadd.f32 %v972_v29, %v954_v27  ;;  %v976_v37 = vadd.f32 %v975_v22, %v957_v33 }
 0x10d   :  { %v983_v34 = vmax.f32 %v973_v31, 0.0  ;;  %v985_v45 = vmax.f32 %v976_v37, 0.0 }
 0x10f   :  { %v1640_v57 = vpack.i.bf16 %v983_v34, %v981_v32 }
 0x110   :  { %v958_v54 = vpop.f32.mrf.mxu2 }
 0x111   :  { %v959_v35 = vadd.f32 %v958_v54, %v940_v53  ;;  %v977_v41 = vpop.f32.mrf.mxu3  ;;  %1641 = vrot.lane.b32.xlu1 %v1640_v57, %s1650_s2 }
 0x113   :  { %v978_v39 = vadd.f32 %v977_v41, %v959_v35 }
 0x115   :  { %v987_v42 = vmax.f32 %v978_v39, 0.0 }
 0x117   :  { %v1645_v43 = vpack.i.bf16 %v987_v42, %v985_v45 }
 0x119   :  { %1646 = vrot.lane.b32.xlu1 %v1645_v43, %s1650_s2 }
 0x149   :  { %v1632_v47 = vpop.permute.xlu0 %1631 }
 0x14a   :  { %v1634_v51 = vunpack.i.h.bf16 %v1632_v47  ;;  %v1633_v56 = vunpack.i.l.bf16 %v1632_v47 }
 0x14c   :  { %v1005_v52 = vmax.f32 %v982_v26, %v1634_v51  ;;  %v1004_v50 = vmax.f32 %v980_v25, %v1633_v56 }
 0x14e   :  { %v1008_v59 = vmax.f32 %v1004_v50, %v981_v32  ;;  %v1009_v60 = vmax.f32 %v1005_v52, %v983_v34 }
 0x159   :  { %v1637_v58 = vpop.permute.xlu0 %1636 }
 0x15a   :  { %v1639_v61 = vunpack.i.h.bf16 %v1637_v58  ;;  %v1638_v62 = vunpack.i.l.bf16 %v1637_v58 }
 0x15c   :  { %v1007_v3 = vmax.f32 %v986_v46, %v1639_v61  ;;  %v1006_v19 = vmax.f32 %v984_v44, %v1638_v62 }
 0x15e   :  { %v1010_v38 = vmax.f32 %v1006_v19, %v985_v45  ;;  %v1011_v46 = vmax.f32 %v1007_v3, %v987_v42 }
 0x183   :  { %v1642_v55 = vpop.permute.xlu1 %1641 }
 0x184   :  { %v1644_v63 = vunpack.i.h.bf16 %v1642_v55  ;;  %v1643_v0 = vunpack.i.l.bf16 %v1642_v55 }
 0x186   :  { %v1028_v1 = vmax.f32 %v1008_v59, %v1643_v0  ;;  %v1029_v2 = vmax.f32 %v1009_v60, %v1644_v63 }
 0x188   :  { %v1032_v26 = vpack.c.bf16 %v1028_v1, %v1028_v1  ;;  %v1033_v15 = vpack.c.bf16 %v1029_v2, %v1029_v2 }
 0x18a   :  { %1037 = vst.msk [vmem:[%s2473_s3] sm:$0xf] %vm1036_vm1, %v1032_v26 }
 0x18b   :  { %1038 = vst.msk [vmem:[%s2473_s3 + $0x4] sm:$0xf] %vm1036_vm1, %v1033_v15  ;;  %v1647_v25 = vpop.permute.xlu1 %1646 }
 0x18c   :  { %v1649_v4 = vunpack.i.h.bf16 %v1647_v25  ;;  %v1648_v5 = vunpack.i.l.bf16 %v1647_v25 }
 0x18e   :  { %v1030_v6 = vmax.f32 %v1010_v38, %v1648_v5  ;;  %v1031_v40 = vmax.f32 %v1011_v46, %v1649_v4 }
 0x190   :  { %v1034_v44 = vpack.c.bf16 %v1030_v6, %v1030_v6  ;;  %v1035_v7 = vpack.c.bf16 %v1031_v40, %v1031_v40 }
 0x192   :  { %1039 = vst.msk [vmem:[%s2473_s3 + $0x8] sm:$0xf] %vm1036_vm1, %v1034_v44 }
 0x193   :  { %1040 = vst.msk [vmem:[%s2473_s3 + $0xc] sm:$0xf] %vm1036_vm1, %v1035_v7 }

// kernel: image_feature_extractor_simple.6
= control target key start
LH: loop header
LB: loop body
LE: loop exit
PB: predicated region body
PF: predicated region fallthrough
CT: control target
= control target key end

     0   :  { %vm327_vm0 = vcmask 523264   ;;  %s728_s1 = inlined_call_operand.vmem [shape: bf16[576,128], index: 1, kind: input, shape index: {}]   ;;  %s729_s2 = inlined_call_operand.vmem [shape: f32[1,128], index: 2, kind: input, shape index: {}]   ;;  %s730_s0 = inlined_call_operand.vmem [shape: bf16[8,576], index: 0, kind: input, shape index: {}]   ;;  %s731_s3 = inlined_call_operand.vmem [shape: bf16[8,128], index: 3, kind: output, shape index: {}]  }
   0x1   :  { %v555_v0 = vld [vmem:[%s728_s1 + $0x38] sm:$0xff]  ;;  %v554_v4 = vld [vmem:[%s728_s1 + $0x30] sm:$0xff]  ;;  %v553_v8 = vld [vmem:[%s728_s1 + $0x28] sm:$0xff] }
   0x2   :  { %v571_v1 = vld [vmem:[%s728_s1 + $0xb8] sm:$0xff]  ;;  %331 = vmatpush.bf16.msra.mxu0 %v555_v0  ;;  %v570_v5 = vld [vmem:[%s728_s1 + $0xb0] sm:$0xff]  ;;  %v569_v9 = vld [vmem:[%s728_s1 + $0xa8] sm:$0xff] }
   0x3   :  { %v579_v2 = vld [vmem:[%s728_s1 + $0xf8] sm:$0xff]  ;;  %357 = vmatpush.bf16.msra.mxu2 %v571_v1  ;;  %v578_v6 = vld [vmem:[%s728_s1 + $0xf0] sm:$0xff]  ;;  %v577_v10 = vld [vmem:[%s728_s1 + $0xe8] sm:$0xff] }
   0x4   :  { %v563_v3 = vld [vmem:[%s728_s1 + $0x78] sm:$0xff]  ;;  %370 = vmatpush.bf16.msra.mxu3 %v579_v2  ;;  %v562_v7 = vld [vmem:[%s728_s1 + $0x70] sm:$0xff]  ;;  %v561_v11 = vld [vmem:[%s728_s1 + $0x68] sm:$0xff] }
   0x5   :  { %344 = vmatpush.bf16.msra.mxu1 %v563_v3  ;;  %v552_v12 = vld [vmem:[%s728_s1 + $0x20] sm:$0xff]  ;;  %v551_v16 = vld [vmem:[%s728_s1 + $0x18] sm:$0xff]  ;;  %v550_v20 = vld [vmem:[%s728_s1 + $0x10] sm:$0xff] }
   0x6   :  { %332 = vmatpush.bf16.msra.mxu0 %v554_v4  ;;  %v568_v13 = vld [vmem:[%s728_s1 + $0xa0] sm:$0xff]  ;;  %v567_v17 = vld [vmem:[%s728_s1 + $0x98] sm:$0xff]  ;;  %v566_v21 = vld [vmem:[%s728_s1 + $0x90] sm:$0xff] }
   0x7   :  { %358 = vmatpush.bf16.msra.mxu2 %v570_v5  ;;  %v576_v14 = vld [vmem:[%s728_s1 + $0xe0] sm:$0xff]  ;;  %v575_v18 = vld [vmem:[%s728_s1 + $0xd8] sm:$0xff]  ;;  %v574_v22 = vld [vmem:[%s728_s1 + $0xd0] sm:$0xff] }
   0x8   :  { %371 = vmatpush.bf16.msra.mxu3 %v578_v6  ;;  %v560_v15 = vld [vmem:[%s728_s1 + $0x60] sm:$0xff]  ;;  %v559_v19 = vld [vmem:[%s728_s1 + $0x58] sm:$0xff]  ;;  %v558_v23 = vld [vmem:[%s728_s1 + $0x50] sm:$0xff] }
   0x9   :  { %345 = vmatpush.bf16.msra.mxu1 %v562_v7  ;;  %v549_v24 = vld [vmem:[%s728_s1 + $0x8] sm:$0xff]  ;;  %v15_v26 = vld [vmem:[%s730_s0] sm:$0xff]  ;;  %v583_v38 = vld [vmem:[%s728_s1 + $0x118] sm:$0xff] }
   0xa   :  { %333 = vmatpush.bf16.msra.mxu0 %v553_v8  ;;  %v565_v25 = vld [vmem:[%s728_s1 + $0x88] sm:$0xff]  ;;  %v97_v30 = vunpack.c.l.b16 %v15_v26  ;;  %v548_v32 = vld [vmem:[%s728_s1] sm:$0xff]  ;;  %v98_v35 = vunpack.c.h.b16 %v15_v26  ;;  %v582_v43 = vld [vmem:[%s728_s1 + $0x110] sm:$0xff] }
   0xb   :  { %359 = vmatpush.bf16.msra.mxu2 %v569_v9  ;;  %v16_v27 = vld [vmem:[%s730_s0 + $0x8] sm:$0xff]  ;;  %v564_v33 = vld [vmem:[%s728_s1 + $0x80] sm:$0xff]  ;;  %v17_v45 = vld [vmem:[%s730_s0 + $0x10] sm:$0xf] }
   0xc   :  { %372 = vmatpush.bf16.msra.mxu3 %v577_v10  ;;  %v573_v28 = vld [vmem:[%s728_s1 + $0xc8] sm:$0xff]  ;;  %v99_v31 = vunpack.c.l.b16 %v16_v27  ;;  %v100_v34 = vunpack.c.h.b16 %v16_v27  ;;  %v572_v36 = vld [vmem:[%s728_s1 + $0xc0] sm:$0xff]  ;;  %v102_v39 = vpack.c.b16 %v97_v30, %v97_v30  ;;  %v103_v42 = vpack.c.b16 %v98_v35, %v98_v35 }
   0xd   :  { %346 = vmatpush.bf16.msra.mxu1 %v561_v11  ;;  %v557_v29 = vld [vmem:[%s728_s1 + $0x48] sm:$0xff]  ;;  %v556_v37 = vld [vmem:[%s728_s1 + $0x40] sm:$0xff]  ;;  %v101_v47 = vunpack.c.l.b16 %v17_v45 }
   0xe   :  { %334 = vmatpush.bf16.msra.mxu0 %v552_v12  ;;  %v104_v40 = vpack.c.b16 %v99_v31, %v99_v31  ;;  %v105_v41 = vpack.c.b16 %v100_v34, %v100_v34  ;;  %v581_v44 = vld [vmem:[%s728_s1 + $0x108] sm:$0xff]  ;;  %v580_v46 = vld [vmem:[%s728_s1 + $0x100] sm:$0xff] }
   0xf   :  { %360 = vmatpush.bf16.msra.mxu2 %v568_v13  ;;  %v106_v48 = vpack.c.b16 %v101_v47, %v101_v47  ;;  %v584_v50 = vld [vmem:[%s729_s2] ss:$0 sm:$0xff] }
  0x10   :  { %373 = vmatpush.bf16.msra.mxu3 %v576_v14 }
  0x11   :  { %347 = vmatpush.bf16.msra.mxu1 %v560_v15 }
  0x12   :  { %335 = vmatpush.bf16.msra.mxu0 %v551_v16 }
  0x13   :  { %361 = vmatpush.bf16.msra.mxu2 %v567_v17 }
  0x14   :  { %374 = vmatpush.bf16.msra.mxu3 %v575_v18 }
  0x15   :  { %348 = vmatpush.bf16.msra.mxu1 %v559_v19 }
  0x16   :  { %336 = vmatpush.bf16.msra.mxu0 %v550_v20 }
  0x17   :  { %362 = vmatpush.bf16.msra.mxu2 %v566_v21 }
  0x18   :  { %375 = vmatpush.bf16.msra.mxu3 %v574_v22 }
  0x19   :  { %349 = vmatpush.bf16.msra.mxu1 %v558_v23 }
  0x1a   :  { %337 = vmatpush.bf16.msra.mxu0 %v549_v24 }
  0x1b   :  { %363 = vmatpush.bf16.msra.mxu2 %v565_v25 }
  0x1c   :  { %376 = vmatpush.bf16.msra.mxu3 %v573_v28 }
  0x1d   :  { %350 = vmatpush.bf16.msra.mxu1 %v557_v29 }
  0x1e   :  { %338 = vmatpush.bf16.msra.mxu0 %v548_v32 }
  0x1f   :  { %364 = vmatpush.bf16.msra.mxu2 %v564_v33 }
  0x20   :  { %377 = vmatpush.bf16.msra.mxu3 %v572_v36 }
  0x21   :  { %351 = vmatpush.bf16.msra.mxu1 %v556_v37  ;;  %339 = vmatmul.bf16.vlgmr.msra.gmra.mxu0 %v102_v39 }
  0x22   :  { %387 = vmatpush.bf16.msrb.mxu0 %v583_v38  ;;  %365 = vmatmul.bf16.vlgmr.msra.gmra.mxu2 %v104_v40 }
  0x23   :  { %378 = vmatmul.bf16.vlgmr.msra.gmra.mxu3 %v105_v41 }
  0x24   :  { %352 = vmatmul.bf16.vlgmr.msra.gmra.mxu1 %v103_v42 }
  0x26   :  { %388 = vmatpush.bf16.msrb.mxu0 %v582_v43 }
  0x2a   :  { %389 = vmatpush.bf16.msrb.mxu0 %v581_v44 }
  0x2e   :  { %390 = vmatpush.bf16.msrb.mxu0 %v580_v46 }
  0x31   :  { %547 = vmatmul.msk.bf16.vlgmr.msrb.gmra.mxu0 %vm327_vm0, %v106_v48 }
  0x9e   :  { %v340_v49 = vpop.f32.mrf.mxu0 }
  0x9f   :  { %v341_v52 = vadd.f32 %v584_v50, %v340_v49 }
  0xa1   :  { %v353_v51 = vpop.f32.mrf.mxu1 }
  0xa2   :  { %v354_v56 = vadd.f32 %v353_v51, %v341_v52 }
  0xa5   :  { %v366_v53 = vpop.f32.mrf.mxu2 }
  0xa6   :  { %v379_v54 = vpop.f32.mrf.mxu3  ;;  %v342_v55 = vpop.f32.mrf.mxu0  ;;  %v367_v58 = vadd.f32 %v366_v53, %v354_v56 }
  0xa8   :  { %v380_v60 = vadd.f32 %v379_v54, %v367_v58 }
  0xa9   :  { %v355_v57 = vpop.f32.mrf.mxu1 }
  0xad   :  { %v368_v59 = vpop.f32.mrf.mxu2 }
  0xae   :  { %v381_v61 = vpop.f32.mrf.mxu3  ;;  %v392_v62 = vpop.f32.mrf.mxu0 }
  0xaf   :  { %v393_v63 = vadd.f32 %v392_v62, %v380_v60 }
  0xb1   :  { %v396_v0 = vmax.f32 %v393_v63, 0.0 }
  0xb3   :  { %v397_v1 = vpack.c.bf16 %v396_v0, %v396_v0 }
  0xb5   :  { %398 = vst [vmem:[%s731_s3] sm:$0xf] %v397_v1 }
  0xb6   :  { %v394_v2 = vpop.f32.mrf.mxu0 }

// kernel: image_feature_extractor_simple.7
= control target key start
LH: loop header
LB: loop body
LE: loop exit
PB: predicated region body
PF: predicated region fallthrough
CT: control target
= control target key end

     0   :  { %v223_v1 = vmov 4.0   ;;  %vm19_vm0 = vcmask 1043456   ;;  %s281_s0 = inlined_call_operand.vmem [shape: bf16[2,4,128], index: 0, kind: input, shape index: {}]   ;;  %s282_s1 = inlined_call_operand.vmem [shape: bf16[128,128], index: 1, kind: input, shape index: {}]   ;;  %s283_s2 = inlined_call_operand.vmem [shape: f32[1,128], index: 2, kind: input, shape index: {}]   ;;  %s284_s3 = inlined_call_operand.hbm [shape: f32[2,128], index: 3, kind: output, shape index: {}]  }
   0x1   :  { %v191_v0 = vld [vmem:[%s282_s1 + $0x38] sm:$0xff]  ;;  %195 = vrcp.f32 %v223_v1  ;;  %v190_v2 = vld [vmem:[%s282_s1 + $0x30] sm:$0xff]  ;;  %v15_v3 = vld [vmem:[%s281_s0] sm:$0x3] }
   0x2   :  { %121 = vmatpush.bf16.msra.mxu0 %v191_v0  ;;  %v16_v4 = vld [vmem:[%s281_s0 + $0x2] sm:$0x3]  ;;  %v17_v5 = vunpack.c.l.bf16 %v15_v3 }
   0x3   :  { %v18_v6 = vunpack.c.l.bf16 %v16_v4 }
   0x4   :  { %8 = vsyncpa [#allocation3], 0  ;;  %v20_v7 = vsel %vm19_vm0, %v17_v5, 0.0  ;;  %v189_v8 = vld [vmem:[%s282_s1 + $0x28] sm:$0xff]  ;;  %v188_v16 = vld [vmem:[%s282_s1 + $0x20] sm:$0xff]  ;;  %vm69_vm2 = vcmask 1041409  }
   0x5   :  { %v21_v9 = vrot.slane %v20_v7, 4  ;;  %v27_v10 = vsel %vm19_vm0, %v18_v6, 0.0  ;;  %v187_v23 = vld [vmem:[%s282_s1 + $0x18] sm:$0xff]  ;;  %v186_v30 = vld [vmem:[%s282_s1 + $0x10] sm:$0xff]  ;;  %v185_v35 = vld [vmem:[%s282_s1 + $0x8] sm:$0xff]  ;;  %s224_s6 = smov [#allocation2]  }
   0x6   :  { %122 = vmatpush.bf16.msra.mxu0 %v190_v2  ;;  %v28_v12 = vrot.slane %v27_v10, 4  ;;  %v184_v38 = vld [vmem:[%s282_s1] sm:$0xff]  ;;  %s141_s7 = sshll.u32 %s224_s6, 4  ;;  %s143_s10 = sshll.u32 %s284_s3, 4  ;;  %s142_s7 = int_to_ptr.vmem [resolvable:$true] %s141_s7  ;;  %s144_s10 = int_to_ptr.hbm [resolvable:$true] %s143_s10 }
   0x7   :  { %v196_v11 = vpop.eup %195  ;;  %v22_v13 = vadd.f32 %v21_v9, %v20_v7  ;;  %v194_v41 = vld [vmem:[%s283_s2] ss:$0 sm:$0xff] }
   0x8   :  { %v35_v14 = vmul.f32 4.0, %v196_v11  ;;  %v29_v15 = vadd.f32 %v28_v12, %v27_v10  ;;  %vm39_vm1 = vweird.f32 %v196_v11 }
   0x9   :  { %v23_v17 = vrot.slane %v22_v13, 2 }
   0xa   :  { %123 = vmatpush.bf16.msra.mxu0 %v189_v8  ;;  %v36_v18 = vsub.f32 1.0, %v35_v14  ;;  %v30_v19 = vrot.slane %v29_v15, 2 }
   0xb   :  { %v24_v20 = vadd.f32 %v23_v17, %v22_v13 }
   0xc   :  { %v37_v21 = vmul.f32 %v196_v11, %v36_v18  ;;  %v31_v22 = vadd.f32 %v30_v19, %v29_v15 }
   0xd   :  { %v25_v24 = vrot.slane %v24_v20, 1 }
   0xe   :  { %124 = vmatpush.bf16.msra.mxu0 %v188_v16  ;;  %v38_v25 = vadd.f32 %v196_v11, %v37_v21  ;;  %v32_v26 = vrot.slane %v31_v22, 1 }
   0xf   :  { %v26_v27 = vadd.f32 %v25_v24, %v24_v20 }
  0x10   :  { %v40_v28 = vsel %vm39_vm1, %v196_v11, %v38_v25  ;;  %v33_v29 = vadd.f32 %v32_v26, %v31_v22 }
  0x11   :  { %v41_v31 = vmul.f32 %v40_v28, %v26_v27 }
  0x12   :  { %125 = vmatpush.bf16.msra.mxu0 %v187_v23  ;;  %v42_v32 = vmul.f32 %v40_v28, %v33_v29 }
  0x13   :  { %v43_v33 = vpack.c.bf16 %v41_v31, %v41_v31 }
  0x14   :  { %v44_v34 = vpack.c.bf16 %v42_v32, %v42_v32 }
  0x15   :  { %v67_v36 = vunpack.c.l.b16 %v43_v33 }
  0x16   :  { %126 = vmatpush.bf16.msra.mxu0 %v186_v30  ;;  %v68_v37 = vunpack.c.l.b16 %v44_v34 }
  0x18   :  { %v70_v39 = vsel %vm69_vm2, %v68_v37, %v67_v36 }
  0x19   :  { %v71_v40 = vpack.c.b16 %v70_v39, %v70_v39 }
  0x1a   :  { %127 = vmatpush.bf16.msra.mxu0 %v185_v35 }
  0x1e   :  { %128 = vmatpush.bf16.msra.mxu0 %v184_v38 }
  0x21   :  { %129 = vmatmul.bf16.vlgmr.msra.gmra.mxu0 %v71_v40 }
  0x9e   :  { %v130_v42 = vpop.f32.mrf.mxu0 }
  0x9f   :  { %v131_v43 = vadd.f32 %v194_v41, %v130_v42 }
  0xa1   :  { %v134_v44 = vmax.f32 %v131_v43, 0.0 }
  0xa3   :  { %135 = vst [vmem:[#allocation2] sm:$0x3] %v134_v44 }
  0xa4   :  { %146 = dma.vmem_to_hbm [thread:$0]  %s142_s7, 32, %s144_s10, [#allocation3]  }
  0xa6   :  { %v132_v45 = vpop.f32.mrf.mxu0 }
  0xa7   :  { %221 = dma.done.wait [#allocation3], 32  }
  0xa8   :  { %222 = vsyncadd [#allocation3], 4294967264 }
  0xa9   :  { %151 = vsyncpa [#allocation3], 1 }

</bundles_post_ra>
